<compile_context>
chip_gen: v7x
topology: tpu7x:2x2x1
jax: 0.10.0
libtpu: 0.0.40
codegen_flags: <defaults>
</compile_context>

<pallas_src>
import math
from itertools import product

import numpy as np
import jax
import jax.numpy as jnp
from jax.experimental import pallas as pl
from jax.experimental.pallas import tpu as pltpu

NUM_CLASSES = 21
MB = 1024 * 1024
LANES = 128
SUBLANES = 8
M_MAX = 4096                     # max MXU M (rows*cols) per grid step
CONV_TILE_BUDGET = 6 * MB        # per-row-tile budget: bf16 patch + f32 dot result
POOL_TILE_BUDGET = 4 * MB
NEG = float(jnp.finfo(jnp.bfloat16).min)   # max-pool padding value

VOC_CFG = {
    'num_classes': 21,
    'feature_maps': [38, 19, 10, 5, 3, 1],
    'min_dim': 300,
    'steps': [8, 16, 32, 64, 100, 300],
    'min_sizes': [30, 60, 111, 162, 213, 264],
    'max_sizes': [60, 111, 162, 213, 264, 315],
    'aspect_ratios': [[2], [2, 3], [2, 3], [2, 3], [2], [2]],
    'variance': [0.1, 0.2],
    'clip': True,
}


# ------------------------------------------------------------------ helpers ---

def _cdiv(a, b):
    return -(-a // b)


def _round_up(a, m):
    return _cdiv(a, m) * m


_VMEM_LIMIT = None


def _vmem_limit_bytes():
    """Generation-aware scoped-VMEM budget (review item 4)."""
    global _VMEM_LIMIT
    if _VMEM_LIMIT is None:
        cap = 128 * MB
        try:
            info = pltpu.get_tpu_info()
            cap = int(getattr(info, "vmem_capacity_bytes", cap))
        except Exception:
            pass
        _VMEM_LIMIT = max(32 * MB, min(cap - 24 * MB, 96 * MB))
    return _VMEM_LIMIT


def _tile_rows(Ho, Wo_pad, bytes_per_out_row, budget):
    """Pick output-row tile TH (cdiv grid, no divisor rule) and rebalance so the last
    tile is not mostly padding (review item 3)."""
    th = min(Ho,
             max(1, budget // max(1, bytes_per_out_row)),
             max(1, M_MAX // Wo_pad))
    nt = _cdiv(Ho, th)
    th = _cdiv(Ho, nt)
    nt = _cdiv(Ho, th)
    return th, nt


def _cparams(n_axes):
    return pltpu.CompilerParams(
        dimension_semantics=("parallel",) * n_axes,
        vmem_limit_bytes=_vmem_limit_bytes())


# ------------------------------------------------------------------ kernels ---

def _conv_kernel_1x1(relu):
    """1x1 conv: true row-tiled input block (no halo), single MXU dot, fused bias/ReLU."""
    def kernel(x_ref, w_ref, b_ref, o_ref):
        _, th, wp, cin = x_ref.shape
        lhs = x_ref[0].reshape(th * wp, cin)
        acc = jnp.dot(lhs, w_ref[...], preferred_element_type=jnp.float32) + b_ref[...]
        if relu:
            acc = jnp.maximum(acc, 0.0)
        o_ref[...] = acc.reshape(1, th, wp, acc.shape[-1]).astype(o_ref.dtype)
    return kernel


def _conv_kernel_kxk(taps, TH, Wo_pad, Cin, relu):
    """KxK conv: resident padded sample slab; the KT taps are packed into a VMEM patch
    (K = KT*Cin) and contracted in ONE dot (review items 1+2: no per-tap f32 acc RMW)."""
    def kernel(x_ref, w_ref, b_ref, o_ref, patch_ref):
        r0 = pl.program_id(1) * TH
        for ti, (base, roff, coff) in enumerate(taps):
            xs = x_ref[0, pl.ds(base + roff + r0, TH), pl.ds(coff, Wo_pad), :]
            patch_ref[:, ti * Cin:(ti + 1) * Cin] = xs.reshape(TH * Wo_pad, Cin)
        acc = jnp.dot(patch_ref[...], w_ref[...],
                      preferred_element_type=jnp.float32) + b_ref[...]
        if relu:
            acc = jnp.maximum(acc, 0.0)
        o_ref[...] = acc.reshape(1, TH, Wo_pad, acc.shape[-1]).astype(o_ref.dtype)
    return kernel


def _pool_2x2_kernel(x_ref, o_ref):
    """Row pairing of a column-pre-paired slab: contiguous loads + leading-dim reshape."""
    _, th2, wp, c = x_ref.shape
    xs = x_ref[0].reshape(th2 // 2, 2, wp, c)
    o_ref[...] = jnp.maximum(xs[:, 0], xs[:, 1])[None].astype(o_ref.dtype)


def _pool_3x3_s1_kernel(TH, Wo_pad):
    """3x3 / stride-1 max pool (pool5): halo taps, max-accumulate."""
    taps = [(i, j) for i in range(3) for j in range(3)]

    def kernel(x_ref, o_ref):
        r0 = pl.program_id(1) * TH
        acc = None
        for (roff, coff) in taps:
            xs = x_ref[0, pl.ds(roff + r0, TH), pl.ds(coff, Wo_pad), :]
            acc = xs if acc is None else jnp.maximum(acc, xs)
        o_ref[...] = acc[None].astype(o_ref.dtype)
    return kernel


def _l2norm_kernel(x_ref, g_ref, o_ref):
    x = x_ref[0].astype(jnp.float32)                       # (H, W, C)
    inv = jax.lax.rsqrt(jnp.sum(x * x, axis=-1, keepdims=True) + 1e-12)
    o_ref[...] = ((x * inv * g_ref[...]).astype(o_ref.dtype))[None]


# ----------------------------------------------------------------- wrappers ---

def conv2d(x, w, b, *, stride=1, pad=0, dilation=1, relu=True,
           out_dtype=jnp.bfloat16):
    """x: (N,H,W,Cin), w: (KH,KW,Cin,Cout), b: (Cout,) -> (N,Ho,Wo,Cout)."""
    N, H, W, Cin = x.shape
    KH, KW, wcin, Cout = w.shape
    assert wcin == Cin
    s, d = stride, dilation
    x = x.astype(jnp.bfloat16)
    w = w.astype(jnp.bfloat16)
    b = b.astype(jnp.float32)

    # Tiny-Cin 3x3 (conv1_1, Cin=3): XLA space-to-depth of the 9 taps once, then the
    # kernel's single dot sees K = 9*Cin (review item 1, fixes the old Cin=3 TODO).
    if KH * KW > 1 and Cin < 32:
        assert s == 1 and d == 1
        Ho, Wo = H + 2 * pad - (KH - 1), W + 2 * pad - (KW - 1)
        xp = jnp.pad(x, ((0, 0), (pad, pad), (pad, pad), (0, 0)))
        patches = [xp[:, i:i + Ho, j:j + Wo, :]
                   for i in range(KH) for j in range(KW)]
        return conv2d(jnp.concatenate(patches, axis=-1),
                      w.reshape(1, 1, KH * KW * Cin, Cout), b,
                      stride=1, pad=0, dilation=1, relu=relu, out_dtype=out_dtype)

    Ho = (H + 2 * pad - d * (KH - 1) - 1) // s + 1
    Wo = (W + 2 * pad - d * (KW - 1) - 1) // s + 1
    Wo_pad = _round_up(Wo, SUBLANES)                      # lane/sublane-clean merges
    Kfold = KH * KW * Cin
    bpr = Wo_pad * (2 * Kfold + 4 * Cout)                 # bf16 patch + f32 dot result
    TH, nt = _tile_rows(Ho, Wo_pad, bpr, CONV_TILE_BUDGET)
    Ho_pad = nt * TH
    M = TH * Wo_pad

    wm = w.reshape(Kfold, Cout)                           # (KT*Cin, Cout), tap-major
    bm = b.reshape(1, Cout)
    cost = pl.CostEstimate(
        flops=2 * N * Ho * Wo * Kfold * Cout, transcendentals=0,
        bytes_accessed=(N * H * W * Cin * 2 + Kfold * Cout * 2 + Cout * 4
                        + N * Ho * Wo * Cout * jnp.dtype(out_dtype).itemsize))

    if KH == 1 and KW == 1:
        xf = jnp.pad(x, ((0, 0), (0, Ho_pad - H), (0, Wo_pad - W), (0, 0)))
        out = pl.pallas_call(
            _conv_kernel_1x1(relu),
            out_shape=jax.ShapeDtypeStruct((N, Ho_pad, Wo_pad, Cout), out_dtype),
            grid=(N, nt),
            in_specs=[pl.BlockSpec((1, TH, Wo_pad, Cin), lambda n, t: (n, t, 0, 0)),
                      pl.BlockSpec((Kfold, Cout), lambda n, t: (0, 0)),
                      pl.BlockSpec((1, Cout), lambda n, t: (0, 0))],
            out_specs=pl.BlockSpec((1, TH, Wo_pad, Cout), lambda n, t: (n, t, 0, 0)),
            compiler_params=_cparams(2), cost_estimate=cost,
        )(xf, wm, bm)
    else:
        if s == 1:
            rows = Ho_pad + d * (KH - 1)
            cols = Wo_pad + d * (KW - 1)
            xf = jnp.pad(x, ((0, 0), (pad, rows - H - pad),
                             (pad, cols - W - pad), (0, 0)))
            taps = [(0, i * d, j * d) for i in range(KH) for j in range(KW)]
        else:
            # SSD extras only: 3x3, stride 2, pad 1.  Space-to-depth phase fold on these
            # tiny maps keeps the kernel's tap slices unit-stride.
            assert s == 2 and KH == 3 and KW == 3 and d == 1 and pad == 1
            Hq, Wq = Ho_pad + 1, Wo_pad + 1
            xp = jnp.pad(x, ((0, 0), (pad, 2 * Hq - H - pad),
                             (pad, 2 * Wq - W - pad), (0, 0)))
            xf = jnp.concatenate([xp[:, rp::2, cp::2, :]
                                  for rp in range(2) for cp in range(2)], axis=1)
            rows, cols = 4 * Hq, Wq
            taps = [(((i % 2) * 2 + (j % 2)) * Hq, i // 2, j // 2)
                    for i in range(3) for j in range(3)]
        out = pl.pallas_call(
            _conv_kernel_kxk(taps, TH, Wo_pad, Cin, relu),
            out_shape=jax.ShapeDtypeStruct((N, Ho_pad, Wo_pad, Cout), out_dtype),
            grid=(N, nt),
            in_specs=[pl.BlockSpec((1, rows, cols, Cin), lambda n, t: (n, 0, 0, 0)),
                      pl.BlockSpec((Kfold, Cout), lambda n, t: (0, 0)),
                      pl.BlockSpec((1, Cout), lambda n, t: (0, 0))],
            out_specs=pl.BlockSpec((1, TH, Wo_pad, Cout), lambda n, t: (n, t, 0, 0)),
            scratch_shapes=[pltpu.VMEM((M, Kfold), jnp.bfloat16)],
            compiler_params=_cparams(2), cost_estimate=cost,
        )(xf, wm, bm)

    if Ho_pad != Ho or Wo_pad != Wo:
        out = out[:, :Ho, :Wo, :]
    return out


def maxpool_2x2(x, ceil_mode=False):
    """2x2 / stride-2 max pool.  Column pairs are reduced by one fused XLA slice+pad+max
    (single read of x — the old phase-fold concat is gone, review item 7); the Pallas
    kernel does the row pairing with contiguous, non-overlapping row-tiled blocks."""
    N, H, W, C = x.shape
    x = x.astype(jnp.bfloat16)
    Ho = _cdiv(H, 2) if ceil_mode else H // 2
    Wo = _cdiv(W, 2) if ceil_mode else W // 2
    Wo_pad = _round_up(Wo, SUBLANES)
    bpr = Wo_pad * C * 2 * 3                       # two input rows + one output row, bf16
    TH, nt = _tile_rows(Ho, Wo_pad, bpr, POOL_TILE_BUDGET)
    Ho_pad = nt * TH
    Hc, Wc = 2 * Ho_pad, 2 * Wo_pad
    x = x[:, :min(H, Hc), :min(W, Wc), :]                       # floor-mode crop
    x = jnp.pad(x, ((0, 0), (0, Hc - x.shape[1]), (0, Wc - x.shape[2]), (0, 0)),
                constant_values=NEG)                            # ceil-mode / align pad
    xw = jnp.maximum(x[:, :, 0::2, :], x[:, :, 1::2, :])        # (N, Hc, Wo_pad, C)

    out = pl.pallas_call(
        _pool_2x2_kernel,
        out_shape=jax.ShapeDtypeStruct((N, Ho_pad, Wo_pad, C), jnp.bfloat16),
        grid=(N, nt),
        in_specs=[pl.BlockSpec((1, 2 * TH, Wo_pad, C), lambda n, t: (n, t, 0, 0))],
        out_specs=pl.BlockSpec((1, TH, Wo_pad, C), lambda n, t: (n, t, 0, 0)),
        compiler_params=_cparams(2),
    )(xw)
    if Ho_pad != Ho or Wo_pad != Wo:
        out = out[:, :Ho, :Wo, :]
    return out


def maxpool_3x3_s1(x, pad=1):
    """3x3 / stride-1 / pad-1 max pool (pool5): halo taps on a resident slab."""
    N, H, W, C = x.shape
    x = x.astype(jnp.bfloat16)
    Ho, Wo = H + 2 * pad - 2, W + 2 * pad - 2
    Wo_pad = _round_up(Wo, SUBLANES)
    bpr = Wo_pad * C * 2 * 2
    TH, nt = _tile_rows(Ho, Wo_pad, bpr, POOL_TILE_BUDGET)
    Ho_pad = nt * TH
    rows, cols = Ho_pad + 2, Wo_pad + 2
    xf = jnp.pad(x, ((0, 0), (pad, rows - H - pad), (pad, cols - W - pad), (0, 0)),
                 constant_values=NEG)
    out = pl.pallas_call(
        _pool_3x3_s1_kernel(TH, Wo_pad),
        out_shape=jax.ShapeDtypeStruct((N, Ho_pad, Wo_pad, C), jnp.bfloat16),
        grid=(N, nt),
        in_specs=[pl.BlockSpec((1, rows, cols, C), lambda n, t: (n, 0, 0, 0))],
        out_specs=pl.BlockSpec((1, TH, Wo_pad, C), lambda n, t: (n, t, 0, 0)),
        compiler_params=_cparams(2),
    )(xf)
    if Ho_pad != Ho or Wo_pad != Wo:
        out = out[:, :Ho, :Wo, :]
    return out


def l2norm(x, gamma):
    N, H, W, C = x.shape
    return pl.pallas_call(
        _l2norm_kernel,
        out_shape=jax.ShapeDtypeStruct((N, H, W, C), jnp.bfloat16),
        grid=(N,),
        in_specs=[pl.BlockSpec((1, H, W, C), lambda n: (n, 0, 0, 0)),
                  pl.BlockSpec((1, C), lambda n: (0, 0))],
        out_specs=pl.BlockSpec((1, H, W, C), lambda n: (n, 0, 0, 0)),
        compiler_params=_cparams(1),
    )(x.astype(jnp.bfloat16), gamma.astype(jnp.float32).reshape(1, C))


# ----------------------------------------------------------------- priorbox ---

def priorbox_voc():
    cfg = VOC_CFG
    image_size = cfg['min_dim']
    mean = []
    for k, f in enumerate(cfg['feature_maps']):
        for i, j in product(range(f), repeat=2):
            f_k = image_size / cfg['steps'][k]
            cx = (j + 0.5) / f_k
            cy = (i + 0.5) / f_k
            s_k = cfg['min_sizes'][k] / image_size
            mean += [cx, cy, s_k, s_k]
            s_k_prime = math.sqrt(s_k * (cfg['max_sizes'][k] / image_size))
            mean += [cx, cy, s_k_prime, s_k_prime]
            for ar in cfg['aspect_ratios'][k]:
                mean += [cx, cy, s_k * math.sqrt(ar), s_k / math.sqrt(ar)]
                mean += [cx, cy, s_k / math.sqrt(ar), s_k * math.sqrt(ar)]
    out = np.asarray(mean, dtype=np.float32).reshape(-1, 4)
    if cfg['clip']:
        np.clip(out, 0.0, 1.0, out=out)
    return jnp.asarray(out)


# -------------------------------------------------------------------- model ---

def _conv_w(key, kh, kw, cin, cout):
    w = jax.random.normal(key, (kh, kw, cin, cout), jnp.float32)
    w = w * np.float32(math.sqrt(2.0 / (kh * kw * cin)))
    return w, jnp.zeros((cout,), jnp.float32)


def build_ssd_params(key, num_classes=NUM_CLASSES):
    keys = iter(jax.random.split(key, 64))

    def nk():
        return next(keys)

    def conv_entry(cin_log, cin_phys, cout_log, k=3, s=1, p=1, dil=1, relu=True):
        # Zero-pad Cin/Cout to the physical (>=128-lane) widths (review item 11).
        w, b = _conv_w(nk(), k, k, cin_log, cout_log)
        cout_phys = _round_up(cout_log, LANES)
        if cout_phys != cout_log or cin_phys != cin_log:
            w = jnp.pad(w, ((0, 0), (0, 0),
                            (0, cin_phys - cin_log), (0, cout_phys - cout_log)))
            b = jnp.pad(b, (0, cout_phys - cout_log))
        layer = {'type': 'conv', 'w': w.astype(jnp.bfloat16), 'b': b,
                 'stride': s, 'pad': p, 'dil': dil, 'relu': relu}
        return layer, cout_log, cout_phys

    base_cfg = [64, 64, 'M', 128, 128, 'M', 256, 256, 256, 'C',
                512, 512, 512, 'M', 512, 512, 512]

    def make_layers(cfg, cin_log, cin_phys):
        layers = []
        for v in cfg:
            if v == 'M':
                layers.append({'type': 'pool2', 'ceil': False})
            elif v == 'C':
                layers.append({'type': 'pool2', 'ceil': True})
            else:
                ly, cin_log, cin_phys = conv_entry(cin_log, cin_phys, v)
                layers.append(ly)
        return layers, cin_log, cin_phys

    # vgg[0..22] in torch indexing: through relu(conv4_3)
    vgg1, c_log, c_phys = make_layers(base_cfg[:13], 3, 3)
    # vgg[23..]: pool4 + conv5_x, then pool5 + dilated conv6 + conv7
    vgg2, c_log, c_phys = make_layers(base_cfg[13:], c_log, c_phys)
    vgg2.append({'type': 'pool5'})
    ly, c_log, c_phys = conv_entry(c_log, c_phys, 1024, k=3, s=1, p=6, dil=6)
    vgg2.append(ly)
    ly, c_log, c_phys = conv_entry(c_log, c_phys, 1024, k=1, s=1, p=0)
    vgg2.append(ly)

    # SSD300 extras; the last two 3x3 convs use pad=1 (instead of 0) for the small input.
    extras_cfg = [
        (1024, 256, 1, 1, 0), (256, 512, 3, 2, 1),
        (512, 128, 1, 1, 0), (128, 256, 3, 2, 1),
        (256, 128, 1, 1, 0), (128, 256, 3, 1, 1),
        (256, 128, 1, 1, 0), (128, 256, 3, 1, 1),
    ]
    extras = []
    for cin, cout, k, s, p in extras_cfg:
        ly, _, _ = conv_entry(cin, cin, cout, k=k, s=s, p=p)
        extras.append(ly)

    # Fused loc+conf heads per source; Cout zero-padded to a multiple of 128 so head
    # stores are lane-dense; real channels are sliced back out in the wrapper.
    mbox = [4, 6, 6, 6, 4, 4]
    src_ch = [512, 1024, 512, 256, 256, 256]
    heads = []
    for m, ch in zip(mbox, src_ch):
        nl, nc = m * 4, m * num_classes
        wl, bl = _conv_w(nk(), 3, 3, ch, nl)
        wc, bc = _conv_w(nk(), 3, 3, ch, nc)
        cpad = _round_up(nl + nc, LANES)
        w = jnp.concatenate(
            [wl, wc, jnp.zeros((3, 3, ch, cpad - nl - nc), jnp.float32)], axis=3)
        b = jnp.concatenate([bl, bc, jnp.zeros((cpad - nl - nc,), jnp.float32)])
        heads.append({'w': w.astype(jnp.bfloat16), 'b': b, 'n_loc': nl, 'n_conf': nc})

    return {
        'vgg1': vgg1, 'vgg2': vgg2, 'extras': extras, 'heads': heads,
        'l2norm_gamma': jnp.full((512,), 20.0, jnp.float32),   # L2Norm(512, 20)
        'priors': priorbox_voc(),
    }


def apply_layer(x, layer):
    t = layer['type']
    if t == 'conv':
        return conv2d(x, layer['w'], layer['b'], stride=layer['stride'],
                      pad=layer['pad'], dilation=layer['dil'], relu=layer['relu'])
    if t == 'pool2':
        return maxpool_2x2(x, ceil_mode=layer['ceil'])
    if t == 'pool5':
        return maxpool_3x3_s1(x, pad=1)
    raise ValueError(t)


def ssd_forward(params, x_nchw):
    """phase='train' forward: returns (loc (N,P,4), conf (N,P,21), priors)."""
    x = jnp.transpose(x_nchw, (0, 2, 3, 1)).astype(jnp.bfloat16)   # NCHW -> NHWC
    sources = []
    for layer in params['vgg1']:
        x = apply_layer(x, layer)
    sources.append(l2norm(x, params['l2norm_gamma']))
    for layer in params['vgg2']:
        x = apply_layer(x, layer)
    sources.append(x)
    for k, layer in enumerate(params['extras']):   # relu fused in conv kernel
        x = apply_layer(x, layer)
        if k % 2 == 1:
            sources.append(x)

    N = x.shape[0]
    loc_flat, conf_flat = [], []
    for src, hd in zip(sources, params['heads']):
        # one fused (loc|conf) conv per source; f32, lane-dense (padded) Cout
        y = conv2d(src, hd['w'], hd['b'], stride=1, pad=1, dilation=1,
                   relu=False, out_dtype=jnp.float32)
        nl, nc = hd['n_loc'], hd['n_conf']
        loc_flat.append(y[..., :nl].reshape(N, -1))            # NHWC flatten ==
        conf_flat.append(y[..., nl:nl + nc].reshape(N, -1))    # permute(0,2,3,1).view
    loc = jnp.concatenate(loc_flat, axis=1)
    conf = jnp.concatenate(conf_flat, axis=1)
    return (loc.reshape(N, -1, 4),
            conf.reshape(N, -1, NUM_CLASSES),
            params['priors'])


# ------------------------------------------------------------- self checks ---

def _self_check():
    """Small numeric checks of the Pallas conv/pool paths against lax references."""
    key = jax.random.PRNGKey(1)
    kx, kw, kp = jax.random.split(key, 3)
    x = jax.random.normal(kx, (2, 13, 11, 128), jnp.float32)
    w = jax.random.normal(kw, (3, 3, 128, 256), jnp.float32) * 0.05
    b = jnp.linspace(-0.5, 0.5, 256, dtype=jnp.float32)
    xb = x.astype(jnp.bfloat16).astype(jnp.float32)
    wb = w.astype(jnp.bfloat16).astype(jnp.float32)
    dn = ('NHWC', 'HWIO', 'NHWC')

    ref = jnp.maximum(jax.lax.conv_general_dilated(
        xb, wb, (1, 1), ((1, 1), (1, 1)), dimension_numbers=dn) + b, 0.0)
    got = conv2d(x, w, b, stride=1, pad=1, relu=True).astype(jnp.float32)
    assert got.shape == ref.shape
    assert float(jnp.max(jnp.abs(got - ref))) < 0.25, "conv s1 mismatch"

    ref2 = jax.lax.conv_general_dilated(
        xb, wb, (2, 2), ((1, 1), (1, 1)), dimension_numbers=dn) + b
    got2 = conv2d(x, w, b, stride=2, pad=1, relu=False).astype(jnp.float32)
    assert got2.shape == ref2.shape
    assert float(jnp.max(jnp.abs(got2 - ref2))) < 0.25, "conv s2 mismatch"

    xp = jax.random.normal(kp, (2, 11, 14, 128), jnp.float32).astype(jnp.bfloat16)
    ref3 = jax.lax.reduce_window(xp.astype(jnp.float32), -jnp.inf, jax.lax.max,
                                 (1, 2, 2, 1), (1, 2, 2, 1), 'VALID')
    got3 = maxpool_2x2(xp, ceil_mode=False).astype(jnp.float32)
    assert got3.shape == ref3.shape
    assert float(jnp.max(jnp.abs(got3 - ref3))) == 0.0, "pool mismatch"


# --------------------------------------------------------------------- main ---

if __name__ == "__main__":
    _self_check()

    root = jax.random.PRNGKey(0)
    k_params, k_x = jax.random.split(root)
    params = build_ssd_params(k_params)

    # Small demo input (batch=2, RGB, 64x64) in NCHW like the PyTorch module.
    x = jax.random.normal(k_x, (2, 3, 64, 64), jnp.float32)

    fwd = jax.jit(lambda inp: ssd_forward(params, inp))
    loc, conf, priors = fwd(x)
    jax.block_until_ready((loc, conf, priors))

    # 64x64 input -> source maps 8,4,2,1,1,1 with mbox 4,6,6,6,4,4 -> 390 boxes.
    # Priors stay 8732x4: the PyTorch module builds them from cfg, independent of input.
    assert loc.shape == (2, 390, 4), loc.shape
    assert conf.shape == (2, 390, NUM_CLASSES), conf.shape
    assert priors.shape == (8732, 4), priors.shape
    assert bool(jnp.all(jnp.isfinite(loc))) and bool(jnp.all(jnp.isfinite(conf)))

    print("KERNEL_OK")
</pallas_src>

<mosaic_0001>
module attributes {stable_mosaic.version = 11 : i64} {
  func.func @kernel(%arg0: i32, %arg1: i32, %arg2: memref<1x15x18x128xbf16, #tpu.memory_space<vmem>>, %arg3: memref<1152x256xbf16, #tpu.memory_space<vmem>>, %arg4: memref<1x256xf32, #tpu.memory_space<vmem>>, %arg5: memref<1x13x16x256xbf16, #tpu.memory_space<vmem>>, %arg6: memref<208x1152xbf16, #tpu.memory_space<vmem>>) attributes {dimension_semantics = [#tpu.dimension_semantics<parallel>, #tpu.dimension_semantics<parallel>], iteration_bounds = array<i64: 2, 1>, scalar_prefetch = 0 : i64, scratch_operands = 1 : i64, tpu.core_type = #tpu.core_type<tc>, window_params = [{transform_indices = @transform_0, window_bounds = array<i64: 1, 15, 18, 128>}, {pipeline_mode = #tpu.pipeline_mode<synchronous>, transform_indices = @transform_1, window_bounds = array<i64: 1152, 256>}, {pipeline_mode = #tpu.pipeline_mode<synchronous>, transform_indices = @transform_2, window_bounds = array<i64: 1, 256>}, {transform_indices = @transform_3, window_bounds = array<i64: 1, 13, 16, 256>}]} {
    %c13_i32 = arith.constant 13 : i32
    %0 = arith.muli %arg1, %c13_i32 : i32
    %c0_i32 = arith.constant 0 : i32
    %1 = arith.addi %c0_i32, %0 : i32
    %c0 = arith.constant 0 : index
    %2 = arith.index_cast %1 : i32 to index
    %c0_0 = arith.constant 0 : index
    %c0_1 = arith.constant 0 : index
    %3 = vector.load %arg2[%c0, %2, %c0_0, %c0_1] : memref<1x15x18x128xbf16, #tpu.memory_space<vmem>>, vector<1x13x16x128xbf16>
    %4 = vector.shape_cast %3 : vector<1x13x16x128xbf16> to vector<13x16x128xbf16>
    %5 = vector.shape_cast %4 : vector<13x16x128xbf16> to vector<208x128xbf16>
    %c0_2 = arith.constant 0 : index
    %c0_3 = arith.constant 0 : index
    %6 = vector.load %arg6[%c0_2, %c0_3] : memref<208x1152xbf16, #tpu.memory_space<vmem>>, vector<208x128xbf16>
    tpu.vector_store %arg6[%c0_2, %c0_3], %5 {strides = array<i32>} : memref<208x1152xbf16, #tpu.memory_space<vmem>>, vector<208x128xbf16>,
    %c0_i32_4 = arith.constant 0 : i32
    %7 = arith.addi %c0_i32_4, %0 : i32
    %c0_5 = arith.constant 0 : index
    %8 = arith.index_cast %7 : i32 to index
    %c1 = arith.constant 1 : index
    %c0_6 = arith.constant 0 : index
    %9 = vector.load %arg2[%c0_5, %8, %c1, %c0_6] : memref<1x15x18x128xbf16, #tpu.memory_space<vmem>>, vector<1x13x16x128xbf16>
    %10 = vector.shape_cast %9 : vector<1x13x16x128xbf16> to vector<13x16x128xbf16>
    %11 = vector.shape_cast %10 : vector<13x16x128xbf16> to vector<208x128xbf16>
    %c0_7 = arith.constant 0 : index
    %c128 = arith.constant 128 : index
    %12 = vector.load %arg6[%c0_7, %c128] : memref<208x1152xbf16, #tpu.memory_space<vmem>>, vector<208x128xbf16>
    tpu.vector_store %arg6[%c0_7, %c128], %11 {strides = array<i32>} : memref<208x1152xbf16, #tpu.memory_space<vmem>>, vector<208x128xbf16>,
    %c0_i32_8 = arith.constant 0 : i32
    %13 = arith.addi %c0_i32_8, %0 : i32
    %c0_9 = arith.constant 0 : index
    %14 = arith.index_cast %13 : i32 to index
    %c2 = arith.constant 2 : index
    %c0_10 = arith.constant 0 : index
    %15 = vector.load %arg2[%c0_9, %14, %c2, %c0_10] : memref<1x15x18x128xbf16, #tpu.memory_space<vmem>>, vector<1x13x16x128xbf16>
    %16 = vector.shape_cast %15 : vector<1x13x16x128xbf16> to vector<13x16x128xbf16>
    %17 = vector.shape_cast %16 : vector<13x16x128xbf16> to vector<208x128xbf16>
    %c0_11 = arith.constant 0 : index
    %c256 = arith.constant 256 : index
    %18 = vector.load %arg6[%c0_11, %c256] : memref<208x1152xbf16, #tpu.memory_space<vmem>>, vector<208x128xbf16>
    tpu.vector_store %arg6[%c0_11, %c256], %17 {strides = array<i32>} : memref<208x1152xbf16, #tpu.memory_space<vmem>>, vector<208x128xbf16>,
    %c1_i32 = arith.constant 1 : i32
    %19 = arith.addi %c1_i32, %0 : i32
    %c0_12 = arith.constant 0 : index
    %20 = arith.index_cast %19 : i32 to index
    %c0_13 = arith.constant 0 : index
    %c0_14 = arith.constant 0 : index
    %21 = vector.load %arg2[%c0_12, %20, %c0_13, %c0_14] : memref<1x15x18x128xbf16, #tpu.memory_space<vmem>>, vector<1x13x16x128xbf16>
    %22 = vector.shape_cast %21 : vector<1x13x16x128xbf16> to vector<13x16x128xbf16>
    %23 = vector.shape_cast %22 : vector<13x16x128xbf16> to vector<208x128xbf16>
    %c0_15 = arith.constant 0 : index
    %c384 = arith.constant 384 : index
    %24 = vector.load %arg6[%c0_15, %c384] : memref<208x1152xbf16, #tpu.memory_space<vmem>>, vector<208x128xbf16>
    tpu.vector_store %arg6[%c0_15, %c384], %23 {strides = array<i32>} : memref<208x1152xbf16, #tpu.memory_space<vmem>>, vector<208x128xbf16>,
    %c1_i32_16 = arith.constant 1 : i32
    %25 = arith.addi %c1_i32_16, %0 : i32
    %c0_17 = arith.constant 0 : index
    %26 = arith.index_cast %25 : i32 to index
    %c1_18 = arith.constant 1 : index
    %c0_19 = arith.constant 0 : index
    %27 = vector.load %arg2[%c0_17, %26, %c1_18, %c0_19] : memref<1x15x18x128xbf16, #tpu.memory_space<vmem>>, vector<1x13x16x128xbf16>
    %28 = vector.shape_cast %27 : vector<1x13x16x128xbf16> to vector<13x16x128xbf16>
    %29 = vector.shape_cast %28 : vector<13x16x128xbf16> to vector<208x128xbf16>
    %c0_20 = arith.constant 0 : index
    %c512 = arith.constant 512 : index
    %30 = vector.load %arg6[%c0_20, %c512] : memref<208x1152xbf16, #tpu.memory_space<vmem>>, vector<208x128xbf16>
    tpu.vector_store %arg6[%c0_20, %c512], %29 {strides = array<i32>} : memref<208x1152xbf16, #tpu.memory_space<vmem>>, vector<208x128xbf16>,
    %c1_i32_21 = arith.constant 1 : i32
    %31 = arith.addi %c1_i32_21, %0 : i32
    %c0_22 = arith.constant 0 : index
    %32 = arith.index_cast %31 : i32 to index
    %c2_23 = arith.constant 2 : index
    %c0_24 = arith.constant 0 : index
    %33 = vector.load %arg2[%c0_22, %32, %c2_23, %c0_24] : memref<1x15x18x128xbf16, #tpu.memory_space<vmem>>, vector<1x13x16x128xbf16>
    %34 = vector.shape_cast %33 : vector<1x13x16x128xbf16> to vector<13x16x128xbf16>
    %35 = vector.shape_cast %34 : vector<13x16x128xbf16> to vector<208x128xbf16>
    %c0_25 = arith.constant 0 : index
    %c640 = arith.constant 640 : index
    %36 = vector.load %arg6[%c0_25, %c640] : memref<208x1152xbf16, #tpu.memory_space<vmem>>, vector<208x128xbf16>
    tpu.vector_store %arg6[%c0_25, %c640], %35 {strides = array<i32>} : memref<208x1152xbf16, #tpu.memory_space<vmem>>, vector<208x128xbf16>,
    %c2_i32 = arith.constant 2 : i32
    %37 = arith.addi %c2_i32, %0 : i32
    %c0_26 = arith.constant 0 : index
    %38 = arith.index_cast %37 : i32 to index
    %c0_27 = arith.constant 0 : index
    %c0_28 = arith.constant 0 : index
    %39 = vector.load %arg2[%c0_26, %38, %c0_27, %c0_28] : memref<1x15x18x128xbf16, #tpu.memory_space<vmem>>, vector<1x13x16x128xbf16>
    %40 = vector.shape_cast %39 : vector<1x13x16x128xbf16> to vector<13x16x128xbf16>
    %41 = vector.shape_cast %40 : vector<13x16x128xbf16> to vector<208x128xbf16>
    %c0_29 = arith.constant 0 : index
    %c768 = arith.constant 768 : index
    %42 = vector.load %arg6[%c0_29, %c768] : memref<208x1152xbf16, #tpu.memory_space<vmem>>, vector<208x128xbf16>
    tpu.vector_store %arg6[%c0_29, %c768], %41 {strides = array<i32>} : memref<208x1152xbf16, #tpu.memory_space<vmem>>, vector<208x128xbf16>,
    %c2_i32_30 = arith.constant 2 : i32
    %43 = arith.addi %c2_i32_30, %0 : i32
    %c0_31 = arith.constant 0 : index
    %44 = arith.index_cast %43 : i32 to index
    %c1_32 = arith.constant 1 : index
    %c0_33 = arith.constant 0 : index
    %45 = vector.load %arg2[%c0_31, %44, %c1_32, %c0_33] : memref<1x15x18x128xbf16, #tpu.memory_space<vmem>>, vector<1x13x16x128xbf16>
    %46 = vector.shape_cast %45 : vector<1x13x16x128xbf16> to vector<13x16x128xbf16>
    %47 = vector.shape_cast %46 : vector<13x16x128xbf16> to vector<208x128xbf16>
    %c0_34 = arith.constant 0 : index
    %c896 = arith.constant 896 : index
    %48 = vector.load %arg6[%c0_34, %c896] : memref<208x1152xbf16, #tpu.memory_space<vmem>>, vector<208x128xbf16>
    tpu.vector_store %arg6[%c0_34, %c896], %47 {strides = array<i32>} : memref<208x1152xbf16, #tpu.memory_space<vmem>>, vector<208x128xbf16>,
    %c2_i32_35 = arith.constant 2 : i32
    %49 = arith.addi %c2_i32_35, %0 : i32
    %c0_36 = arith.constant 0 : index
    %50 = arith.index_cast %49 : i32 to index
    %c2_37 = arith.constant 2 : index
    %c0_38 = arith.constant 0 : index
    %51 = vector.load %arg2[%c0_36, %50, %c2_37, %c0_38] : memref<1x15x18x128xbf16, #tpu.memory_space<vmem>>, vector<1x13x16x128xbf16>
    %52 = vector.shape_cast %51 : vector<1x13x16x128xbf16> to vector<13x16x128xbf16>
    %53 = vector.shape_cast %52 : vector<13x16x128xbf16> to vector<208x128xbf16>
    %c0_39 = arith.constant 0 : index
    %c1024 = arith.constant 1024 : index
    %54 = vector.load %arg6[%c0_39, %c1024] : memref<208x1152xbf16, #tpu.memory_space<vmem>>, vector<208x128xbf16>
    tpu.vector_store %arg6[%c0_39, %c1024], %53 {strides = array<i32>} : memref<208x1152xbf16, #tpu.memory_space<vmem>>, vector<208x128xbf16>,
    %c0_40 = arith.constant 0 : index
    %c0_41 = arith.constant 0 : index
    %55 = vector.load %arg6[%c0_40, %c0_41] : memref<208x1152xbf16, #tpu.memory_space<vmem>>, vector<208x1152xbf16>
    %c0_42 = arith.constant 0 : index
    %c0_43 = arith.constant 0 : index
    %56 = vector.load %arg3[%c0_42, %c0_43] : memref<1152x256xbf16, #tpu.memory_space<vmem>>, vector<1152x256xbf16>
    %cst = arith.constant dense<0.000000e+00> : vector<208x256xf32>
    %57 = tpu.matmul %55, %56, %cst {dimension_numbers = #tpu.dot_dimension_numbers<[1], [0], [0], [1], [0, 0, 1, 1], [], []>} : vector<208x1152xbf16>, vector<1152x256xbf16>, vector<208x256xf32> -> vector<208x256xf32>
    %c0_44 = arith.constant 0 : index
    %c0_45 = arith.constant 0 : index
    %58 = vector.load %arg4[%c0_44, %c0_45] : memref<1x256xf32, #tpu.memory_space<vmem>>, vector<1x256xf32>
    %59 = vector.broadcast %58 : vector<1x256xf32> to vector<208x256xf32>
    %60 = arith.addf %57, %59 : vector<208x256xf32>
    %cst_46 = arith.constant 0.000000e+00 : f32
    %61 = vector.broadcast %cst_46 : f32 to vector<208x256xf32>
    %62 = arith.maximumf %60, %61 : vector<208x256xf32>
    %63 = vector.shape_cast %62 : vector<208x256xf32> to vector<1x13x16x256xf32>
    %64 = arith.truncf %63 : vector<1x13x16x256xf32> to vector<1x13x16x256xbf16>
    %c0_47 = arith.constant 0 : index
    %c0_48 = arith.constant 0 : index
    %c0_49 = arith.constant 0 : index
    %c0_50 = arith.constant 0 : index
    %65 = vector.load %arg5[%c0_47, %c0_48, %c0_49, %c0_50] : memref<1x13x16x256xbf16, #tpu.memory_space<vmem>>, vector<1x13x16x256xbf16>
    tpu.vector_store %arg5[%c0_47, %c0_48, %c0_49, %c0_50], %64 {strides = array<i32>} : memref<1x13x16x256xbf16, #tpu.memory_space<vmem>>, vector<1x13x16x256xbf16>,
    return
  }
  func.func @transform_0(%arg0: i32, %arg1: i32) -> (i32, i32, i32, i32) {
    %c0_i32 = arith.constant 0 : i32
    %c0_i32_0 = arith.constant 0 : i32
    %c0_i32_1 = arith.constant 0 : i32
    %c0_i32_2 = arith.constant 0 : i32
    return %arg0, %c0_i32, %c0_i32_0, %c0_i32_1 : i32, i32, i32, i32
  }
  func.func @transform_1(%arg0: i32, %arg1: i32) -> (i32, i32) {
    %c0_i32 = arith.constant 0 : i32
    %c0_i32_0 = arith.constant 0 : i32
    %c0_i32_1 = arith.constant 0 : i32
    return %c0_i32, %c0_i32_0 : i32, i32
  }
  func.func @transform_2(%arg0: i32, %arg1: i32) -> (i32, i32) {
    %c0_i32 = arith.constant 0 : i32
    %c0_i32_0 = arith.constant 0 : i32
    %c0_i32_1 = arith.constant 0 : i32
    return %c0_i32, %c0_i32_0 : i32, i32
  }
  func.func @transform_3(%arg0: i32, %arg1: i32) -> (i32, i32, i32, i32) {
    %c0_i32 = arith.constant 0 : i32
    %c0_i32_0 = arith.constant 0 : i32
    %c0_i32_1 = arith.constant 0 : i32
    return %arg0, %arg1, %c0_i32, %c0_i32_0 : i32, i32, i32, i32
  }
}

</mosaic_0001>

<bundles_post_ra>
// kernel: tpu_custom_call.1
= control target key start
LH: loop header
LB: loop body
LE: loop exit
PB: predicated region body
PF: predicated region fallthrough
CT: control target
= control target key end

     0   :  { %8 = vsyncpa [#allocation4], 0  ;;  %s7371_s0 = inlined_call_operand.hbm [shape: bf16[2,15,18,128], index: 0, kind: input, shape index: {}]   ;;  %s7372_s1 = inlined_call_operand.hbm [shape: bf16[1152,256], index: 1, kind: input, shape index: {}]   ;;  %s7373_s2 = inlined_call_operand.hbm [shape: f32[1,256], index: 2, kind: input, shape index: {}]   ;;  %s7374_s3 = inlined_call_operand.hbm [shape: bf16[2,13,16,256], index: 3, kind: output, shape index: {}]  }
   0x1   :  { %10 = vsyncpa [#allocation4 + $0x1], 0 }
   0x2   :  { %11 = vsyncpa [#allocation7], 0 }
   0x3   :  { %12 = vsyncpa [#allocation5], 0 }
   0x4   :  { %14 = vsyncpa [#allocation5 + $0x1], 0  ;;  %s6172_s12 = smov 0   ;;  %s6174_s13 = smov 0  }
   0x5   :  { %s6176_s14 = smov 0   ;;  %s6178_s15 = smov 0  }
   0x6   :  { %s6180_s16 = smov 0   ;;  %s6182_s17 = smov 0  }
   0x7 LB: > { %s4723_s18 = sadd.s32 4294967295, %s6139_s17   ;;  %s4724_s19 = sadd.s32 4294967294, %s6139_s17   ;;  %s6139_s17 = sphi %s6182_s17, %s20_s17   ;;  %s6135_s16 = sphi %s6180_s16, %s7416_s16   ;;  %s6131_s15 = sphi %s6178_s15, %s7415_s15   ;;  %s6127_s14 = sphi %s6176_s14, %s7414_s14   ;;  %s6123_s13 = sphi %s6174_s13, %s7413_s13   ;;  %s6119_s12 = sphi %s6172_s12, %s7412_s12  }
   0x8   : > { %p52_p0 = scmp.ne.s32.totalorder %s6123_s13, %s6119_s12  ;;  %p6206_p1 = scmp.eq.s32.totalorder %s4723_s18, 0 }
   0x9   : > { %p6210_p2 = scmp.eq.s32.totalorder %s4723_s18, 1  ;;  %p126_p3 = scmp.eq.s32.totalorder %s4724_s19, 1 }
   0xa   : > { %s7379_s20 = scalar_select %p6206_p1, 1, 0 }
   0xb   : > { %p6216_p4 = por %p6206_p1, %p52_p0  ;;  %p4725_p5 = scmp.ge.s32.totalorder %s6139_s17, 1 }
   0xc   : > { %p6221_p6 = por %p126_p3, %p52_p0  ;;  %p133_p7 = scmp.lt.s32.totalorder %s6139_s17, 3 }
   0xd   : > { %s7381_s22 = scalar_select %p6216_p4, 1, 0 }
   0xe   : > { %s7382_s23 = scalar_select %p6221_p6, 1, 0 }
   0xf   : > { %p6226_p8 = pnand %p4725_p5, %p133_p7  ;;  %s6141_s25 = smov [#allocation6]  }
  0x10   : > { %s145_s26 = sshll.u32 %s6141_s25, 4  ;;  %s6142_s28 = smov [#allocation8]   ;;  %s6230_s26 = int_to_ptr.vmem [resolvable:$true] %s145_s26 }
  0x11   : > { %p5605_p9 = pneg %p6226_p8  ;;  %s159_s29 = sshll.u32 %s6142_s28, 4  ;;  %s6241_s29 = int_to_ptr.vmem [resolvable:$true] %s159_s29 }
  0x12   : > { %s5967_s5 = scalar_lea.hbm %s7372_s1, 18432 }
  0x13   : > { %p6237_p11 = pnand %p5605_p9, %p6206_p1  ;;  %p5968_p12 = scmp.ne.s32.totalorder %s7372_s1, %s5967_s5 }
  0x14   : > { %p5974_p5 = scmp.lt.u32.totalorder %s5967_s5, %s7372_s1 }
  0x15   : > { %p5969_p13 = pneg %p6237_p11 }
  0x17   : > { %p5970_p0 = pnand %p5969_p13, %p5968_p12 }
  0x19   : > { %p5971_p3 = pneg %p5970_p0 }
  0x1b   : > { %p5976_p7 = pnand %p5974_p5, %p5971_p3 }
  0x1d   : > { %5979 = shalt.err (!%p5976_p7)
}
  0x1e   : > { %s5980_s10 = scalar_lea.vmem %s6230_s26, 18432  ;;  %p5988_p1 = scmp.lt.s32.totalorder %s6230_s26, %s6230_s26 }
  0x1f   : > { %p5981_p9 = scmp.ne.s32.totalorder %s6230_s26, %s5980_s10  ;;  %p5989_p12 = scmp.lt.s32.totalorder %s5980_s10, %s5980_s10 }
  0x21   : > { %p5983_p10 = pnand %p5981_p9, %p5969_p13  ;;  %p5990_p0 = por %p5989_p12, %p5988_p1 }
  0x23   : > { %p5984_p6 = pneg %p5983_p10 }
  0x25   : > { %p5991_p4 = pnand %p5990_p0, %p5984_p6 }
  0x27   : > { %5994 = shalt.err (!%p5991_p4)
}
  0x28   : > { %s6143_s11 = smov 128   ;;  %s6144_s18 = smov 8  }
  0x29   : > { %5608 = dma.hbm_to_vmem [thread:$0]  (!%p6237_p11), %s7372_s1, 18432, %s6230_s26, [#allocation7], %s6143_s11, %s6143_s11, %s6144_s18  }
  0x2a   : > { %s5995_s4 = scalar_lea.hbm %s7373_s2, 32 }
  0x2b   : > { %p5996_p1 = scmp.ne.s32.totalorder %s7373_s2, %s5995_s4  ;;  %p6002_p10 = scmp.lt.u32.totalorder %s5995_s4, %s7373_s2 }
  0x2d   : > { %p5998_p4 = pnand %p5996_p1, %p5969_p13 }
  0x2f   : > { %p5999_p6 = pneg %p5998_p4 }
  0x31   : > { %p6004_p3 = pnand %p6002_p10, %p5999_p6 }
  0x33   : > { %6007 = shalt.err (!%p6004_p3)
}
  0x34   : > { %s6008_s26 = scalar_lea.vmem %s6241_s29, 32  ;;  %p6016_p12 = scmp.lt.s32.totalorder %s6241_s29, %s6241_s29 }
  0x35   : > { %p6009_p5 = scmp.ne.s32.totalorder %s6241_s29, %s6008_s26  ;;  %p6017_p0 = scmp.lt.s32.totalorder %s6008_s26, %s6008_s26 }
  0x37   : > { %p6011_p7 = pnand %p6009_p5, %p5969_p13  ;;  %p6018_p1 = por %p6017_p0, %p6016_p12 }
  0x39   : > { %p6012_p9 = pneg %p6011_p7 }
  0x3b   : > { %p6019_p4 = pnand %p6018_p1, %p6012_p9 }
  0x3d   : > { %6022 = shalt.err (!%p6019_p4)
}
  0x3e   : > { %5611 = dma.hbm_to_vmem [thread:$0]  (!%p6237_p11), %s7373_s2, 32, %s6241_s29, [#allocation7]  }
  0x3f   : > { %s32_s11 = sadd.s32 1, %s6135_s16  ;;  %s39_s18 = sadd.s32 1, %s6127_s14 }
  0x40   : > { %p34_p13 = scmp.ge.s32.totalorder %s32_s11, 2  ;;  %p46_p6 = scmp.ne.s32.totalorder %s6127_s14, %s6123_s13 }
  0x41   : > { %p47_p10 = scmp.eq.s32.totalorder %s6139_s17, 0  ;;  %p5622_p3 = scmp.lt.s32.totalorder %s6139_s17, 2 }
  0x42   : > { %s7418_s11 = smov (%p34_p13, %s32_s11), 0  ;;  %p6305_p7 = por %p6210_p2, %p46_p6 }
  0x43   : > { %p48_p5 = por %p47_p10, %p46_p6  ;;  %s36_s19 = ssub.s32 %s6135_s16, %s7418_s11 }
  0x44   : > { %s7385_s27 = scalar_select %p6305_p7, 1, 0 }
  0x45   : > { %s170_s25 = sand.u32 1, %s6127_s14   ;;  %p37_p9 = scmp.eq.s32.totalorder %s36_s19, 0 }
  0x46   : > { %s5588_s29 = smul.u32 180, %s170_s25  ;;  %p6312_p11 = pnand %p5622_p3, %p48_p5 }
  0x47   : > { %s6317_s30 = scalar_select %p37_p9, %s6127_s14, %s39_s18  }
  0x48   : > { %s5589_s4 = smul.u32 2880, %s6135_s16  ;;  %s174_s5 = scalar_lea.vmem [#allocation3], %s5588_s29 }
  0x49   : > { %s181_s6 = sshll.u32 %s174_s5, 4  ;;  %s6327_s26 = scalar_lea.sflag [#allocation4], %s170_s25  ;;  %s6325_s6 = int_to_ptr.vmem [resolvable:$true] %s181_s6 }
  0x4a   : > { %s6323_s8 = scalar_lea.hbm %s7371_s0, %s5589_s4  ;;  %p6025_p12 = pneg %p6312_p11 }
  0x4b   : > { %s6023_s9 = scalar_lea.hbm %s6323_s8, 2880  ;;  %s6028_s19 = scalar_lea.hbm %s7371_s0, 5760 }
  0x4c   : > { %p6024_p2 = scmp.ne.s32.totalorder %s6323_s8, %s6023_s9  ;;  %p6029_p4 = scmp.lt.u32.totalorder %s6323_s8, %s7371_s0 }
  0x4d   : > { %p6030_p13 = scmp.lt.u32.totalorder %s6028_s19, %s6023_s9  ;;  %p6032_p10 = scmp.lt.u32.totalorder %s6023_s9, %s6323_s8 }
  0x4e   : > { %p6026_p0 = pnand %p6025_p12, %p6024_p2 }
  0x4f   : > { %p6031_p6 = por %p6030_p13, %p6029_p4 }
  0x50   : > { %p6027_p1 = pneg %p6026_p0 }
  0x51   : > { %p6033_p3 = por %p6032_p10, %p6031_p6 }
  0x53   : > { %p6034_p5 = pnand %p6033_p3, %p6027_p1 }
  0x55   : > { %6037 = shalt.err (!%p6034_p5)
}
  0x56   : > { %s6038_s25 = scalar_lea.vmem %s6325_s6, 2880  ;;  %s6145_s5 = smov [#allocation3]  }
  0x57   : > { %p6039_p9 = scmp.ne.s32.totalorder %s6325_s6, %s6038_s25  ;;  %s6043_s21 = sshll.u32 %s6145_s5, 4  ;;  %s6044_s21 = int_to_ptr.vmem [resolvable:$false] %s6043_s21 }
  0x58   : > { %s6045_s7 = scalar_lea.vmem %s6044_s21, 5760  ;;  %p6046_p7 = scmp.lt.s32.totalorder %s6325_s6, %s6044_s21 }
  0x59   : > { %p6041_p2 = pnand %p6039_p9, %p6025_p12  ;;  %p6047_p4 = scmp.lt.s32.totalorder %s6045_s7, %s6038_s25 }
  0x5b   : > { %p6042_p0 = pneg %p6041_p2  ;;  %p6048_p13 = por %p6047_p4, %p6046_p7 }
  0x5d   : > { %p6049_p6 = pnand %p6048_p13, %p6042_p0 }
  0x5f   : > { %6052 = shalt.err (!%p6049_p6)
}
  0x60   : > { %s6146_s9 = smov 64   ;;  %s6147_s10 = smov 4  }
  0x61   : > { %5615 = dma.hbm_to_vmem [thread:$0]  (!%p6312_p11), %s6323_s8, 2880, %s6325_s6, %s6327_s26, %s6146_s9, %s6146_s9, %s6147_s10  }
  0x62   : > { %193 = sbr.rel (%p6226_p8) target bundleno = 685 (0x2ad), region = 32 }
  0x69   : > { %s6358_s18 = sand.u32 1, %s6123_s13   ;;  %p7387_p7 = scmp.ne.s32.totalorder %s7381_s22, 0 }
  0x6a   : > { %s5590_s19 = smul.u32 180, %s6358_s18  ;;  %s196_s29 = scalar_lea.sflag [#allocation4], %s6358_s18 }
  0x6c   : > { %s6362_s4 = scalar_lea.vmem [#allocation3], %s5590_s19 }
  0x6d   : > { %6106 = dma.done.wait (%p7387_p7), %s196_s29, 2880  }
  0x6e   : > { %6108 = vsyncadd (%p7387_p7), %s196_s29, 4294964416  ;;  %p7388_p11 = scmp.ne.s32.totalorder %s7379_s20, 0 }
  0x70   : > { %6110 = dma.done.wait (%p7388_p11), [#allocation7], 18464  }
  0x71   : > { %6112 = vsyncadd (%p7388_p11), [#allocation7], 4294948832  ;;  %v5683_v0 = vld [vmem:[#allocation6 + $0x4] ss:$8 sps:$4 sm:$0xff]   ;;  %v5687_v2 = vld [vmem:[#allocation6] ss:$8 sps:$4 sm:$0xff]  }
  0x72   : > { %v5685_v1 = vld [vmem:[#allocation6 + $0x204] ss:$8 sps:$4 sm:$0xff]   ;;  %3544 = vmatprep.subr.bf16.mxu1 %v5683_v0  ;;  %v5688_v3 = vld [vmem:[#allocation6 + $0x200] ss:$8 sps:$4 sm:$0xff]   ;;  %v5689_v4 = vld [vmem:[#allocation6 + $0x14] ss:$8 sps:$4 sm:$0xff]  }
  0x73   : > { %3870 = vmatprep.subr.bf16.mxu0 %v5685_v1  ;;  %3545 = vmatpush1.bf16.msra.mxu1 %v5687_v2  ;;  %v5691_v5 = vld [vmem:[#allocation6 + $0x214] ss:$8 sps:$4 sm:$0xff]   ;;  %v5693_v6 = vld [vmem:[#allocation6 + $0x10] ss:$8 sps:$4 sm:$0xff]   ;;  %v5695_v8 = vld [vmem:[#allocation6 + $0x24] ss:$8 sps:$4 sm:$0xff]  }
  0x74   : > { %3871 = vmatpush1.bf16.msra.mxu0 %v5688_v3  ;;  %3546 = vmatprep.subr.bf16.mxu1 %v5689_v4  ;;  %v5694_v7 = vld [vmem:[#allocation6 + $0x210] ss:$8 sps:$4 sm:$0xff]   ;;  %v5697_v9 = vld [vmem:[#allocation6 + $0x224] ss:$8 sps:$4 sm:$0xff]   ;;  %v5699_v10 = vld [vmem:[#allocation6 + $0x20] ss:$8 sps:$4 sm:$0xff]  }
  0x75   : > { %3872 = vmatprep.subr.bf16.mxu0 %v5691_v5  ;;  %v5700_v11 = vld [vmem:[#allocation6 + $0x220] ss:$8 sps:$4 sm:$0xff]   ;;  %v5701_v12 = vld [vmem:[#allocation6 + $0x34] ss:$8 sps:$4 sm:$0xff]   ;;  %v5705_v14 = vld [vmem:[#allocation6 + $0x30] ss:$8 sps:$4 sm:$0xff]  }
  0x76   : > { %v5703_v13 = vld [vmem:[#allocation6 + $0x234] ss:$8 sps:$4 sm:$0xff]   ;;  %v5706_v15 = vld [vmem:[#allocation6 + $0x230] ss:$8 sps:$4 sm:$0xff]   ;;  %v5707_v16 = vld [vmem:[#allocation6 + $0x44] ss:$8 sps:$4 sm:$0xff]  }
  0x77   : > { %3547 = vmatpush1.bf16.msra.mxu1 %v5693_v6  ;;  %v5709_v17 = vld [vmem:[#allocation6 + $0x244] ss:$8 sps:$4 sm:$0xff]   ;;  %v5711_v18 = vld [vmem:[#allocation6 + $0x40] ss:$8 sps:$4 sm:$0xff]   ;;  %v5713_v20 = vld [vmem:[#allocation6 + $0x54] ss:$8 sps:$4 sm:$0xff]  }
  0x78   : > { %3873 = vmatpush1.bf16.msra.mxu0 %v5694_v7  ;;  %3548 = vmatprep.subr.bf16.mxu1 %v5695_v8  ;;  %v5712_v19 = vld [vmem:[#allocation6 + $0x240] ss:$8 sps:$4 sm:$0xff]   ;;  %v5715_v21 = vld [vmem:[#allocation6 + $0x254] ss:$8 sps:$4 sm:$0xff]   ;;  %v5717_v22 = vld [vmem:[#allocation6 + $0x50] ss:$8 sps:$4 sm:$0xff]  }
  0x79   : > { %3874 = vmatprep.subr.bf16.mxu0 %v5697_v9  ;;  %v5718_v23 = vld [vmem:[#allocation6 + $0x250] ss:$8 sps:$4 sm:$0xff]   ;;  %v5719_v24 = vld [vmem:[#allocation6 + $0x64] ss:$8 sps:$4 sm:$0xff]   ;;  %v5723_v26 = vld [vmem:[#allocation6 + $0x60] ss:$8 sps:$4 sm:$0xff]  }
  0x7a   : > { %v5721_v25 = vld [vmem:[#allocation6 + $0x264] ss:$8 sps:$4 sm:$0xff]   ;;  %v5724_v27 = vld [vmem:[#allocation6 + $0x260] ss:$8 sps:$4 sm:$0xff]   ;;  %v5725_v28 = vld [vmem:[#allocation6 + $0x74] ss:$8 sps:$4 sm:$0xff]  }
  0x7b   : > { %3549 = vmatpush1.bf16.msra.mxu1 %v5699_v10  ;;  %v5727_v29 = vld [vmem:[#allocation6 + $0x274] ss:$8 sps:$4 sm:$0xff]   ;;  %v5729_v30 = vld [vmem:[#allocation6 + $0x70] ss:$8 sps:$4 sm:$0xff]   ;;  %v5731_v32 = vld [vmem:[#allocation6 + $0x84] ss:$8 sps:$4 sm:$0xff]  }
  0x7c   : > { %3875 = vmatpush1.bf16.msra.mxu0 %v5700_v11  ;;  %3550 = vmatprep.subr.bf16.mxu1 %v5701_v12  ;;  %v5730_v31 = vld [vmem:[#allocation6 + $0x270] ss:$8 sps:$4 sm:$0xff]   ;;  %v5733_v33 = vld [vmem:[#allocation6 + $0x284] ss:$8 sps:$4 sm:$0xff]   ;;  %v5735_v34 = vld [vmem:[#allocation6 + $0x80] ss:$8 sps:$4 sm:$0xff]  }
  0x7d   : > { %3876 = vmatprep.subr.bf16.mxu0 %v5703_v13  ;;  %v5736_v35 = vld [vmem:[#allocation6 + $0x280] ss:$8 sps:$4 sm:$0xff]   ;;  %v5737_v36 = vld [vmem:[#allocation6 + $0x94] ss:$8 sps:$4 sm:$0xff]   ;;  %v5741_v38 = vld [vmem:[#allocation6 + $0x90] ss:$8 sps:$4 sm:$0xff]  }
  0x7e   : > { %v5739_v37 = vld [vmem:[#allocation6 + $0x294] ss:$8 sps:$4 sm:$0xff]   ;;  %v5742_v39 = vld [vmem:[#allocation6 + $0x290] ss:$8 sps:$4 sm:$0xff]   ;;  %v5743_v40 = vld [vmem:[#allocation6 + $0xa4] ss:$8 sps:$4 sm:$0xff]  }
  0x7f   : > { %3551 = vmatpush1.bf16.msra.mxu1 %v5705_v14  ;;  %v5745_v41 = vld [vmem:[#allocation6 + $0x2a4] ss:$8 sps:$4 sm:$0xff]   ;;  %v5747_v42 = vld [vmem:[#allocation6 + $0xa0] ss:$8 sps:$4 sm:$0xff]   ;;  %vm392_vm0 = vsmask.f32 3328 }
  0x80   : > { %3877 = vmatpush1.bf16.msra.mxu0 %v5706_v15  ;;  %3552 = vmatprep.subr.bf16.mxu1 %v5707_v16  ;;  %v5748_v43 = vld [vmem:[#allocation6 + $0x2a0] ss:$8 sps:$4 sm:$0xff]   ;;  %v5749_v44 = vld [vmem:[#allocation6 + $0xb4] ss:$8 sps:$4 sm:$0xff]   ;;  %vm393_vm1 = vsmask.f32 7440 }
  0x81   : > { %3878 = vmatprep.subr.bf16.mxu0 %v5709_v17  ;;  %v5751_v45 = vld [vmem:[#allocation6 + $0x2b4] ss:$8 sps:$4 sm:$0xff]   ;;  %vm850_vm2 = vcmask 1042432   ;;  %vm851_vm3 = vcmask 1046532   ;;  %v5753_v46 = vld [vmem:[#allocation6 + $0xb0] ss:$8 sps:$4 sm:$0xff]   ;;  %vm6387_vm5 = vmor %vm392_vm0, %vm393_vm1 }
  0x82   : > { %v5754_v47 = vld [vmem:[#allocation6 + $0x2b0] ss:$8 sps:$4 sm:$0xff]   ;;  %v5755_v49 = vld [vmem:[#allocation6 + $0xc4] ss:$8 sps:$4 sm:$0xff]   ;;  %v355_v52 = vld [vmem:[%s6362_s4 + $0x8] sm:$0x1] }
  0x83   : > { %3553 = vmatpush1.bf16.msra.mxu1 %v5711_v18  ;;  %v353_v48 = vld [vmem:[%s6362_s4] sm:$0xf]  ;;  %v354_v51 = vld [vmem:[%s6362_s4 + $0x4] sm:$0xf]  ;;  %v415_v57 = vshll.u32 %v355_v52, 16  ;;  %vm6380_vm4 = vmor %vm850_vm2, %vm851_vm3  ;;  %s5591_s20 = smul.u32 208, %s6358_s18 }
  0x84   : > { %3879 = vmatpush1.bf16.msra.mxu0 %v5712_v19  ;;  %3554 = vmatprep.subr.bf16.mxu1 %v5713_v20  ;;  %v5757_v50 = vld [vmem:[#allocation6 + $0x2c4] ss:$8 sps:$4 sm:$0xff]   ;;  %v396_v53 = vshrl.u32 %v353_v48, 16  ;;  %v399_v54 = vshll.u32 %v353_v48, 16  ;;  %v405_v55 = vshll.u32 %v354_v51, 16  ;;  %v409_v56 = vshrl.u32 %v354_v51, 16 }
  0x85   : > { %3880 = vmatprep.subr.bf16.mxu0 %v5715_v21  ;;  %v4876_v58 = vld [vmem:[%s6362_s4 + $0xc] sm:$0xe]  ;;  %v4877_v61 = vld [vmem:[%s6362_s4 + $0x10] sm:$0xf]  ;;  %v4878_v62 = vld [vmem:[%s6362_s4 + $0x14] sm:$0x1] }
  0x86   : > { %v398_v59 = vrot.slane %v396_v53, 4  ;;  %v401_v60 = vrot.slane %v399_v54, 5  ;;  %v5759_v63 = vld [vmem:[#allocation6 + $0xc0] ss:$8 sps:$4 sm:$0xff]   ;;  %v407_v1 = vrot.slane %v405_v55, 5  ;;  %v411_v2 = vrot.slane %v409_v56, 4 }
  0x87   : > { %3555 = vmatpush1.bf16.msra.mxu1 %v5717_v22  ;;  %v5760_v0 = vld [vmem:[#allocation6 + $0x2c0] ss:$8 sps:$4 sm:$0xff]   ;;  %v417_v3 = vrot.slane %v415_v57, 5  ;;  %v4915_v5 = vrot.slane %v4876_v58, 9  ;;  %v5761_v6 = vld [vmem:[#allocation6 + $0xd4] ss:$8 sps:$4 sm:$0xff]  }
  0x88   : > { %3881 = vmatpush1.bf16.msra.mxu0 %v5718_v23  ;;  %3556 = vmatprep.subr.bf16.mxu1 %v5719_v24  ;;  %v5763_v7 = vld [vmem:[#allocation6 + $0x2d4] ss:$8 sps:$4 sm:$0xff]   ;;  %v402_v8 = vor.u32 %v401_v60, %v398_v59  ;;  %v1626_v9 = vrot.slane %v4877_v61, 5  ;;  %v1629_v10 = vrot.slane %v4878_v62, 5  ;;  %v4824_v11 = vld [vmem:[%s6362_s4 + $0xc] sm:$0xf]  ;;  %v412_v13 = vor.u32 %v411_v2, %v407_v1 }
  0x89   : > { %3882 = vmatprep.subr.bf16.mxu0 %v5721_v25  ;;  %v4825_v14 = vld [vmem:[%s6362_s4 + $0x10] sm:$0xf]  ;;  %v4826_v15 = vld [vmem:[%s6362_s4 + $0x14] sm:$0x1]  ;;  %v1170_v16 = vshrl.u32 %v4824_v11, 16  ;;  %v1173_v17 = vshll.u32 %v4824_v11, 16 }
  0x8a   : > { %v403_v18 = vrot.slane %v402_v8, 4  ;;  %v1627_v19 = vsel %vm6380_vm4, %v4915_v5, %v1626_v9  ;;  %v1628_v20 = vrot.slane %v1626_v9, 4  ;;  %v1179_v21 = vshll.u32 %v4825_v14, 16  ;;  %v5765_v22 = vld [vmem:[#allocation6 + $0xd0] ss:$8 sps:$4 sm:$0xff]   ;;  %s7141_s22 = scalar_lea.vmem [#allocation9], %s5591_s20 }
  0x8b   : > { %3557 = vmatpush1.bf16.msra.mxu1 %v5723_v26  ;;  %v413_v23 = vrot.slane %v412_v13, 4  ;;  %v1172_v24 = vrot.slane %v1170_v16, 4  ;;  %v1175_v25 = vrot.slane %v1173_v17, 5  ;;  %v1183_v26 = vshrl.u32 %v4825_v14, 16  ;;  %v4879_v54 = vld [vmem:[%s6362_s4 + $0x18] sm:$0xe] }
  0x8c   : > { %3883 = vmatpush1.bf16.msra.mxu0 %v5724_v27  ;;  %3558 = vmatprep.subr.bf16.mxu1 %v5725_v28  ;;  %v5766_v27 = vld [vmem:[#allocation6 + $0x2d0] ss:$8 sps:$4 sm:$0xff]   ;;  %v408_v28 = vsel %vm6387_vm5, %v403_v18, %v407_v1  ;;  %v4880_v58 = vld [vmem:[%s6362_s4 + $0x1c] sm:$0xf]  ;;  %v4916_v62 = vrot.slane %v4879_v54, 9  ;;  %s5592_s24 = smul.u32 3328, %s6131_s15 }
  0x8d   : > { %3884 = vmatprep.subr.bf16.mxu0 %v5727_v29  ;;  %v1630_v29 = vsel %vm6380_vm4, %v1628_v20, %v1629_v10  ;;  %v4881_v61 = vld [vmem:[%s6362_s4 + $0x20] sm:$0x1]  ;;  %v4827_v9 = vld [vmem:[%s6362_s4 + $0x18] sm:$0xf]  ;;  %s4610_s28 = sshll.u32 %s7141_s22, 4  ;;  %s4594_s15 = scalar_lea.sflag [#allocation5], %s6358_s18  ;;  %s7320_s28 = int_to_ptr.vmem [resolvable:$true] %s4610_s28 }
  0x8e   : > { %v1636_v5 = vrot.slane %v4881_v61, 5  ;;  %v4829_v16 = vld [vmem:[%s6362_s4 + $0x20] sm:$0x1]  ;;  %v1197_v20 = vshll.u32 %v4827_v9, 16  ;;  %s7318_s26 = scalar_lea.hbm %s7374_s3, %s5592_s24  ;;  %s6053_s25 = scalar_lea.vmem %s7320_s28, 3328 }
  0x8f   : > { %3559 = vmatpush1.bf16.msra.mxu1 %v5729_v30  ;;  %v6399_v30 = vrot.slane %v1179_v21, 5  ;;  %v5785_v17 = vld [vmem:[#allocation6 + $0x104] ss:$8 sps:$4 sm:$0xff]   ;;  %p6054_p8 = scmp.ne.s32.totalorder %s7320_s28, %s6053_s25  ;;  %p7409_p12 = scmp.ne.s32.totalorder %s7385_s27, 0 }
  0x90   : > { %3885 = vmatpush1.bf16.msra.mxu0 %v5730_v31  ;;  %3560 = vmatprep.subr.bf16.mxu1 %v5731_v32  ;;  %v1189_v31 = vshll.u32 %v4826_v15, 16  ;;  %v5767_v32 = vld [vmem:[#allocation6 + $0xe4] ss:$8 sps:$4 sm:$0xff]   ;;  %v4828_v15 = vld [vmem:[%s6362_s4 + $0x1c] sm:$0xf]  ;;  %s6149_s5 = smov [#allocation9]  }
  0x91   : > { %3886 = vmatprep.subr.bf16.mxu0 %v5733_v33  ;;  %v5769_v33 = vld [vmem:[#allocation6 + $0x2e4] ss:$8 sps:$4 sm:$0xff]   ;;  %v1203_v21 = vshll.u32 %v4828_v15, 16  ;;  %p6055_p1 = pnand %p6054_p8, %p7409_p12  ;;  %s6057_s21 = sshll.u32 %s6149_s5, 4  ;;  %s6058_s21 = int_to_ptr.vmem [resolvable:$false] %s6057_s21 }
  0x92   : > { %v5795_v54 = vld [vmem:[#allocation6 + $0x324] ss:$8 sps:$4 sm:$0xff]   ;;  %s6059_s7 = scalar_lea.vmem %s6058_s21, 6656  ;;  %p6060_p3 = scmp.lt.s32.totalorder %s7320_s28, %s6058_s21 }
  0x93   : > { %3561 = vmatpush1.bf16.msra.mxu1 %v5735_v34  ;;  %v418_v34 = vsel %vm6387_vm5, %v413_v23, %v417_v3  ;;  %v1633_v3 = vrot.slane %v4880_v58, 5  ;;  %p6056_p10 = pneg %p6055_p1  ;;  %p6061_p5 = scmp.lt.s32.totalorder %s6059_s7, %s6053_s25 }
  0x94   : > { %3887 = vmatpush1.bf16.msra.mxu0 %v5736_v35  ;;  %3562 = vmatprep.subr.bf16.mxu1 %v5737_v36  ;;  %v4928_v35 = vcombine.low %v1627_v19, %v1630_v29  ;;  %v1176_v36 = vor.u32 %v1175_v25, %v1172_v24  ;;  %v1194_v19 = vshrl.u32 %v4827_v9, 16  ;;  %v1207_v25 = vshrl.u32 %v4828_v15, 16  ;;  %v5783_v29 = vld [vmem:[#allocation6 + $0x100] ss:$8 sps:$4 sm:$0xff]  }
  0x95   : > { %3888 = vmatprep.subr.bf16.mxu0 %v5739_v37  ;;  %v1185_v37 = vrot.slane %v1183_v26, 4  ;;  %v1634_v13 = vsel %vm6380_vm4, %v4916_v62, %v1633_v3  ;;  %v1635_v14 = vrot.slane %v1633_v3, 4  ;;  %v1213_v26 = vshll.u32 %v4829_v16, 16  ;;  %v4831_v9 = vld [vmem:[%s6362_s4 + $0x28] sm:$0xf]  ;;  %p6062_p9 = por %p6061_p5, %p6060_p3 }
  0x96   : > { %3902 = vmatprep.mubr.bf16.mxu0 %v4928_v35  ;;  %v1205_v35 = vrot.slane %v1203_v21, 5  ;;  %v1227_v21 = vshll.u32 %v4831_v9, 16 }
  0x97   : > { %3563 = vmatpush1.bf16.msra.mxu1 %v5741_v38  ;;  %v4746_v38 = vcombine.low %v408_v28, %v418_v34  ;;  %v1637_v24 = vsel %vm6380_vm4, %v1635_v14, %v1636_v5  ;;  %v5780_v28 = vld [vmem:[#allocation6 + $0x300] ss:$8 sps:$4 sm:$0xff]   ;;  %v5788_v34 = vld [vmem:[#allocation6 + $0x314] ss:$8 sps:$4 sm:$0xff]   ;;  %p6063_p2 = pnand %p6062_p9, %p6056_p10 }
  0x98   : > { %3889 = vmatpush1.bf16.msra.mxu0 %v5742_v39  ;;  %3564 = vmatprep.subr.bf16.mxu1 %v5743_v40  ;;  %v1191_v39 = vrot.slane %v1189_v31, 5  ;;  %v356_v40 = vld [vmem:[%s6362_s4 + $0xc] sm:$0xf]  ;;  %v1196_v31 = vrot.slane %v1194_v19, 4 }
  0x99   : > { %3890 = vmatprep.subr.bf16.mxu0 %v5745_v41  ;;  %v357_v41 = vld [vmem:[%s6362_s4 + $0x10] sm:$0xf]  ;;  %v423_v48 = vshll.u32 %v356_v40, 16  ;;  %3576 = vmatprep.mubr.bf16.mxu1 %v4746_v38 }
  0x9a   : > { %v429_v51 = vshll.u32 %v357_v41, 16  ;;  %v433_v52 = vshrl.u32 %v357_v41, 16  ;;  %v5792_v38 = vld [vmem:[#allocation6 + $0x114] ss:$8 sps:$4 sm:$0xff]  }
  0x9b   : > { %3565 = vmatpush1.bf16.msra.mxu1 %v5747_v42  ;;  %v5771_v42 = vld [vmem:[#allocation6 + $0xe0] ss:$8 sps:$4 sm:$0xff]   ;;  %v425_v57 = vrot.slane %v423_v48, 5 }
  0x9c   : > { %3891 = vmatpush1.bf16.msra.mxu0 %v5748_v43  ;;  %3566 = vmatprep.subr.bf16.mxu1 %v5749_v44  ;;  %v5772_v43 = vld [vmem:[#allocation6 + $0x2e0] ss:$8 sps:$4 sm:$0xff]   ;;  %v1177_v44 = vrot.slane %v1176_v36, 4  ;;  %v431_v59 = vrot.slane %v429_v51, 5  ;;  %v435_v60 = vrot.slane %v433_v52, 4  ;;  %v1209_v36 = vrot.slane %v1207_v25, 4 }
  0x9d   : > { %3892 = vmatprep.subr.bf16.mxu0 %v5751_v45  ;;  %v1186_v45 = vor.u32 %v1185_v37, %v6399_v30  ;;  %v1215_v37 = vrot.slane %v1213_v26, 5  ;;  %v4882_v51 = vld [vmem:[%s6362_s4 + $0x24] sm:$0xe]  ;;  %v5797_v26 = vld [vmem:[#allocation6 + $0x120] ss:$8 sps:$4 sm:$0xff]  }
  0x9e   : > { %v436_v8 = vor.u32 %v435_v60, %v431_v59  ;;  %v4917_v58 = vrot.slane %v4882_v51, 9 }
  0x9f   : > { %3567 = vmatpush1.bf16.msra.mxu1 %v5753_v46  ;;  %v358_v46 = vld [vmem:[%s6362_s4 + $0x14] sm:$0x1]  ;;  %v1187_v55 = vrot.slane %v1186_v45, 4 }
  0xa0   : > { %3893 = vmatpush1.bf16.msra.mxu0 %v5754_v47  ;;  %3568 = vmatprep.subr.bf16.mxu1 %v5755_v49  ;;  %v420_v47 = vshrl.u32 %v356_v40, 16  ;;  %v5773_v49 = vld [vmem:[#allocation6 + $0xf4] ss:$8 sps:$4 sm:$0xff]   ;;  %v439_v53 = vshll.u32 %v358_v46, 16  ;;  %v437_v18 = vrot.slane %v436_v8, 4  ;;  %v4929_v40 = vcombine.low %v1634_v13, %v1637_v24 }
  0xa1   : > { %3894 = vmatprep.subr.bf16.mxu0 %v5757_v50  ;;  %v5775_v50 = vld [vmem:[#allocation6 + $0x2f4] ss:$8 sps:$4 sm:$0xff]   ;;  %v1192_v10 = vsel %vm6387_vm5, %v1187_v55, %v1191_v39  ;;  %v359_v39 = vld [vmem:[%s6362_s4 + $0x18] sm:$0xf]  ;;  %v5793_v13 = vld [vmem:[#allocation6 + $0x320] ss:$8 sps:$4 sm:$0xff]  }
  0xa2   : > { %v422_v56 = vrot.slane %v420_v47, 4  ;;  %v441_v2 = vrot.slane %v439_v53, 5  ;;  %v447_v45 = vshll.u32 %v359_v39, 16  ;;  %v5786_v46 = vld [vmem:[#allocation6 + $0x310] ss:$8 sps:$4 sm:$0xff]   ;;  %v1210_v47 = vor.u32 %v1209_v36, %v1205_v35 }
  0xa3   : > { %3569 = vmatpush1.bf16.msra.mxu1 %v5759_v63  ;;  %v5777_v63 = vld [vmem:[#allocation6 + $0xf0] ss:$8 sps:$4 sm:$0xff]   ;;  %v1231_v24 = vshrl.u32 %v4831_v9, 16  ;;  %v1229_v36 = vrot.slane %v1227_v21, 5 }
  0xa4   : > { %3895 = vmatpush1.bf16.msra.mxu0 %v5760_v0  ;;  %3570 = vmatprep.subr.bf16.mxu1 %v5761_v6  ;;  %v5778_v0 = vld [vmem:[#allocation6 + $0x2f0] ss:$8 sps:$4 sm:$0xff]   ;;  %v426_v1 = vor.u32 %v425_v57, %v422_v56  ;;  %v1182_v6 = vsel %vm6387_vm5, %v1177_v44, %v6399_v30  ;;  %v442_v30 = vsel %vm6387_vm5, %v437_v18, %v441_v2  ;;  %v444_v44 = vshrl.u32 %v359_v39, 16  ;;  %v4883_v57 = vld [vmem:[%s6362_s4 + $0x28] sm:$0xf] }
  0xa5   : > { %3896 = vmatprep.subr.bf16.mxu0 %v5763_v7  ;;  %v5782_v7 = vld [vmem:[#allocation6 + $0x304] ss:$8 sps:$4 sm:$0xff]   ;;  %v5790_v53 = vld [vmem:[#allocation6 + $0x110] ss:$8 sps:$4 sm:$0xff]   ;;  %v449_v56 = vrot.slane %v447_v45, 5  ;;  %v1640_v3 = vrot.slane %v4883_v57, 5 }
  0xa6   : > { %v427_v11 = vrot.slane %v426_v1, 4  ;;  %v446_v55 = vrot.slane %v444_v44, 4  ;;  %v4830_v8 = vld [vmem:[%s6362_s4 + $0x24] sm:$0xf]  ;;  %v364_v39 = vld [vmem:[%s6362_s4 + $0x2c] sm:$0x1] }
  0xa7   : > { %3571 = vmatpush1.bf16.msra.mxu1 %v5765_v22  ;;  %v5779_v22 = vld [vmem:[%s6362_s4] sm:$0xff]   ;;  %v1641_v15 = vsel %vm6380_vm4, %v4917_v58, %v1640_v3  ;;  %v1642_v16 = vrot.slane %v1640_v3, 4  ;;  %v1218_v19 = vshrl.u32 %v4830_v8, 16  ;;  %v4885_v44 = vld [vmem:[%s6362_s4 + $0x30] sm:$0xe]  ;;  %v5796_v45 = vld [vmem:[%s6362_s4 + $0x18] sm:$0xff]  }
  0xa8   : > { %3897 = vmatpush1.bf16.msra.mxu0 %v5766_v27  ;;  %3572 = vmatprep.subr.bf16.mxu1 %v5767_v32  ;;  %v432_v23 = vsel %vm6387_vm5, %v427_v11, %v431_v59  ;;  %v4863_v27 = vcombine.low %v1182_v6, %v1192_v10  ;;  %v1199_v32 = vrot.slane %v1197_v20, 5  ;;  %v1211_v59 = vrot.slane %v1210_v47, 4  ;;  %v4832_v10 = vld [vmem:[%s6362_s4 + $0x2c] sm:$0x1]  ;;  %v4835_v3 = vld [vmem:[%s6362_s4 + $0x38] sm:$0x1] }
  0xa9   : > { %3898 = vmatprep.subr.bf16.mxu0 %v5769_v33  ;;  %v4747_v33 = vcombine.low %v432_v23, %v442_v30  ;;  %v450_v2 = vor.u32 %v449_v56, %v446_v55  ;;  %v1221_v20 = vshll.u32 %v4830_v8, 16  ;;  %v1237_v25 = vshll.u32 %v4832_v10, 16 }
  0xaa   : > { %v1200_v41 = vor.u32 %v1199_v32, %v1196_v31  ;;  %v1216_v6 = vsel %vm6387_vm5, %v1211_v59, %v1215_v37  ;;  %v1220_v30 = vrot.slane %v1218_v19, 4  ;;  %v5800_v32 = vld [vmem:[#allocation6 + $0x330] ss:$8 sps:$4 sm:$0xff]   ;;  %v1233_v37 = vrot.slane %v1231_v24, 4 }
  0xab   : > { %3573 = vmatpush1.bf16.msra.mxu1 %v5771_v42  ;;  %v360_v42 = vld [vmem:[%s6362_s4 + $0x1c] sm:$0xf]  ;;  %v451_v14 = vrot.slane %v450_v2, 4  ;;  %v1223_v31 = vrot.slane %v1221_v20, 5  ;;  %v4918_v58 = vrot.slane %v4885_v44, 9  ;;  %v1261_v21 = vshll.u32 %v4835_v3, 16 }
  0xac   : > { %3899 = vmatpush1.bf16.msra.mxu0 %v5772_v43  ;;  %3574 = vmatprep.subr.bf16.mxu1 %v5773_v49  ;;  %v361_v43 = vld [vmem:[%s6362_s4 + $0x20] sm:$0x1]  ;;  %v453_v48 = vshll.u32 %v360_v42, 16  ;;  %v457_v49 = vshrl.u32 %v360_v42, 16  ;;  %v1201_v52 = vrot.slane %v1200_v41, 4  ;;  %v5810_v3 = vld [vmem:[%s6362_s4 + $0x30] sm:$0xff]  }
  0xad   : > { %3900 = vmatprep.subr.bf16.mxu0 %v5775_v50  ;;  %v463_v50 = vshll.u32 %v361_v43, 16  ;;  %v4889_v44 = vld [vmem:[%s6362_s4 + $0x40] sm:$0xf] }
  0xae   : > { %v455_v60 = vrot.slane %v453_v48, 5  ;;  %v459_v61 = vrot.slane %v457_v49, 4  ;;  %v1206_v1 = vsel %vm6387_vm5, %v1201_v52, %v1205_v35  ;;  %v487_v48 = vshll.u32 %v364_v39, 16  ;;  %v4886_v49 = vld [vmem:[%s6362_s4 + $0x34] sm:$0xf] }
  0xaf   : > { %3575 = vmatpush1.bf16.msra.mxu1 %v5777_v63  ;;  %v465_v62 = vrot.slane %v463_v50, 5  ;;  %v4884_v63 = vld [vmem:[%s6362_s4 + $0x2c] sm:$0x1]  ;;  %v4864_v11 = vcombine.low %v1206_v1, %v1216_v6  ;;  %v4887_v50 = vld [vmem:[%s6362_s4 + $0x38] sm:$0x1] }
  0xb0   : > { %3901 = vmatpush1.bf16.msra.mxu0 %v5778_v0  ;;  %3707 = vmatprep.subr.bf16.mxu1 %v5785_v17  ;;  %v5789_v0 = vld [vmem:[%s6362_s4 + $0xc] sm:$0xff]   ;;  %v1643_v5 = vrot.slane %v4884_v63, 5  ;;  %v489_v57 = vrot.slane %v487_v48, 5 }
  0xb1   : > { %4033 = vmatprep.subr.bf16.mxu0 %v5782_v7  ;;  %v460_v7 = vor.u32 %v459_v61, %v455_v60  ;;  %v5799_v17 = vld [vmem:[#allocation6 + $0x124] ss:$8 sps:$4 sm:$0xff]   ;;  %v1647_v61 = vrot.slane %v4886_v49, 5  ;;  %v4833_v63 = vld [vmem:[%s6362_s4 + $0x30] sm:$0xf] }
  0xb2   : > { %3577 = vmatmul.mubr.bf16.vlgmr.msra.gmra.mrb[0].mxu1 %v5779_v22  ;;  %v456_v22 = vsel %vm6387_vm5, %v451_v14, %v455_v60  ;;  %v1644_v23 = vsel %vm6380_vm4, %v1642_v16, %v1643_v5  ;;  %v1242_v5 = vshrl.u32 %v4833_v63, 16  ;;  %v1245_v6 = vshll.u32 %v4833_v63, 16  ;;  %v4837_v63 = vld [vmem:[%s6362_s4 + $0x40] sm:$0xf] }
  0xb3   : > { %3903 = vmatmul.mubr.bf16.vlgmr.msra.gmra.mrb[0].mxu0 %v4863_v27  ;;  %3586 = vmatprep.mubr.bf16.mxu1 %v4747_v33  ;;  %v461_v18 = vrot.slane %v460_v7, 4  ;;  %v5802_v27 = vld [vmem:[#allocation6 + $0x334] ss:$8 sps:$4 sm:$0xff]   ;;  %v1648_v9 = vsel %vm6380_vm4, %v4918_v58, %v1647_v61  ;;  %v1649_v10 = vrot.slane %v1647_v61, 4  ;;  %v5813_v58 = vld [vmem:[#allocation6 + $0x144] ss:$8 sps:$4 sm:$0xff]  }
  0xb4   : > { %4034 = vmatpush1.bf16.msra.mxu0 %v5780_v28  ;;  %3708 = vmatpush1.bf16.msra.mxu1 %v5783_v29  ;;  %v4930_v29 = vcombine.low %v1641_v15, %v1644_v23  ;;  %v362_v33 = vld [vmem:[%s6362_s4 + $0x24] sm:$0xf]  ;;  %v1244_v15 = vrot.slane %v1242_v5, 4  ;;  %v1247_v16 = vrot.slane %v1245_v6, 5  ;;  %v5809_v23 = vld [vmem:[#allocation6 + $0x344] ss:$8 sps:$4 sm:$0xff]  }
  0xb5   : > { %3912 = vmatprep.mubr.bf16.mxu0 %v4929_v40  ;;  %4035 = vmatprep.subr.bf16.mxu0 %v5788_v34  ;;  %v466_v28 = vsel %vm6387_vm5, %v461_v18, %v465_v62  ;;  %v363_v34 = vld [vmem:[%s6362_s4 + $0x28] sm:$0xf]  ;;  %v1224_v40 = vor.u32 %v1223_v31, %v1220_v30  ;;  %v468_v41 = vshrl.u32 %v362_v33, 16  ;;  %v471_v42 = vshll.u32 %v362_v33, 16  ;;  %v366_v30 = vld [vmem:[%s6362_s4 + $0x34] sm:$0xf] }
  0xb6   : > { %3709 = vmatprep.subr.bf16.mxu1 %v5792_v38  ;;  %v4748_v35 = vcombine.low %v456_v22, %v466_v28  ;;  %v1239_v38 = vrot.slane %v1237_v25, 5  ;;  %v477_v43 = vshll.u32 %v363_v34, 16  ;;  %v481_v47 = vshrl.u32 %v363_v34, 16  ;;  %v5807_v22 = vld [vmem:[#allocation6 + $0x340] ss:$8 sps:$4 sm:$0xff]  }
  0xb7   : > { %v1225_v51 = vrot.slane %v1224_v40, 4  ;;  %v470_v52 = vrot.slane %v468_v41, 4  ;;  %v1650_v62 = vrot.slane %v4887_v50, 5  ;;  %v1263_v33 = vrot.slane %v1261_v21, 5  ;;  %v367_v34 = vld [vmem:[%s6362_s4 + $0x38] sm:$0x1] }
  0xb8   : > { %4036 = vmatpush1.bf16.msra.mxu0 %v5786_v46  ;;  %3710 = vmatpush1.bf16.msra.mxu1 %v5790_v53  ;;  %v1234_v46 = vor.u32 %v1233_v37, %v1229_v36  ;;  %v473_v53 = vrot.slane %v471_v42, 5  ;;  %v483_v56 = vrot.slane %v481_v47, 4  ;;  %v505_v39 = vshrl.u32 %v366_v30, 16  ;;  %v4888_v40 = vld [vmem:[%s6362_s4 + $0x3c] sm:$0xe] }
  0xb9   : > { %4037 = vmatprep.subr.bf16.mxu0 %v5795_v54  ;;  %3711 = vmatprep.subr.bf16.mxu1 %v5799_v17  ;;  %v479_v54 = vrot.slane %v477_v43, 5  ;;  %v1230_v59 = vsel %vm6387_vm5, %v1225_v51, %v1229_v36  ;;  %v1651_v19 = vsel %vm6380_vm4, %v1649_v10, %v1650_v62  ;;  %v511_v43 = vshll.u32 %v367_v34, 16  ;;  %v4836_v62 = vld [vmem:[%s6362_s4 + $0x3c] sm:$0xf]  ;;  %v4838_v5 = vld [vmem:[%s6362_s4 + $0x44] sm:$0x1] }
  0xba   : > { %3587 = vmatmul.mubr.bf16.gmra.mrb[4].mxu1 %v5789_v0  ;;  %v1235_v55 = vrot.slane %v1234_v46, 4  ;;  %v474_v60 = vor.u32 %v473_v53, %v470_v52  ;;  %v4834_v0 = vld [vmem:[%s6362_s4 + $0x34] sm:$0xf]  ;;  %v4931_v25 = vcombine.low %v1648_v9, %v1651_v19  ;;  %v507_v49 = vrot.slane %v505_v39, 4  ;;  %v5819_v34 = vld [vmem:[#allocation6 + $0x154] ss:$8 sps:$4 sm:$0xff]  }
  0xbb   : > { %3913 = vmatmul.mubr.bf16.gmra.mrb[4].mxu0 %v4864_v11  ;;  %3596 = vmatprep.mubr.bf16.mxu1 %v4748_v35  ;;  %v484_v2 = vor.u32 %v483_v56, %v479_v54  ;;  %v5804_v11 = vld [vmem:[#allocation6 + $0x130] ss:$8 sps:$4 sm:$0xff]   ;;  %v1251_v17 = vshll.u32 %v4834_v0, 16  ;;  %v1255_v20 = vshrl.u32 %v4834_v0, 16  ;;  %v513_v51 = vrot.slane %v511_v43, 5 }
  0xbc   : > { %4038 = vmatpush1.bf16.msra.mxu0 %v5793_v13  ;;  %3922 = vmatprep.mubr.bf16.mxu0 %v4930_v29  ;;  %v1240_v1 = vsel %vm6387_vm5, %v1235_v55, %v1239_v38  ;;  %v475_v8 = vrot.slane %v474_v60, 4  ;;  %v5806_v13 = vld [vmem:[#allocation6 + $0x134] ss:$8 sps:$4 sm:$0xff]   ;;  %v501_v38 = vshll.u32 %v366_v30, 16  ;;  %v4919_v52 = vrot.slane %v4888_v40, 9 }
  0xbd   : > { %3712 = vmatpush1.bf16.msra.mxu1 %v5797_v26  ;;  %4039 = vmatprep.subr.bf16.mxu0 %v5802_v27  ;;  %v4865_v7 = vcombine.low %v1230_v59, %v1240_v1  ;;  %v485_v14 = vrot.slane %v484_v2, 4  ;;  %v5803_v26 = vld [vmem:[%s6362_s4 + $0x24] sm:$0xff]   ;;  %v1248_v27 = vor.u32 %v1247_v16, %v1244_v15  ;;  %v1253_v28 = vrot.slane %v1251_v17, 5  ;;  %v365_v29 = vld [vmem:[%s6362_s4 + $0x30] sm:$0xf] }
  0xbe   : > { %v480_v18 = vsel %vm6387_vm5, %v475_v8, %v479_v54  ;;  %3713 = vmatprep.subr.bf16.mxu1 %v5806_v13  ;;  %v492_v35 = vshrl.u32 %v365_v29, 16  ;;  %v495_v37 = vshll.u32 %v365_v29, 16  ;;  %v503_v48 = vrot.slane %v501_v38, 5  ;;  %v5816_v17 = vld [vmem:[#allocation6 + $0x354] ss:$8 sps:$4 sm:$0xff]  }
  0xbf   : > { %v490_v24 = vsel %vm6387_vm5, %v485_v14, %v489_v57  ;;  %v1249_v36 = vrot.slane %v1248_v27, 4  ;;  %v1654_v53 = vrot.slane %v4889_v44, 5  ;;  %v5811_v57 = vld [vmem:[#allocation6 + $0x140] ss:$8 sps:$4 sm:$0xff]   ;;  %v1266_v6 = vshrl.u32 %v4836_v62, 16 }
  0xc0   : > { %4040 = vmatpush1.bf16.msra.mxu0 %v5800_v32  ;;  %v4749_v31 = vcombine.low %v480_v18, %v490_v24  ;;  %v1257_v32 = vrot.slane %v1255_v20, 4  ;;  %v494_v42 = vrot.slane %v492_v35, 4  ;;  %v497_v47 = vrot.slane %v495_v37, 5  ;;  %v368_v18 = vld [vmem:[%s6362_s4 + $0x3c] sm:$0xf] }
  0xc1   : > { %3714 = vmatpush1.bf16.msra.mxu1 %v5804_v11  ;;  %4041 = vmatprep.subr.bf16.mxu0 %v5809_v23  ;;  %v1254_v46 = vsel %vm6387_vm5, %v1249_v36, %v1253_v28  ;;  %v508_v55 = vor.u32 %v507_v49, %v503_v48  ;;  %v1655_v60 = vsel %vm6380_vm4, %v4919_v52, %v1654_v53  ;;  %v1656_v61 = vrot.slane %v1654_v53, 4  ;;  %v5814_v11 = vld [vmem:[#allocation6 + $0x350] ss:$8 sps:$4 sm:$0xff]   ;;  %v4891_v39 = vld [vmem:[%s6362_s4 + $0x48] sm:$0xe] }
  0xc2   : > { %3597 = vmatmul.mubr.bf16.gmra.mrb[8].mxu1 %v5796_v45  ;;  %v1258_v41 = vor.u32 %v1257_v32, %v1253_v28  ;;  %v4890_v45 = vld [vmem:[%s6362_s4 + $0x44] sm:$0x1]  ;;  %v498_v54 = vor.u32 %v497_v47, %v494_v42  ;;  %3715 = vmatprep.subr.bf16.mxu1 %v5813_v58  ;;  %v1269_v8 = vshll.u32 %v4836_v62, 16  ;;  %v1275_v9 = vshll.u32 %v4837_v63, 16  ;;  %v369_v23 = vld [vmem:[%s6362_s4 + $0x40] sm:$0xf] }
  0xc3   : > { %3923 = vmatmul.mubr.bf16.gmra.mrb[8].mxu0 %v4865_v7  ;;  %3606 = vmatprep.mubr.bf16.mxu1 %v4749_v31  ;;  %v1657_v56 = vrot.slane %v4890_v45, 5  ;;  %v509_v2 = vrot.slane %v508_v55, 4  ;;  %v1279_v10 = vshrl.u32 %v4837_v63, 16  ;;  %v1268_v16 = vrot.slane %v1266_v6, 4  ;;  %v4892_v44 = vld [vmem:[%s6362_s4 + $0x4c] sm:$0xf] }
  0xc4   : > { %3932 = vmatprep.mubr.bf16.mxu0 %v4931_v25  ;;  %4042 = vmatpush1.bf16.msra.mxu0 %v5807_v22  ;;  %v1259_v50 = vrot.slane %v1258_v41, 4  ;;  %v499_v1 = vrot.slane %v498_v54, 4  ;;  %v1271_v20 = vrot.slane %v1269_v8, 5  ;;  %v1277_v21 = vrot.slane %v1275_v9, 5  ;;  %v370_v25 = vld [vmem:[%s6362_s4 + $0x44] sm:$0x1] }
  0xc5   : > { %v1658_v7 = vsel %vm6380_vm4, %v1656_v61, %v1657_v56  ;;  %3716 = vmatpush1.bf16.msra.mxu1 %v5811_v57  ;;  %v514_v14 = vsel %vm6387_vm5, %v509_v2, %v513_v51  ;;  %v1281_v22 = vrot.slane %v1279_v10, 4  ;;  %v1285_v24 = vshll.u32 %v4838_v5, 16  ;;  %4043 = vmatprep.subr.bf16.mxu0 %v5816_v17  ;;  %v5820_v49 = vld [vmem:[#allocation6 + $0x360] ss:$8 sps:$4 sm:$0xff]   ;;  %v5822_v54 = vld [vmem:[#allocation6 + $0x364] ss:$8 sps:$4 sm:$0xff]  }
  0xc6   : > { %v1264_v59 = vsel %vm6387_vm5, %v1259_v50, %v1263_v33  ;;  %v504_v13 = vsel %vm6387_vm5, %v499_v1, %v503_v48  ;;  %v4932_v15 = vcombine.low %v1655_v60, %v1658_v7  ;;  %v519_v27 = vshll.u32 %v368_v18, 16  ;;  %v5817_v33 = vld [vmem:[#allocation6 + $0x150] ss:$8 sps:$4 sm:$0xff]   ;;  %3717 = vmatprep.subr.bf16.mxu1 %v5819_v34  ;;  %v4841_v62 = vld [vmem:[%s6362_s4 + $0x50] sm:$0x1] }
  0xc7   : > { %v4866_v0 = vcombine.low %v1254_v46, %v1264_v59  ;;  %v4750_v19 = vcombine.low %v504_v13, %v514_v14  ;;  %v525_v28 = vshll.u32 %v369_v23, 16  ;;  %v1272_v29 = vor.u32 %v1271_v20, %v1268_v16  ;;  %v4893_v46 = vld [vmem:[%s6362_s4 + $0x50] sm:$0x1]  ;;  %v4839_v59 = vld [vmem:[%s6362_s4 + $0x48] sm:$0xf]  ;;  %v5823_v8 = vld [vmem:[%s6362_s4 + $0x3c] sm:$0xff]  }
  0xc8   : > { %v1282_v30 = vor.u32 %v1281_v22, %v1277_v21  ;;  %4044 = vmatpush1.bf16.msra.mxu0 %v5814_v11  ;;  %v529_v31 = vshrl.u32 %v369_v23, 16  ;;  %v535_v32 = vshll.u32 %v370_v25, 16  ;;  %v1287_v35 = vrot.slane %v1285_v24, 5  ;;  %v4840_v61 = vld [vmem:[%s6362_s4 + $0x4c] sm:$0xf] }
  0xc9   : > { %v521_v37 = vrot.slane %v519_v27, 5  ;;  %v527_v38 = vrot.slane %v525_v28, 5  ;;  %v1273_v40 = vrot.slane %v1272_v29, 4  ;;  %v4920_v47 = vrot.slane %v4891_v39, 9  ;;  %3718 = vmatpush1.bf16.msra.mxu1 %v5817_v33  ;;  %4045 = vmatprep.subr.bf16.mxu0 %v5822_v54  ;;  %v5824_v5 = vld [vmem:[#allocation6 + $0x160] ss:$8 sps:$4 sm:$0xff]  }
  0xca   : > { %3607 = vmatmul.mubr.bf16.gmra.mrb[12].mxu1 %v5803_v26  ;;  %v516_v26 = vshrl.u32 %v368_v18, 16  ;;  %v1283_v41 = vrot.slane %v1282_v30, 4  ;;  %v531_v42 = vrot.slane %v529_v31, 4  ;;  %v537_v43 = vrot.slane %v535_v32, 5  ;;  %v5826_v11 = vld [vmem:[#allocation6 + $0x164] ss:$8 sps:$4 sm:$0xff]  }
  0xcb   : > { %3933 = vmatmul.mubr.bf16.gmra.mrb[12].mxu0 %v4866_v0  ;;  %3616 = vmatprep.mubr.bf16.mxu1 %v4750_v19  ;;  %v1661_v48 = vrot.slane %v4892_v44, 5  ;;  %v1278_v50 = vsel %vm6387_vm5, %v1273_v40, %v1277_v21  ;;  %v1664_v53 = vrot.slane %v4893_v46, 5  ;;  %v1290_v63 = vshrl.u32 %v4839_v59, 16  ;;  %v5827_v17 = vld [vmem:[#allocation6 + $0x370] ss:$8 sps:$4 sm:$0xff]  }
  0xcc   : > { %3942 = vmatprep.mubr.bf16.mxu0 %v4932_v15  ;;  %v518_v36 = vrot.slane %v516_v26, 4  ;;  %v1288_v51 = vsel %vm6387_vm5, %v1283_v41, %v1287_v35  ;;  %v532_v52 = vor.u32 %v531_v42, %v527_v38  ;;  %v1293_v2 = vshll.u32 %v4839_v59, 16  ;;  %4046 = vmatpush1.bf16.msra.mxu0 %v5820_v49  ;;  %v5829_v19 = vld [vmem:[#allocation6 + $0x374] ss:$8 sps:$4 sm:$0xff]   ;;  %v372_v23 = vld [vmem:[%s6362_s4 + $0x4c] sm:$0xf] }
  0xcd   : > { %v4867_v55 = vcombine.low %v1278_v50, %v1288_v51  ;;  %v1662_v57 = vsel %vm6380_vm4, %v4920_v47, %v1661_v48  ;;  %v1663_v58 = vrot.slane %v1661_v48, 4  ;;  %v1292_v9 = vrot.slane %v1290_v63, 4  ;;  %3719 = vmatprep.subr.bf16.mxu1 %v5826_v11  ;;  %v371_v20 = vld [vmem:[%s6362_s4 + $0x48] sm:$0xf]  ;;  %v373_v24 = vld [vmem:[%s6362_s4 + $0x50] sm:$0x1]  ;;  %4047 = vmatprep.subr.bf16.mxu0 %v5829_v19 }
  0xce   : > { %v522_v45 = vor.u32 %v521_v37, %v518_v36  ;;  %v533_v60 = vrot.slane %v532_v52, 4  ;;  %v1303_v10 = vshrl.u32 %v4840_v61, 16  ;;  %v1295_v14 = vrot.slane %v1293_v2, 5  ;;  %3720 = vmatpush1.bf16.msra.mxu1 %v5824_v5  ;;  %v4894_v30 = vld [vmem:[%s6362_s4 + $0x54] sm:$0xe] }
  0xcf   : > { %v1665_v1 = vsel %vm6380_vm4, %v1663_v58, %v1664_v53  ;;  %v1309_v16 = vshll.u32 %v4841_v62, 16  ;;  %v540_v25 = vshrl.u32 %v371_v20, 16  ;;  %v543_v27 = vshll.u32 %v371_v20, 16  ;;  %v4895_v34 = vld [vmem:[%s6362_s4 + $0x58] sm:$0xf]  ;;  %v5830_v62 = vld [vmem:[%s6362_s4 + $0x48] sm:$0xff]  }
  0xd0   : > { %v523_v56 = vrot.slane %v522_v45, 4  ;;  %v538_v6 = vsel %vm6387_vm5, %v533_v60, %v537_v43  ;;  %v4933_v7 = vcombine.low %v1662_v57, %v1665_v1  ;;  %v1305_v18 = vrot.slane %v1303_v10, 4  ;;  %4048 = vmatpush1.bf16.msra.mxu0 %v5827_v17  ;;  %v4896_v40 = vld [vmem:[%s6362_s4 + $0x5c] sm:$0x1]  ;;  %v4842_v48 = vld [vmem:[%s6362_s4 + $0x54] sm:$0xf] }
  0xd1   : > { %v1296_v21 = vor.u32 %v1295_v14, %v1292_v9  ;;  %v1311_v22 = vrot.slane %v1309_v16, 5  ;;  %v549_v28 = vshll.u32 %v372_v23, 16  ;;  %v553_v29 = vshrl.u32 %v372_v23, 16  ;;  %v4843_v49 = vld [vmem:[%s6362_s4 + $0x58] sm:$0xf] }
  0xd2   : > { %3617 = vmatmul.mubr.bf16.gmra.mrb[16].mxu1 %v5810_v3  ;;  %v528_v0 = vsel %vm6387_vm5, %v523_v56, %v527_v38  ;;  %v1299_v3 = vshll.u32 %v4840_v61, 16  ;;  %v542_v32 = vrot.slane %v540_v25, 4  ;;  %v559_v33 = vshll.u32 %v373_v24, 16  ;;  %v4844_v53 = vld [vmem:[%s6362_s4 + $0x5c] sm:$0x1] }
  0xd3   : > { %3943 = vmatmul.mubr.bf16.gmra.mrb[16].mxu0 %v4867_v55  ;;  %v4751_v13 = vcombine.low %v528_v0, %v538_v6  ;;  %v1297_v31 = vrot.slane %v1296_v21, 4  ;;  %v4921_v35 = vrot.slane %v4894_v30, 9  ;;  %v545_v37 = vrot.slane %v543_v27, 5  ;;  %v5831_v55 = vld [vmem:[#allocation6 + $0x170] ss:$8 sps:$4 sm:$0xff]  }
  0xd4   : > { %v1301_v15 = vrot.slane %v1299_v3, 5  ;;  %3952 = vmatprep.mubr.bf16.mxu0 %v4933_v7  ;;  %v551_v38 = vrot.slane %v549_v28, 5  ;;  %v555_v39 = vrot.slane %v553_v29, 4  ;;  %v561_v42 = vrot.slane %v559_v33, 5  ;;  %v5833_v60 = vld [vmem:[#allocation6 + $0x174] ss:$8 sps:$4 sm:$0xff]  }
  0xd5   : > { %3626 = vmatprep.mubr.bf16.mxu1 %v4751_v13  ;;  %v1668_v43 = vrot.slane %v4895_v34, 5  ;;  %v1671_v44 = vrot.slane %v4896_v40, 5  ;;  %v546_v46 = vor.u32 %v545_v37, %v542_v32  ;;  %v1314_v54 = vshrl.u32 %v4842_v48, 16  ;;  %v5834_v2 = vld [vmem:[#allocation6 + $0x380] ss:$8 sps:$4 sm:$0xff]   ;;  %3721 = vmatprep.subr.bf16.mxu1 %v5833_v60 }
  0xd6   : > { %v1306_v26 = vor.u32 %v1305_v18, %v1301_v15  ;;  %v1302_v41 = vsel %vm6387_vm5, %v1297_v31, %v1301_v15  ;;  %v556_v47 = vor.u32 %v555_v39, %v551_v38  ;;  %v1317_v58 = vshll.u32 %v4842_v48, 16  ;;  %v374_v9 = vld [vmem:[%s6362_s4 + $0x54] sm:$0xf]  ;;  %3722 = vmatpush1.bf16.msra.mxu1 %v5831_v55  ;;  %v375_v15 = vld [vmem:[%s6362_s4 + $0x58] sm:$0xf] }
  0xd7   : > { %v1669_v51 = vsel %vm6380_vm4, %v4921_v35, %v1668_v43  ;;  %v1670_v52 = vrot.slane %v1668_v43, 4  ;;  %v547_v56 = vrot.slane %v546_v46, 4  ;;  %v1323_v59 = vshll.u32 %v4843_v49, 16  ;;  %v376_v17 = vld [vmem:[%s6362_s4 + $0x5c] sm:$0x1] }
  0xd8   : > { %v1307_v36 = vrot.slane %v1306_v26, 4  ;;  %v557_v57 = vrot.slane %v556_v47, 4  ;;  %v1316_v63 = vrot.slane %v1314_v54, 4  ;;  %v1327_v0 = vshrl.u32 %v4843_v49, 16  ;;  %v4897_v24 = vld [vmem:[%s6362_s4 + $0x60] sm:$0xe] }
  0xd9   : > { %v1672_v61 = vsel %vm6380_vm4, %v1670_v52, %v1671_v44  ;;  %v1333_v1 = vshll.u32 %v4844_v53, 16  ;;  %v552_v3 = vsel %vm6387_vm5, %v547_v56, %v551_v38  ;;  %v1319_v7 = vrot.slane %v1317_v58, 5  ;;  %v4898_v25 = vld [vmem:[%s6362_s4 + $0x64] sm:$0xf]  ;;  %v4899_v30 = vld [vmem:[%s6362_s4 + $0x68] sm:$0x1] }
  0xda   : > { %3627 = vmatmul.mubr.bf16.gmra.mrb[20].mxu1 %v5823_v8  ;;  %v1312_v45 = vsel %vm6387_vm5, %v1307_v36, %v1311_v22  ;;  %v562_v5 = vsel %vm6387_vm5, %v557_v57, %v561_v42  ;;  %v4934_v6 = vcombine.low %v1669_v51, %v1672_v61  ;;  %v5836_v8 = vld [vmem:[#allocation6 + $0x384] ss:$8 sps:$4 sm:$0xff]   ;;  %v1325_v11 = vrot.slane %v1323_v59, 5  ;;  %v4846_v42 = vld [vmem:[%s6362_s4 + $0x64] sm:$0xf] }
  0xdb   : > { %v4868_v50 = vcombine.low %v1302_v41, %v1312_v45  ;;  %v4752_v10 = vcombine.low %v552_v3, %v562_v5  ;;  %v1329_v13 = vrot.slane %v1327_v0, 4  ;;  %v1335_v14 = vrot.slane %v1333_v1, 5  ;;  %4049 = vmatprep.subr.bf16.mxu0 %v5836_v8  ;;  %v4845_v39 = vld [vmem:[%s6362_s4 + $0x60] sm:$0xf]  ;;  %v4847_v43 = vld [vmem:[%s6362_s4 + $0x68] sm:$0x1] }
  0xdc   : > { %v1320_v16 = vor.u32 %v1319_v7, %v1316_v63  ;;  %v564_v18 = vshrl.u32 %v374_v9, 16  ;;  %v567_v19 = vshll.u32 %v374_v9, 16  ;;  %v573_v20 = vshll.u32 %v375_v15, 16  ;;  %4050 = vmatpush1.bf16.msra.mxu0 %v5834_v2  ;;  %v5840_v51 = vld [vmem:[#allocation6 + $0x184] ss:$8 sps:$4 sm:$0xff]  }
  0xdd   : > { %3953 = vmatmul.mubr.bf16.gmra.mrb[20].mxu0 %v4868_v50  ;;  %3636 = vmatprep.mubr.bf16.mxu1 %v4752_v10  ;;  %v1330_v21 = vor.u32 %v1329_v13, %v1325_v11  ;;  %v577_v22 = vshrl.u32 %v375_v15, 16  ;;  %v583_v23 = vshll.u32 %v376_v17, 16  ;;  %v4922_v34 = vrot.slane %v4897_v24, 9  ;;  %v5838_v50 = vld [vmem:[#allocation6 + $0x180] ss:$8 sps:$4 sm:$0xff]  }
  0xde   : > { %3962 = vmatprep.mubr.bf16.mxu0 %v4934_v6  ;;  %v1321_v26 = vrot.slane %v1320_v16, 4  ;;  %v566_v27 = vrot.slane %v564_v18, 4  ;;  %v569_v28 = vrot.slane %v567_v19, 5  ;;  %v575_v29 = vrot.slane %v573_v20, 5  ;;  %v5837_v53 = vld [vmem:[%s6362_s4 + $0x54] sm:$0xff]   ;;  %3723 = vmatprep.subr.bf16.mxu1 %v5840_v51 }
  0xdf   : > { %v1331_v31 = vrot.slane %v1330_v21, 4  ;;  %v579_v32 = vrot.slane %v577_v22, 4  ;;  %v585_v33 = vrot.slane %v583_v23, 5  ;;  %v1675_v37 = vrot.slane %v4898_v25, 5  ;;  %v5841_v61 = vld [vmem:[#allocation6 + $0x390] ss:$8 sps:$4 sm:$0xff]   ;;  %3724 = vmatpush1.bf16.msra.mxu1 %v5838_v50 }
  0xe0   : > { %v1326_v35 = vsel %vm6387_vm5, %v1321_v26, %v1325_v11  ;;  %v570_v36 = vor.u32 %v569_v28, %v566_v27  ;;  %v1678_v38 = vrot.slane %v4899_v30, 5  ;;  %v1338_v44 = vshrl.u32 %v4845_v39, 16  ;;  %v377_v3 = vld [vmem:[%s6362_s4 + $0x60] sm:$0xf]  ;;  %v378_v5 = vld [vmem:[%s6362_s4 + $0x64] sm:$0xf] }
  0xe1   : > { %v1336_v40 = vsel %vm6387_vm5, %v1331_v31, %v1335_v14  ;;  %v580_v41 = vor.u32 %v579_v32, %v575_v29  ;;  %v1341_v45 = vshll.u32 %v4845_v39, 16  ;;  %v1676_v48 = vsel %vm6380_vm4, %v4922_v34, %v1675_v37  ;;  %v379_v9 = vld [vmem:[%s6362_s4 + $0x68] sm:$0x1]  ;;  %v4900_v16 = vld [vmem:[%s6362_s4 + $0x6c] sm:$0xe] }
  0xe2   : > { %3637 = vmatmul.mubr.bf16.gmra.mrb[24].mxu1 %v5830_v62  ;;  %v4869_v46 = vcombine.low %v1326_v35, %v1336_v40  ;;  %v571_v47 = vrot.slane %v570_v36, 4  ;;  %v1677_v49 = vrot.slane %v1675_v37, 4  ;;  %v1340_v54 = vrot.slane %v1338_v44, 4  ;;  %v5843_v62 = vld [vmem:[#allocation6 + $0x394] ss:$8 sps:$4 sm:$0xff]  }
  0xe3   : > { %v581_v52 = vrot.slane %v580_v41, 4  ;;  %v1343_v55 = vrot.slane %v1341_v45, 5  ;;  %v1347_v56 = vshll.u32 %v4846_v42, 16  ;;  %v1351_v59 = vshrl.u32 %v4846_v42, 16  ;;  %4051 = vmatprep.subr.bf16.mxu0 %v5843_v62  ;;  %v4901_v20 = vld [vmem:[%s6362_s4 + $0x70] sm:$0xf] }
  0xe4   : > { %v576_v57 = vsel %vm6387_vm5, %v571_v47, %v575_v29  ;;  %v1679_v58 = vsel %vm6380_vm4, %v1677_v49, %v1678_v38  ;;  %v1357_v60 = vshll.u32 %v4847_v43, 16  ;;  %v588_v10 = vshrl.u32 %v377_v3, 16  ;;  %4052 = vmatpush1.bf16.msra.mxu0 %v5841_v61  ;;  %v4902_v21 = vld [vmem:[%s6362_s4 + $0x74] sm:$0x1]  ;;  %v4849_v34 = vld [vmem:[%s6362_s4 + $0x70] sm:$0xf] }
  0xe5   : > { %3963 = vmatmul.mubr.bf16.gmra.mrb[24].mxu0 %v4869_v46  ;;  %v586_v63 = vsel %vm6387_vm5, %v581_v52, %v585_v33  ;;  %v4935_v0 = vcombine.low %v1676_v48, %v1679_v58  ;;  %v1344_v1 = vor.u32 %v1343_v55, %v1340_v54  ;;  %v1349_v2 = vrot.slane %v1347_v56, 5  ;;  %v4848_v33 = vld [vmem:[%s6362_s4 + $0x6c] sm:$0xf]  ;;  %v4850_v38 = vld [vmem:[%s6362_s4 + $0x74] sm:$0x1]  ;;  %v5844_v54 = vld [vmem:[%s6362_s4 + $0x60] sm:$0xff]  }
  0xe6   : > { %v4753_v6 = vcombine.low %v576_v57, %v586_v63  ;;  %v1353_v7 = vrot.slane %v1351_v59, 4  ;;  %v1359_v8 = vrot.slane %v1357_v60, 5  ;;  %v591_v13 = vshll.u32 %v377_v3, 16  ;;  %v5845_v40 = vld [vmem:[#allocation6 + $0x190] ss:$8 sps:$4 sm:$0xff]  }
  0xe7   : > { %3972 = vmatprep.mubr.bf16.mxu0 %v4935_v0  ;;  %v1345_v11 = vrot.slane %v1344_v1, 4  ;;  %v597_v14 = vshll.u32 %v378_v5, 16  ;;  %v601_v15 = vshrl.u32 %v378_v5, 16  ;;  %v590_v18 = vrot.slane %v588_v10, 4  ;;  %v5847_v45 = vld [vmem:[#allocation6 + $0x194] ss:$8 sps:$4 sm:$0xff]  }
  0xe8   : > { %3646 = vmatprep.mubr.bf16.mxu1 %v4753_v6  ;;  %v1354_v17 = vor.u32 %v1353_v7, %v1349_v2  ;;  %v607_v19 = vshll.u32 %v379_v9, 16  ;;  %v593_v23 = vrot.slane %v591_v13, 5  ;;  %v4923_v28 = vrot.slane %v4900_v16, 9  ;;  %v5848_v50 = vld [vmem:[#allocation6 + $0x3a0] ss:$8 sps:$4 sm:$0xff]   ;;  %3725 = vmatprep.subr.bf16.mxu1 %v5847_v45 }
  0xe9   : > { %v1350_v22 = vsel %vm6387_vm5, %v1345_v11, %v1349_v2  ;;  %v599_v24 = vrot.slane %v597_v14, 5  ;;  %v603_v25 = vrot.slane %v601_v15, 4  ;;  %v1682_v29 = vrot.slane %v4901_v20, 5  ;;  %v5850_v56 = vld [vmem:[#allocation6 + $0x3a4] ss:$8 sps:$4 sm:$0xff]   ;;  %3726 = vmatpush1.bf16.msra.mxu1 %v5845_v40 }
  0xea   : > { %3647 = vmatmul.mubr.bf16.gmra.mrb[28].mxu1 %v5837_v53  ;;  %v1355_v26 = vrot.slane %v1354_v17, 4  ;;  %v609_v27 = vrot.slane %v607_v19, 5  ;;  %v594_v30 = vor.u32 %v593_v23, %v590_v18  ;;  %v1685_v32 = vrot.slane %v4902_v21, 5  ;;  %v380_v57 = vld [vmem:[%s6362_s4 + $0x6c] sm:$0xf]  ;;  %4053 = vmatprep.subr.bf16.mxu0 %v5850_v56 }
  0xeb   : > { %v604_v31 = vor.u32 %v603_v25, %v599_v24  ;;  %v1683_v36 = vsel %vm6380_vm4, %v4923_v28, %v1682_v29  ;;  %v1684_v37 = vrot.slane %v1682_v29, 4  ;;  %v1362_v39 = vshrl.u32 %v4848_v33, 16  ;;  %v381_v62 = vld [vmem:[%s6362_s4 + $0x70] sm:$0xf]  ;;  %v382_v0 = vld [vmem:[%s6362_s4 + $0x74] sm:$0x1]  ;;  %4054 = vmatpush1.bf16.msra.mxu0 %v5848_v50 }
  0xec   : > { %v1360_v35 = vsel %vm6387_vm5, %v1355_v26, %v1359_v8  ;;  %v595_v42 = vrot.slane %v594_v30, 4  ;;  %v1365_v44 = vshll.u32 %v4848_v33, 16  ;;  %v1371_v48 = vshll.u32 %v4849_v34, 16  ;;  %v5851_v9 = vld [vmem:[#allocation6 + $0x1a0] ss:$8 sps:$4 sm:$0xff]  }
  0xed   : > { %v4870_v41 = vcombine.low %v1350_v22, %v1360_v35  ;;  %v605_v43 = vrot.slane %v604_v31, 4  ;;  %v1686_v46 = vsel %vm6380_vm4, %v1684_v37, %v1685_v32  ;;  %v1364_v47 = vrot.slane %v1362_v39, 4  ;;  %v5853_v15 = vld [vmem:[#allocation6 + $0x1a4] ss:$8 sps:$4 sm:$0xff]   ;;  %v4904_v22 = vld [vmem:[%s6362_s4 + $0x7c] sm:$0xf] }
  0xee   : > { %v1375_v49 = vshrl.u32 %v4849_v34, 16  ;;  %v600_v51 = vsel %vm6387_vm5, %v595_v42, %v599_v24  ;;  %v4936_v53 = vcombine.low %v1683_v36, %v1686_v46  ;;  %v1367_v55 = vrot.slane %v1365_v44, 5  ;;  %v4903_v19 = vld [vmem:[%s6362_s4 + $0x78] sm:$0xe]  ;;  %3727 = vmatprep.subr.bf16.mxu1 %v5853_v15  ;;  %v4905_v23 = vld [vmem:[%s6362_s4 + $0x80] sm:$0x1] }
  0xef   : > { %3973 = vmatmul.mubr.bf16.gmra.mrb[28].mxu0 %v4870_v41  ;;  %v610_v52 = vsel %vm6387_vm5, %v605_v43, %v609_v27  ;;  %v1373_v59 = vrot.slane %v1371_v48, 5  ;;  %v1381_v61 = vshll.u32 %v4850_v38, 16  ;;  %v612_v1 = vshrl.u32 %v380_v57, 16  ;;  %3728 = vmatpush1.bf16.msra.mxu1 %v5851_v9  ;;  %v4851_v31 = vld [vmem:[%s6362_s4 + $0x78] sm:$0xf]  ;;  %v5854_v39 = vld [vmem:[%s6362_s4 + $0x6c] sm:$0xff]  }
  0xf0   : > { %v4754_v58 = vcombine.low %v600_v51, %v610_v52  ;;  %v1377_v60 = vrot.slane %v1375_v49, 4  ;;  %3982 = vmatprep.mubr.bf16.mxu0 %v4936_v53  ;;  %v1368_v63 = vor.u32 %v1367_v55, %v1364_v47  ;;  %v615_v2 = vshll.u32 %v380_v57, 16  ;;  %v4852_v32 = vld [vmem:[%s6362_s4 + $0x7c] sm:$0xf]  ;;  %v4853_v36 = vld [vmem:[%s6362_s4 + $0x80] sm:$0x1] }
  0xf1   : > { %v621_v3 = vshll.u32 %v381_v62, 16  ;;  %v1383_v6 = vrot.slane %v1381_v61, 5  ;;  %v625_v7 = vshrl.u32 %v381_v62, 16  ;;  %v631_v8 = vshll.u32 %v382_v0, 16  ;;  %v5855_v47 = vld [vmem:[#allocation6 + $0x3b0] ss:$8 sps:$4 sm:$0xff]  }
  0xf2   : > { %3656 = vmatprep.mubr.bf16.mxu1 %v4754_v58  ;;  %v1378_v5 = vor.u32 %v1377_v60, %v1373_v59  ;;  %v1369_v10 = vrot.slane %v1368_v63, 4  ;;  %v614_v11 = vrot.slane %v612_v1, 4  ;;  %v617_v13 = vrot.slane %v615_v2, 5  ;;  %v5857_v48 = vld [vmem:[#allocation6 + $0x3b4] ss:$8 sps:$4 sm:$0xff]  }
  0xf3   : > { %3657 = vmatmul.mubr.bf16.gmra.mrb[32].mxu1 %v5844_v54  ;;  %v623_v14 = vrot.slane %v621_v3, 5  ;;  %v627_v17 = vrot.slane %v625_v7, 4  ;;  %v633_v18 = vrot.slane %v631_v8, 5  ;;  %v4924_v24 = vrot.slane %v4903_v19, 9  ;;  %v5858_v53 = vld [vmem:[#allocation6 + $0x1b0] ss:$8 sps:$4 sm:$0xff]   ;;  %4055 = vmatprep.subr.bf16.mxu0 %v5857_v48 }
  0xf4   : > { %v1379_v16 = vrot.slane %v1378_v5, 4  ;;  %v1374_v20 = vsel %vm6387_vm5, %v1369_v10, %v1373_v59  ;;  %v618_v21 = vor.u32 %v617_v13, %v614_v11  ;;  %v1689_v27 = vrot.slane %v4904_v22, 5  ;;  %v5860_v54 = vld [vmem:[#allocation6 + $0x1b4] ss:$8 sps:$4 sm:$0xff]   ;;  %v5861_v57 = vld [vmem:[#allocation6 + $0x3c0] ss:$8 sps:$4 sm:$0xff]   ;;  %4056 = vmatpush1.bf16.msra.mxu0 %v5855_v47 }
  0xf5   : > { %v628_v26 = vor.u32 %v627_v17, %v623_v14  ;;  %v1692_v28 = vrot.slane %v4905_v23, 5  ;;  %v1386_v37 = vshrl.u32 %v4851_v31, 16  ;;  %v1389_v40 = vshll.u32 %v4851_v31, 16  ;;  %v5863_v58 = vld [vmem:[#allocation6 + $0x3c4] ss:$8 sps:$4 sm:$0xff]   ;;  %3729 = vmatprep.subr.bf16.mxu1 %v5860_v54 }
  0xf6   : > { %v1384_v25 = vsel %vm6387_vm5, %v1379_v16, %v1383_v6  ;;  %v619_v30 = vrot.slane %v618_v21, 4  ;;  %v1690_v34 = vsel %vm6380_vm4, %v4924_v24, %v1689_v27  ;;  %v1691_v35 = vrot.slane %v1689_v27, 4  ;;  %v383_v59 = vld [vmem:[%s6362_s4 + $0x78] sm:$0xf]  ;;  %v384_v61 = vld [vmem:[%s6362_s4 + $0x7c] sm:$0xf]  ;;  %4057 = vmatprep.subr.bf16.mxu0 %v5863_v58  ;;  %3730 = vmatpush1.bf16.msra.mxu1 %v5858_v53 }
  0xf7   : > { %v4871_v29 = vcombine.low %v1374_v20, %v1384_v25  ;;  %v629_v33 = vrot.slane %v628_v26, 4  ;;  %v1395_v41 = vshll.u32 %v4852_v32, 16  ;;  %v1399_v42 = vshrl.u32 %v4852_v32, 16  ;;  %v385_v62 = vld [vmem:[%s6362_s4 + $0x80] sm:$0x1] }
  0xf8   : > { %v624_v38 = vsel %vm6387_vm5, %v619_v30, %v623_v14  ;;  %v1693_v44 = vsel %vm6380_vm4, %v1691_v35, %v1692_v28  ;;  %v1388_v45 = vrot.slane %v1386_v37, 4  ;;  %v1405_v46 = vshll.u32 %v4853_v36, 16  ;;  %v4906_v6 = vld [vmem:[%s6362_s4 + $0x84] sm:$0xe]  ;;  %v4907_v10 = vld [vmem:[%s6362_s4 + $0x88] sm:$0xf]  ;;  %4058 = vmatpush1.bf16.msra.mxu0 %v5861_v57 }
  0xf9   : > { %3983 = vmatmul.mubr.bf16.gmra.mrb[32].mxu0 %v4871_v29  ;;  %v634_v43 = vsel %vm6387_vm5, %v629_v33, %v633_v18  ;;  %v4937_v50 = vcombine.low %v1690_v34, %v1693_v44  ;;  %v1391_v51 = vrot.slane %v1389_v40, 5  ;;  %v1397_v52 = vrot.slane %v1395_v41, 5  ;;  %v4908_v17 = vld [vmem:[%s6362_s4 + $0x8c] sm:$0x1]  ;;  %v4854_v24 = vld [vmem:[%s6362_s4 + $0x84] sm:$0xf] }
  0xfa   : > { %v4755_v49 = vcombine.low %v624_v38, %v634_v43  ;;  %v1401_v55 = vrot.slane %v1399_v42, 4  ;;  %v1407_v56 = vrot.slane %v1405_v46, 5  ;;  %v636_v63 = vshrl.u32 %v383_v59, 16  ;;  %v4855_v25 = vld [vmem:[%s6362_s4 + $0x88] sm:$0xf]  ;;  %v5864_v34 = vld [vmem:[%s6362_s4 + $0x78] sm:$0xff]  }
  0xfb   : > { %3992 = vmatprep.mubr.bf16.mxu0 %v4937_v50  ;;  %v1392_v60 = vor.u32 %v1391_v51, %v1388_v45  ;;  %v639_v0 = vshll.u32 %v383_v59, 16  ;;  %v645_v2 = vshll.u32 %v384_v61, 16  ;;  %v649_v3 = vshrl.u32 %v384_v61, 16  ;;  %v4856_v26 = vld [vmem:[%s6362_s4 + $0x8c] sm:$0x1] }
  0xfc   : > { %3666 = vmatprep.mubr.bf16.mxu1 %v4755_v49  ;;  %v1402_v1 = vor.u32 %v1401_v55, %v1397_v52  ;;  %v655_v5 = vshll.u32 %v385_v62, 16  ;;  %v638_v8 = vrot.slane %v636_v63, 4  ;;  %v4925_v11 = vrot.slane %v4906_v6, 9  ;;  %v5865_v31 = vld [vmem:[#allocation6 + $0x1c0] ss:$8 sps:$4 sm:$0xff]  }
  0xfd   : > { %3667 = vmatmul.mubr.bf16.gmra.mrb[36].mxu1 %v5854_v39  ;;  %v1393_v7 = vrot.slane %v1392_v60, 4  ;;  %v641_v9 = vrot.slane %v639_v0, 5  ;;  %v647_v14 = vrot.slane %v645_v2, 5  ;;  %v651_v15 = vrot.slane %v649_v3, 4  ;;  %v5867_v32 = vld [vmem:[#allocation6 + $0x1c4] ss:$8 sps:$4 sm:$0xff]  }
  0xfe   : > { %v1403_v13 = vrot.slane %v1402_v1, 4  ;;  %v657_v16 = vrot.slane %v655_v5, 5  ;;  %v1696_v20 = vrot.slane %v4907_v10, 5  ;;  %v1699_v21 = vrot.slane %v4908_v17, 5  ;;  %3731 = vmatprep.subr.bf16.mxu1 %v5867_v32  ;;  %v5868_v42 = vld [vmem:[#allocation6 + $0x3d0] ss:$8 sps:$4 sm:$0xff]  }
  0xff   : > { %v1398_v18 = vsel %vm6387_vm5, %v1393_v7, %v1397_v52  ;;  %v642_v19 = vor.u32 %v641_v9, %v638_v8  ;;  %v652_v23 = vor.u32 %v651_v15, %v647_v14  ;;  %v1410_v35 = vshrl.u32 %v4854_v24, 16  ;;  %v5870_v43 = vld [vmem:[#allocation6 + $0x3d4] ss:$8 sps:$4 sm:$0xff]   ;;  %3732 = vmatpush1.bf16.msra.mxu1 %v5865_v31  ;;  %v388_v54 = vld [vmem:[%s6362_s4 + $0x8c] sm:$0x1] }
 0x100   : > { %v1408_v22 = vsel %vm6387_vm5, %v1403_v13, %v1407_v56  ;;  %v1697_v29 = vsel %vm6380_vm4, %v4925_v11, %v1696_v20  ;;  %v1698_v30 = vrot.slane %v1696_v20, 4  ;;  %v1413_v36 = vshll.u32 %v4854_v24, 16  ;;  %v386_v48 = vld [vmem:[%s6362_s4 + $0x84] sm:$0xf]  ;;  %v387_v49 = vld [vmem:[%s6362_s4 + $0x88] sm:$0xf]  ;;  %4059 = vmatprep.subr.bf16.mxu0 %v5870_v43 }
 0x101   : > { %v4872_v27 = vcombine.low %v1398_v18, %v1408_v22  ;;  %v643_v28 = vrot.slane %v642_v19, 4  ;;  %v653_v33 = vrot.slane %v652_v23, 4  ;;  %v1419_v37 = vshll.u32 %v4855_v25, 16  ;;  %4060 = vmatpush1.bf16.msra.mxu0 %v5868_v42  ;;  %v4909_v59 = vld [vmem:[%s6362_s4 + $0x90] sm:$0xe] }
 0x102   : > { %v1700_v39 = vsel %vm6380_vm4, %v1698_v30, %v1699_v21  ;;  %v1423_v40 = vshrl.u32 %v4855_v25, 16  ;;  %v1429_v41 = vshll.u32 %v4856_v26, 16  ;;  %v1412_v46 = vrot.slane %v1410_v35, 4  ;;  %v4910_v63 = vld [vmem:[%s6362_s4 + $0x94] sm:$0xf] }
 0x103   : > { %3993 = vmatmul.mubr.bf16.gmra.mrb[36].mxu0 %v4872_v27  ;;  %v648_v38 = vsel %vm6387_vm5, %v643_v28, %v647_v14  ;;  %v658_v44 = vsel %vm6387_vm5, %v653_v33, %v657_v16  ;;  %v4938_v45 = vcombine.low %v1697_v29, %v1700_v39  ;;  %v1415_v47 = vrot.slane %v1413_v36, 5  ;;  %v4911_v0 = vld [vmem:[%s6362_s4 + $0x98] sm:$0x1]  ;;  %v4857_v15 = vld [vmem:[%s6362_s4 + $0x90] sm:$0xf]  ;;  %v5871_v29 = vld [vmem:[%s6362_s4 + $0x84] sm:$0xff]  }
 0x104   : > { %v4756_v50 = vcombine.low %v648_v38, %v658_v44  ;;  %v1421_v51 = vrot.slane %v1419_v37, 5  ;;  %v1425_v52 = vrot.slane %v1423_v40, 4  ;;  %v1431_v53 = vrot.slane %v1429_v41, 5  ;;  %v4858_v16 = vld [vmem:[%s6362_s4 + $0x94] sm:$0xf] }
 0x105   : > { %4002 = vmatprep.mubr.bf16.mxu0 %v4938_v45  ;;  %v1416_v55 = vor.u32 %v1415_v47, %v1412_v46  ;;  %v660_v56 = vshrl.u32 %v386_v48, 16  ;;  %v663_v57 = vshll.u32 %v386_v48, 16  ;;  %v669_v58 = vshll.u32 %v387_v49, 16  ;;  %v4859_v19 = vld [vmem:[%s6362_s4 + $0x98] sm:$0x1] }
 0x106   : > { %3676 = vmatprep.mubr.bf16.mxu1 %v4756_v50  ;;  %v1426_v60 = vor.u32 %v1425_v52, %v1421_v51  ;;  %v673_v61 = vshrl.u32 %v387_v49, 16  ;;  %v679_v62 = vshll.u32 %v388_v54, 16  ;;  %v4926_v9 = vrot.slane %v4909_v59, 9  ;;  %v5872_v26 = vld [vmem:[#allocation6 + $0x1d0] ss:$8 sps:$4 sm:$0xff]  }
 0x107   : > { %3677 = vmatmul.mubr.bf16.gmra.mrb[40].mxu1 %v5864_v34  ;;  %v1417_v1 = vrot.slane %v1416_v55, 4  ;;  %v662_v2 = vrot.slane %v660_v56, 4  ;;  %v665_v3 = vrot.slane %v663_v57, 5  ;;  %v671_v5 = vrot.slane %v669_v58, 5  ;;  %v5874_v27 = vld [vmem:[#allocation6 + $0x1d4] ss:$8 sps:$4 sm:$0xff]  }
 0x108   : > { %v1427_v6 = vrot.slane %v1426_v60, 4  ;;  %v675_v7 = vrot.slane %v673_v61, 4  ;;  %v681_v8 = vrot.slane %v679_v62, 5  ;;  %v1703_v13 = vrot.slane %v4910_v63, 5  ;;  %3733 = vmatprep.subr.bf16.mxu1 %v5874_v27  ;;  %v5875_v37 = vld [vmem:[#allocation6 + $0x3e0] ss:$8 sps:$4 sm:$0xff]  }
 0x109   : > { %v1422_v10 = vsel %vm6387_vm5, %v1417_v1, %v1421_v51  ;;  %v666_v11 = vor.u32 %v665_v3, %v662_v2  ;;  %v1706_v14 = vrot.slane %v4911_v0, 5  ;;  %v1434_v20 = vshrl.u32 %v4857_v15, 16  ;;  %v6646_v38 = vld [vmem:[#allocation6 + $0x3e4] ss:$8 sps:$4 sm:$0xff]   ;;  %3734 = vmatpush1.bf16.msra.mxu1 %v5872_v26  ;;  %v389_v43 = vld [vmem:[%s6362_s4 + $0x90] sm:$0xf] }
 0x10a   : > { %v1432_v17 = vsel %vm6387_vm5, %v1427_v6, %v1431_v53  ;;  %v676_v18 = vor.u32 %v675_v7, %v671_v5  ;;  %v1437_v21 = vshll.u32 %v4857_v15, 16  ;;  %v1704_v24 = vsel %vm6380_vm4, %v4926_v9, %v1703_v13  ;;  %v390_v44 = vld [vmem:[%s6362_s4 + $0x94] sm:$0xf]  ;;  %4061 = vmatprep.subr.bf16.mxu0 %v6646_v38  ;;  %v391_v48 = vld [vmem:[%s6362_s4 + $0x98] sm:$0x1] }
 0x10b   : > { %v4873_v22 = vcombine.low %v1422_v10, %v1432_v17  ;;  %v667_v23 = vrot.slane %v666_v11, 4  ;;  %v1705_v25 = vrot.slane %v1703_v13, 4  ;;  %v1436_v30 = vrot.slane %v1434_v20, 4  ;;  %4062 = vmatpush1.bf16.msra.mxu0 %v5875_v37  ;;  %v4912_v54 = vld [vmem:[%s6362_s4 + $0x9c] sm:$0xe] }
 0x10c   : > { %v677_v28 = vrot.slane %v676_v18, 4  ;;  %v1439_v31 = vrot.slane %v1437_v21, 5  ;;  %v1443_v32 = vshll.u32 %v4858_v16, 16  ;;  %v1447_v35 = vshrl.u32 %v4858_v16, 16  ;;  %v4913_v58 = vld [vmem:[%s6362_s4 + $0xa0] sm:$0xf] }
 0x10d   : > { %4003 = vmatmul.mubr.bf16.gmra.mrb[40].mxu0 %v4873_v22  ;;  %v672_v33 = vsel %vm6387_vm5, %v667_v23, %v671_v5  ;;  %v1707_v34 = vsel %vm6380_vm4, %v1705_v25, %v1706_v14  ;;  %v1453_v36 = vshll.u32 %v4859_v19, 16  ;;  %v684_v49 = vshrl.u32 %v389_v43, 16  ;;  %v4914_v59 = vld [vmem:[%s6362_s4 + $0xa4] sm:$0x1]  ;;  %v5881_v9 = vld [vmem:[#allocation6 + $0x1e4] ss:$8 sps:$4 sm:$0xff]  }
 0x10e   : > { %v682_v39 = vsel %vm6387_vm5, %v677_v28, %v681_v8  ;;  %v4939_v40 = vcombine.low %v1704_v24, %v1707_v34  ;;  %v1440_v41 = vor.u32 %v1439_v31, %v1436_v30  ;;  %v1445_v42 = vrot.slane %v1443_v32, 5  ;;  %v5879_v8 = vld [vmem:[#allocation6 + $0x1e0] ss:$8 sps:$4 sm:$0xff]   ;;  %v4861_v15 = vld [vmem:[%s6362_s4 + $0xa0] sm:$0xf]  ;;  %3735 = vmatprep.subr.bf16.mxu1 %v5881_v9 }
 0x10f   : > { %v4757_v45 = vcombine.low %v672_v33, %v682_v39  ;;  %v1449_v46 = vrot.slane %v1447_v35, 4  ;;  %v1455_v47 = vrot.slane %v1453_v36, 5  ;;  %v687_v51 = vshll.u32 %v389_v43, 16  ;;  %v4860_v14 = vld [vmem:[%s6362_s4 + $0x9c] sm:$0xf]  ;;  %v5878_v22 = vld [vmem:[%s6362_s4 + $0x90] sm:$0xff]   ;;  %3736 = vmatpush1.bf16.msra.mxu1 %v5879_v8 }
 0x110   : > { %4012 = vmatprep.mubr.bf16.mxu0 %v4939_v40  ;;  %v1441_v50 = vrot.slane %v1440_v41, 4  ;;  %v693_v52 = vshll.u32 %v390_v44, 16  ;;  %v697_v53 = vshrl.u32 %v390_v44, 16  ;;  %v686_v56 = vrot.slane %v684_v49, 4  ;;  %v4862_v19 = vld [vmem:[%s6362_s4 + $0xa4] sm:$0x1] }
 0x111   : > { %3686 = vmatprep.mubr.bf16.mxu1 %v4757_v45  ;;  %v1450_v55 = vor.u32 %v1449_v46, %v1445_v42  ;;  %v703_v57 = vshll.u32 %v391_v48, 16  ;;  %v689_v61 = vrot.slane %v687_v51, 5  ;;  %v4927_v2 = vrot.slane %v4912_v54, 9  ;;  %v6669_v26 = vld [vmem:[#allocation6 + $0x3f0] ss:$8 sps:$4 sm:$0xff]  }
 0x112   : > { %3687 = vmatmul.mubr.bf16.gmra.mrb[44].mxu1 %v5871_v29  ;;  %v1446_v60 = vsel %vm6387_vm5, %v1441_v50, %v1445_v42  ;;  %v695_v62 = vrot.slane %v693_v52, 5  ;;  %v699_v63 = vrot.slane %v697_v53, 4  ;;  %v1710_v3 = vrot.slane %v4913_v58, 5  ;;  %v6675_v31 = vld [vmem:[#allocation6 + $0x3f4] ss:$8 sps:$4 sm:$0xff]  }
 0x113   : > { %v1451_v0 = vrot.slane %v1450_v55, 4  ;;  %v705_v1 = vrot.slane %v703_v57, 5  ;;  %v690_v5 = vor.u32 %v689_v61, %v686_v56  ;;  %v1713_v7 = vrot.slane %v4914_v59, 5  ;;  %v5885_v32 = vld [vmem:[#allocation6 + $0x1f0] ss:$8 sps:$4 sm:$0xff]   ;;  %4063 = vmatprep.subr.bf16.mxu0 %v6675_v31 }
 0x114   : > { %v700_v6 = vor.u32 %v699_v63, %v695_v62  ;;  %v1711_v11 = vsel %vm6380_vm4, %v4927_v2, %v1710_v3  ;;  %v1712_v13 = vrot.slane %v1710_v3, 4  ;;  %v1458_v20 = vshrl.u32 %v4860_v14, 16  ;;  %v5888_v33 = vld [vmem:[%s6362_s4 + $0xc] sm:$0xff]   ;;  %4064 = vmatpush1.bf16.msra.mxu0 %v6669_v26  ;;  %v4980_v43 = vld [vmem:[%s6362_s4 + $0x18] sm:$0xf] }
 0x115   : > { %v1456_v10 = vsel %vm6387_vm5, %v1451_v0, %v1455_v47  ;;  %v691_v17 = vrot.slane %v690_v5, 4  ;;  %v1461_v23 = vshll.u32 %v4860_v14, 16  ;;  %v1467_v24 = vshll.u32 %v4861_v15, 16  ;;  %v5887_v39 = vld [vmem:[#allocation6 + $0x1f4] ss:$8 sps:$4 sm:$0xff]  }
 0x116   : > { %v4874_v16 = vcombine.low %v1446_v60, %v1456_v10  ;;  %v701_v18 = vrot.slane %v700_v6, 4  ;;  %v1714_v21 = vsel %vm6380_vm4, %v1712_v13, %v1713_v7  ;;  %v1471_v25 = vshrl.u32 %v4861_v15, 16  ;;  %v4981_v44 = vld [vmem:[%s6362_s4 + $0x1c] sm:$0xf]  ;;  %v4982_v45 = vld [vmem:[%s6362_s4 + $0x20] sm:$0x1]  ;;  %3737 = vmatprep.subr.bf16.mxu1 %v5887_v39 }
 0x117   : > { %v696_v27 = vsel %vm6387_vm5, %v691_v17, %v695_v62  ;;  %v4940_v29 = vcombine.low %v1711_v11, %v1714_v21  ;;  %v1460_v30 = vrot.slane %v1458_v20, 4  ;;  %v1463_v35 = vrot.slane %v1461_v23, 5  ;;  %v772_v50 = vld [vmem:[%s6362_s4] sm:$0xe]  ;;  %3738 = vmatpush1.bf16.msra.mxu1 %v5885_v32  ;;  %v773_v55 = vld [vmem:[%s6362_s4 + $0x4] sm:$0xf] }
 0x118   : > { %4013 = vmatmul.mubr.bf16.gmra.mrb[44].mxu0 %v4874_v16  ;;  %v706_v28 = vsel %vm6387_vm5, %v701_v18, %v705_v1  ;;  %v1469_v36 = vrot.slane %v1467_v24, 5  ;;  %v1473_v37 = vrot.slane %v1471_v25, 4  ;;  %v1477_v40 = vshll.u32 %v4862_v19, 16  ;;  %v774_v59 = vld [vmem:[%s6362_s4 + $0x8] sm:$0x1]  ;;  %v5893_v23 = vld [vmem:[%s6362_s4 + $0x18] sm:$0xff]  }
 0x119   : > { %v4758_v34 = vcombine.low %v696_v27, %v706_v28  ;;  %4022 = vmatprep.mubr.bf16.mxu0 %v4940_v29  ;;  %v1464_v41 = vor.u32 %v1463_v35, %v1460_v30  ;;  %v1941_v47 = vshrl.u32 %v4980_v43, 16  ;;  %v1944_v48 = vshll.u32 %v4980_v43, 16  ;;  %v5938_v61 = vld [vmem:[#allocation6 + $0x304] ss:$8 sps:$4 sm:$0xff]   ;;  %v4983_v13 = vld [vmem:[%s6362_s4 + $0x24] sm:$0xf] }
 0x11a   : > { %v1474_v42 = vor.u32 %v1473_v37, %v1469_v36  ;;  %v1479_v46 = vrot.slane %v1477_v40, 5  ;;  %v1950_v49 = vshll.u32 %v4981_v44, 16  ;;  %v1954_v53 = vshrl.u32 %v4981_v44, 16  ;;  %5296 = vmatprep.subr.bf16.mxu1 %v5938_v61  ;;  %v5892_v6 = vld [vmem:[#allocation6 + $0x404] ss:$8 sps:$4 sm:$0xff]  }
 0x11b   : > { %3696 = vmatprep.mubr.bf16.mxu1 %v4758_v34  ;;  %v1465_v51 = vrot.slane %v1464_v41, 4  ;;  %v1960_v54 = vshll.u32 %v4982_v45, 16  ;;  %v1943_v56 = vrot.slane %v1941_v47, 4  ;;  %v1946_v57 = vrot.slane %v1944_v48, 5  ;;  %4196 = vmatprep.subr.bf16.mxu0 %v5892_v6  ;;  %v4984_v14 = vld [vmem:[%s6362_s4 + $0x28] sm:$0xf] }
 0x11c   : > { %3697 = vmatmul.mubr.bf16.gmra.mrb[48].mxu1 %v5878_v22  ;;  %v1475_v52 = vrot.slane %v1474_v42, 4  ;;  %v1952_v58 = vrot.slane %v1950_v49, 5  ;;  %v4759_v60 = vrot.slane %v772_v50, 9  ;;  %v1956_v0 = vrot.slane %v1954_v53, 4  ;;  %v4985_v16 = vld [vmem:[%s6362_s4 + $0x2c] sm:$0x1] }
 0x11d   : > { %3739 = vmatprep.mubr.bf16.mxu1 %v5888_v33  ;;  %v1470_v62 = vsel %vm6387_vm5, %v1465_v51, %v1469_v36  ;;  %v1947_v2 = vor.u32 %v1946_v57, %v1943_v56  ;;  %v855_v3 = vrot.slane %v773_v55, 5  ;;  %v858_v5 = vrot.slane %v774_v59, 5  ;;  %v5889_v22 = vld [vmem:[%s6362_s4 + $0x18] sm:$0xff]   ;;  %v775_v33 = vld [vmem:[%s6362_s4 + $0xc] sm:$0xe] }
 0x11e   : > { %v1480_v63 = vsel %vm6387_vm5, %v1475_v52, %v1479_v46  ;;  %v1957_v7 = vor.u32 %v1956_v0, %v1952_v58  ;;  %v1962_v8 = vrot.slane %v1960_v54, 5  ;;  %v1965_v17 = vshrl.u32 %v4983_v13, 16  ;;  %v5890_v29 = vld [vmem:[#allocation6 + $0x400] ss:$8 sps:$4 sm:$0xff]   ;;  %v5896_v37 = vld [vmem:[#allocation6 + $0x414] ss:$8 sps:$4 sm:$0xff]  }
 0x11f   : > { %v4875_v1 = vcombine.low %v1470_v62, %v1480_v63  ;;  %v1948_v9 = vrot.slane %v1947_v2, 4  ;;  %v856_v10 = vsel %vm6380_vm4, %v4759_v60, %v855_v3  ;;  %v857_v11 = vrot.slane %v855_v3, 4  ;;  %v776_v39 = vld [vmem:[%s6362_s4 + $0x10] sm:$0xf]  ;;  %v777_v41 = vld [vmem:[%s6362_s4 + $0x14] sm:$0x1] }
 0x120   : > { %v1958_v15 = vrot.slane %v1957_v7, 4  ;;  %v1968_v18 = vshll.u32 %v4983_v13, 16  ;;  %v1974_v19 = vshll.u32 %v4984_v14, 16  ;;  %v1978_v24 = vshrl.u32 %v4984_v14, 16  ;;  %v5939_v47 = vld [vmem:[#allocation6 + $0x300] ss:$8 sps:$4 sm:$0xff]  }
 0x121   : > { %4023 = vmatmul.mubr.bf16.gmra.mrb[48].mxu0 %v4875_v1  ;;  %v1953_v20 = vsel %vm6387_vm5, %v1948_v9, %v1952_v58  ;;  %v859_v21 = vsel %vm6380_vm4, %v857_v11, %v858_v5  ;;  %v1984_v25 = vshll.u32 %v4985_v16, 16  ;;  %v1967_v30 = vrot.slane %v1965_v17, 4  ;;  %v5894_v52 = vld [vmem:[#allocation6 + $0x410] ss:$8 sps:$4 sm:$0xff]   ;;  %v5940_v53 = vld [vmem:[#allocation6 + $0x314] ss:$8 sps:$4 sm:$0xff]  }
 0x122   : > { %v1963_v27 = vsel %vm6387_vm5, %v1958_v15, %v1962_v8  ;;  %v4772_v28 = vcombine.low %v856_v10, %v859_v21  ;;  %v1970_v32 = vrot.slane %v1968_v18, 5  ;;  %v1976_v35 = vrot.slane %v1974_v19, 5  ;;  %v5901_v54 = vld [vmem:[%s6362_s4 + $0x24] sm:$0xff]   ;;  %v5900_v57 = vld [vmem:[#allocation6 + $0x424] ss:$8 sps:$4 sm:$0xff]  }
 0x123   : > { %v5019_v34 = vcombine.low %v1953_v20, %v1963_v27  ;;  %v1980_v36 = vrot.slane %v1978_v24, 4  ;;  %v4760_v42 = vrot.slane %v775_v33, 9  ;;  %v862_v43 = vrot.slane %v776_v39, 5  ;;  %v4986_v58 = vld [vmem:[%s6362_s4 + $0x30] sm:$0xf]  ;;  %v5897_v5 = vld [vmem:[%s6362_s4 + $0x24] sm:$0xff]  }
 0x124   : > { %3740 = vmatmul.mubr.bf16.vlgmr.msra.gmra.mrb[0].mxu1 %v4772_v28  ;;  %v1971_v40 = vor.u32 %v1970_v32, %v1967_v30  ;;  %v1986_v45 = vrot.slane %v1984_v25, 5  ;;  %v865_v46 = vrot.slane %v777_v41, 5  ;;  %v4987_v59 = vld [vmem:[%s6362_s4 + $0x34] sm:$0xf]  ;;  %v4988_v60 = vld [vmem:[%s6362_s4 + $0x38] sm:$0x1] }
 0x125   : > { %4065 = vmatprep.mubr.bf16.mxu0 %v5019_v34  ;;  %3749 = vmatprep.mubr.bf16.mxu1 %v5893_v23  ;;  %v1981_v44 = vor.u32 %v1980_v36, %v1976_v35  ;;  %v863_v49 = vsel %vm6380_vm4, %v4760_v42, %v862_v43  ;;  %v864_v50 = vrot.slane %v862_v43, 4  ;;  %v1989_v63 = vshrl.u32 %v4986_v58, 16  ;;  %v778_v1 = vld [vmem:[%s6362_s4 + $0x18] sm:$0xe]  ;;  %v779_v2 = vld [vmem:[%s6362_s4 + $0x1c] sm:$0xf] }
 0x126   : > { %5312 = vmatpush1.bf16.msra.mxu1 %v5939_v47  ;;  %v1972_v48 = vrot.slane %v1971_v40, 4  ;;  %v1992_v0 = vshll.u32 %v4986_v58, 16  ;;  %v5941_v6 = vld [vmem:[#allocation6 + $0x310] ss:$8 sps:$4 sm:$0xff]   ;;  %v1998_v7 = vshll.u32 %v4987_v59, 16  ;;  %v2002_v8 = vshrl.u32 %v4987_v59, 16 }
 0x127   : > { %v1982_v51 = vrot.slane %v1981_v44, 4  ;;  %5297 = vmatprep.subr.bf16.mxu1 %v5940_v53  ;;  %v866_v56 = vsel %vm6380_vm4, %v864_v50, %v865_v46  ;;  %v2008_v9 = vshll.u32 %v4988_v60, 16  ;;  %v780_v10 = vld [vmem:[%s6362_s4 + $0x20] sm:$0x1]  ;;  %v1991_v11 = vrot.slane %v1989_v63, 4  ;;  %v5906_v39 = vld [vmem:[%s6362_s4 + $0x30] sm:$0xff]  }
 0x128   : > { %v1977_v55 = vsel %vm6387_vm5, %v1972_v48, %v1976_v35  ;;  %v4773_v62 = vcombine.low %v863_v49, %v866_v56  ;;  %v1994_v13 = vrot.slane %v1992_v0, 5  ;;  %v4761_v14 = vrot.slane %v778_v1, 9  ;;  %v5942_v16 = vld [vmem:[#allocation6 + $0x324] ss:$8 sps:$4 sm:$0xff]   ;;  %v5898_v20 = vld [vmem:[#allocation6 + $0x420] ss:$8 sps:$4 sm:$0xff]  }
 0x129   : > { %4066 = vmatmul.mubr.bf16.vlgmr.msra.gmra.mrb[0].mxu0 %v5889_v22  ;;  %v1987_v61 = vsel %vm6387_vm5, %v1982_v51, %v1986_v45  ;;  %v869_v15 = vrot.slane %v779_v2, 5  ;;  %v2000_v17 = vrot.slane %v1998_v7, 5  ;;  %v2004_v18 = vrot.slane %v2002_v8, 4  ;;  %v5943_v27 = vld [vmem:[#allocation6 + $0x320] ss:$8 sps:$4 sm:$0xff]  }
 0x12a   : > { %4197 = vmatpush1.bf16.msra.mxu0 %v5890_v29  ;;  %v5020_v3 = vcombine.low %v1977_v55, %v1987_v61  ;;  %5313 = vmatpush1.bf16.msra.mxu1 %v5941_v6  ;;  %v872_v19 = vrot.slane %v780_v10, 5  ;;  %v1995_v21 = vor.u32 %v1994_v13, %v1991_v11  ;;  %v2010_v22 = vrot.slane %v2008_v9, 5  ;;  %v5905_v28 = vld [vmem:[#allocation6 + $0x434] ss:$8 sps:$4 sm:$0xff]   ;;  %v5903_v32 = vld [vmem:[#allocation6 + $0x430] ss:$8 sps:$4 sm:$0xff]  }
 0x12b   : > { %4198 = vmatprep.subr.bf16.mxu0 %v5896_v37  ;;  %5298 = vmatprep.subr.bf16.mxu1 %v5942_v16  ;;  %v870_v23 = vsel %vm6380_vm4, %v4761_v14, %v869_v15  ;;  %v871_v24 = vrot.slane %v869_v15, 4  ;;  %v2005_v25 = vor.u32 %v2004_v18, %v2000_v17  ;;  %v4989_v33 = vld [vmem:[%s6362_s4 + $0x3c] sm:$0xf]  ;;  %v4990_v34 = vld [vmem:[%s6362_s4 + $0x40] sm:$0xf]  ;;  %v5902_v44 = vld [vmem:[%s6362_s4 + $0x30] sm:$0xff]  }
 0x12c   : > { %4075 = vmatprep.mubr.bf16.mxu0 %v5020_v3  ;;  %3750 = vmatmul.mubr.bf16.gmra.mrb[4].mxu1 %v4773_v62  ;;  %v1996_v29 = vrot.slane %v1995_v21, 4  ;;  %v5944_v35 = vld [vmem:[#allocation6 + $0x334] ss:$8 sps:$4 sm:$0xff]   ;;  %v2013_v41 = vshrl.u32 %v4989_v33, 16  ;;  %v2016_v42 = vshll.u32 %v4989_v33, 16  ;;  %v2022_v45 = vshll.u32 %v4990_v34, 16 }
 0x12d   : > { %3759 = vmatprep.mubr.bf16.mxu1 %v5901_v54  ;;  %v873_v30 = vsel %vm6380_vm4, %v871_v24, %v872_v19  ;;  %v2006_v36 = vrot.slane %v2005_v25, 4  ;;  %v4991_v40 = vld [vmem:[%s6362_s4 + $0x44] sm:$0x1]  ;;  %v2026_v46 = vshrl.u32 %v4990_v34, 16  ;;  %v781_v48 = vld [vmem:[%s6362_s4 + $0x24] sm:$0xe] }
 0x12e   : > { %4199 = vmatpush1.bf16.msra.mxu0 %v5894_v52  ;;  %5314 = vmatpush1.bf16.msra.mxu1 %v5943_v27  ;;  %v4774_v37 = vcombine.low %v870_v23, %v873_v30  ;;  %v2001_v43 = vsel %vm6387_vm5, %v1996_v29, %v2000_v17  ;;  %v2032_v47 = vshll.u32 %v4991_v40, 16  ;;  %v2015_v50 = vrot.slane %v2013_v41, 4  ;;  %v782_v52 = vld [vmem:[%s6362_s4 + $0x28] sm:$0xf]  ;;  %v783_v53 = vld [vmem:[%s6362_s4 + $0x2c] sm:$0x1] }
 0x12f   : > { %4200 = vmatprep.subr.bf16.mxu0 %v5900_v57  ;;  %5299 = vmatprep.subr.bf16.mxu1 %v5944_v35  ;;  %v2011_v49 = vsel %vm6387_vm5, %v2006_v36, %v2010_v22  ;;  %v2018_v51 = vrot.slane %v2016_v42, 5  ;;  %v5945_v54 = vld [vmem:[#allocation6 + $0x330] ss:$8 sps:$4 sm:$0xff]   ;;  %v2024_v56 = vrot.slane %v2022_v45, 5  ;;  %v2028_v57 = vrot.slane %v2026_v46, 4 }
 0x130   : > { %v5021_v55 = vcombine.low %v2001_v43, %v2011_v49  ;;  %v2034_v58 = vrot.slane %v2032_v47, 5  ;;  %v5946_v59 = vld [vmem:[#allocation6 + $0x344] ss:$8 sps:$4 sm:$0xff]   ;;  %v4762_v61 = vrot.slane %v781_v48, 9  ;;  %v876_v62 = vrot.slane %v782_v52, 5 }
 0x131   : > { %4076 = vmatmul.mubr.bf16.gmra.mrb[4].mxu0 %v5897_v5  ;;  %v2019_v60 = vor.u32 %v2018_v51, %v2015_v50  ;;  %v879_v63 = vrot.slane %v783_v53, 5  ;;  %v2029_v0 = vor.u32 %v2028_v57, %v2024_v56  ;;  %v5908_v1 = vld [vmem:[#allocation6 + $0x440] ss:$8 sps:$4 sm:$0xff]   ;;  %v5910_v2 = vld [vmem:[#allocation6 + $0x444] ss:$8 sps:$4 sm:$0xff]  }
 0x132   : > { %4201 = vmatpush1.bf16.msra.mxu0 %v5898_v20  ;;  %5315 = vmatpush1.bf16.msra.mxu1 %v5945_v54  ;;  %v877_v5 = vsel %vm6380_vm4, %v4762_v61, %v876_v62  ;;  %v878_v6 = vrot.slane %v876_v62, 4  ;;  %v4992_v7 = vld [vmem:[%s6362_s4 + $0x48] sm:$0xf]  ;;  %v5911_v10 = vld [vmem:[%s6362_s4 + $0x3c] sm:$0xff]   ;;  %v4993_v11 = vld [vmem:[%s6362_s4 + $0x4c] sm:$0xf] }
 0x133   : > { %4202 = vmatprep.subr.bf16.mxu0 %v5905_v28  ;;  %5300 = vmatprep.subr.bf16.mxu1 %v5946_v59  ;;  %v2020_v3 = vrot.slane %v2019_v60, 4  ;;  %v5947_v8 = vld [vmem:[#allocation6 + $0x340] ss:$8 sps:$4 sm:$0xff]   ;;  %v2030_v9 = vrot.slane %v2029_v0, 4  ;;  %v2037_v14 = vshrl.u32 %v4992_v7, 16  ;;  %v2040_v17 = vshll.u32 %v4992_v7, 16 }
 0x134   : > { %3760 = vmatmul.mubr.bf16.gmra.mrb[8].mxu1 %v4774_v37  ;;  %4085 = vmatprep.mubr.bf16.mxu0 %v5021_v55  ;;  %v4994_v13 = vld [vmem:[%s6362_s4 + $0x50] sm:$0x1]  ;;  %v880_v16 = vsel %vm6380_vm4, %v878_v6, %v879_v63  ;;  %v2046_v18 = vshll.u32 %v4993_v11, 16  ;;  %v784_v19 = vld [vmem:[%s6362_s4 + $0x30] sm:$0xe]  ;;  %v2050_v25 = vshrl.u32 %v4993_v11, 16 }
 0x135   : > { %3769 = vmatprep.mubr.bf16.mxu1 %v5906_v39  ;;  %v2025_v15 = vsel %vm6387_vm5, %v2020_v3, %v2024_v56  ;;  %v785_v20 = vld [vmem:[%s6362_s4 + $0x34] sm:$0xf]  ;;  %v5948_v21 = vld [vmem:[#allocation6 + $0x354] ss:$8 sps:$4 sm:$0xff]   ;;  %v2035_v22 = vsel %vm6387_vm5, %v2030_v9, %v2034_v58  ;;  %v4775_v23 = vcombine.low %v877_v5, %v880_v16  ;;  %v2039_v24 = vrot.slane %v2037_v14, 4 }
 0x136   : > { %4203 = vmatpush1.bf16.msra.mxu0 %v5903_v32  ;;  %5316 = vmatpush1.bf16.msra.mxu1 %v5947_v8  ;;  %v786_v27 = vld [vmem:[%s6362_s4 + $0x38] sm:$0x1]  ;;  %v5022_v28 = vcombine.low %v2025_v15, %v2035_v22  ;;  %v5907_v29 = vld [vmem:[%s6362_s4 + $0x3c] sm:$0xff]   ;;  %v2042_v30 = vrot.slane %v2040_v17, 5  ;;  %v2048_v32 = vrot.slane %v2046_v18, 5  ;;  %v2056_v33 = vshll.u32 %v4994_v13, 16 }
 0x137   : > { %4204 = vmatprep.subr.bf16.mxu0 %v5910_v2  ;;  %5301 = vmatprep.subr.bf16.mxu1 %v5948_v21  ;;  %v5949_v34 = vld [vmem:[#allocation6 + $0x350] ss:$8 sps:$4 sm:$0xff]   ;;  %v2052_v35 = vrot.slane %v2050_v25, 4  ;;  %v4763_v36 = vrot.slane %v784_v19, 9  ;;  %v883_v37 = vrot.slane %v785_v20, 5  ;;  %v886_v39 = vrot.slane %v786_v27, 5 }
 0x138   : > { %v5950_v40 = vld [vmem:[#allocation6 + $0x364] ss:$8 sps:$4 sm:$0xff]   ;;  %v2043_v41 = vor.u32 %v2042_v30, %v2039_v24  ;;  %v5913_v42 = vld [vmem:[#allocation6 + $0x450] ss:$8 sps:$4 sm:$0xff]   ;;  %v5915_v43 = vld [vmem:[#allocation6 + $0x454] ss:$8 sps:$4 sm:$0xff]  }
 0x139   : > { %4086 = vmatmul.mubr.bf16.gmra.mrb[8].mxu0 %v5902_v44  ;;  %v2053_v44 = vor.u32 %v2052_v35, %v2048_v32  ;;  %v2058_v45 = vrot.slane %v2056_v33, 5  ;;  %v884_v46 = vsel %vm6380_vm4, %v4763_v36, %v883_v37  ;;  %v885_v47 = vrot.slane %v883_v37, 4  ;;  %v4995_v49 = vld [vmem:[%s6362_s4 + $0x54] sm:$0xf]  ;;  %v4996_v50 = vld [vmem:[%s6362_s4 + $0x58] sm:$0xf] }
 0x13a   : > { %4205 = vmatpush1.bf16.msra.mxu0 %v5908_v1  ;;  %5317 = vmatpush1.bf16.msra.mxu1 %v5949_v34  ;;  %v2044_v48 = vrot.slane %v2043_v41, 4  ;;  %v5951_v51 = vld [vmem:[#allocation6 + $0x360] ss:$8 sps:$4 sm:$0xff]   ;;  %v2061_v55 = vshrl.u32 %v4995_v49, 16  ;;  %v2064_v56 = vshll.u32 %v4995_v49, 16  ;;  %v2070_v60 = vshll.u32 %v4996_v50, 16 }
 0x13b   : > { %5302 = vmatprep.subr.bf16.mxu1 %v5950_v40  ;;  %4095 = vmatprep.mubr.bf16.mxu0 %v5022_v28  ;;  %v2054_v52 = vrot.slane %v2053_v44, 4  ;;  %v887_v53 = vsel %vm6380_vm4, %v885_v47, %v886_v39  ;;  %v4997_v54 = vld [vmem:[%s6362_s4 + $0x5c] sm:$0x1]  ;;  %v2074_v61 = vshrl.u32 %v4996_v50, 16  ;;  %v787_v62 = vld [vmem:[%s6362_s4 + $0x3c] sm:$0xe] }
 0x13c   : > { %3770 = vmatmul.mubr.bf16.gmra.mrb[12].mxu1 %v4775_v23  ;;  %4206 = vmatprep.subr.bf16.mxu0 %v5915_v43  ;;  %v5952_v57 = vld [vmem:[#allocation6 + $0x374] ss:$8 sps:$4 sm:$0xff]   ;;  %v2049_v58 = vsel %vm6387_vm5, %v2044_v48, %v2048_v32  ;;  %v4776_v59 = vcombine.low %v884_v46, %v887_v53  ;;  %v788_v63 = vld [vmem:[%s6362_s4 + $0x40] sm:$0xf]  ;;  %v2063_v2 = vrot.slane %v2061_v55, 4  ;;  %v2066_v3 = vrot.slane %v2064_v56, 5 }
 0x13d   : > { %3779 = vmatprep.mubr.bf16.mxu1 %v5911_v10  ;;  %v2059_v0 = vsel %vm6387_vm5, %v2054_v52, %v2058_v45  ;;  %v5916_v1 = vld [vmem:[%s6362_s4 + $0x48] sm:$0xff]   ;;  %v2080_v5 = vshll.u32 %v4997_v54, 16  ;;  %v789_v6 = vld [vmem:[%s6362_s4 + $0x44] sm:$0x1]  ;;  %v2072_v9 = vrot.slane %v2070_v60, 5  ;;  %v2076_v10 = vrot.slane %v2074_v61, 4 }
 0x13e   : > { %5318 = vmatpush1.bf16.msra.mxu1 %v5951_v51  ;;  %4207 = vmatpush1.bf16.msra.mxu0 %v5913_v42  ;;  %v5023_v7 = vcombine.low %v2049_v58, %v2059_v0  ;;  %v5912_v8 = vld [vmem:[%s6362_s4 + $0x48] sm:$0xff]   ;;  %v4764_v11 = vrot.slane %v787_v62, 9  ;;  %v2067_v14 = vor.u32 %v2066_v3, %v2063_v2  ;;  %v890_v16 = vrot.slane %v788_v63, 5  ;;  %v4998_v25 = vld [vmem:[%s6362_s4 + $0x60] sm:$0xf]  ;;  %v5921_v35 = vld [vmem:[%s6362_s4 + $0x54] sm:$0xff]  }
 0x13f   : > { %5303 = vmatprep.subr.bf16.mxu1 %v5952_v57  ;;  %v5953_v13 = vld [vmem:[#allocation6 + $0x370] ss:$8 sps:$4 sm:$0xff]   ;;  %v2082_v15 = vrot.slane %v2080_v5, 5  ;;  %v893_v17 = vrot.slane %v789_v6, 5  ;;  %v5954_v18 = vld [vmem:[#allocation6 + $0x384] ss:$8 sps:$4 sm:$0xff]   ;;  %v2077_v19 = vor.u32 %v2076_v10, %v2072_v9 }
 0x140   : > { %v5918_v20 = vld [vmem:[#allocation6 + $0x460] ss:$8 sps:$4 sm:$0xff]   ;;  %v5920_v21 = vld [vmem:[#allocation6 + $0x464] ss:$8 sps:$4 sm:$0xff]   ;;  %v2068_v22 = vrot.slane %v2067_v14, 4  ;;  %v891_v23 = vsel %vm6380_vm4, %v4764_v11, %v890_v16  ;;  %v892_v24 = vrot.slane %v890_v16, 4 }
 0x141   : > { %4096 = vmatmul.mubr.bf16.gmra.mrb[12].mxu0 %v5907_v29  ;;  %v2078_v27 = vrot.slane %v2077_v19, 4  ;;  %4208 = vmatprep.subr.bf16.mxu0 %v5920_v21  ;;  %v4999_v28 = vld [vmem:[%s6362_s4 + $0x64] sm:$0xf]  ;;  %v5000_v29 = vld [vmem:[%s6362_s4 + $0x68] sm:$0x1]  ;;  %v2085_v30 = vshrl.u32 %v4998_v25, 16 }
 0x142   : > { %5319 = vmatpush1.bf16.msra.mxu1 %v5953_v13  ;;  %4105 = vmatprep.mubr.bf16.mxu0 %v5023_v7  ;;  %v5955_v32 = vld [vmem:[#allocation6 + $0x380] ss:$8 sps:$4 sm:$0xff]   ;;  %v2073_v33 = vsel %vm6387_vm5, %v2068_v22, %v2072_v9  ;;  %v894_v34 = vsel %vm6380_vm4, %v892_v24, %v893_v17  ;;  %v2088_v36 = vshll.u32 %v4998_v25, 16  ;;  %v2094_v37 = vshll.u32 %v4999_v28, 16  ;;  %v791_v40 = vld [vmem:[%s6362_s4 + $0x4c] sm:$0xf] }
 0x143   : > { %5304 = vmatprep.subr.bf16.mxu1 %v5954_v18  ;;  %v790_v39 = vld [vmem:[%s6362_s4 + $0x48] sm:$0xe]  ;;  %v2083_v42 = vsel %vm6387_vm5, %v2078_v27, %v2082_v15  ;;  %v4777_v43 = vcombine.low %v891_v23, %v894_v34  ;;  %4209 = vmatpush1.bf16.msra.mxu0 %v5918_v20  ;;  %v2087_v44 = vrot.slane %v2085_v30, 4  ;;  %v2098_v45 = vshrl.u32 %v4999_v28, 16  ;;  %v792_v46 = vld [vmem:[%s6362_s4 + $0x50] sm:$0x1] }
 0x144   : > { %3780 = vmatmul.mubr.bf16.gmra.mrb[16].mxu1 %v4776_v59  ;;  %v5956_v41 = vld [vmem:[#allocation6 + $0x394] ss:$8 sps:$4 sm:$0xff]   ;;  %v5024_v47 = vcombine.low %v2073_v33, %v2083_v42  ;;  %v2090_v48 = vrot.slane %v2088_v36, 5  ;;  %v2096_v49 = vrot.slane %v2094_v37, 5  ;;  %v2104_v50 = vshll.u32 %v5000_v29, 16  ;;  %v5917_v57 = vld [vmem:[%s6362_s4 + $0x54] sm:$0xff]  }
 0x145   : > { %3789 = vmatprep.mubr.bf16.mxu1 %v5916_v1  ;;  %v2100_v51 = vrot.slane %v2098_v45, 4  ;;  %v4765_v52 = vrot.slane %v790_v39, 9  ;;  %v897_v53 = vrot.slane %v791_v40, 5  ;;  %v900_v54 = vrot.slane %v792_v46, 5  ;;  %v5923_v55 = vld [vmem:[#allocation6 + $0x470] ss:$8 sps:$4 sm:$0xff]  }
 0x146   : > { %5320 = vmatpush1.bf16.msra.mxu1 %v5955_v32  ;;  %v5957_v56 = vld [vmem:[#allocation6 + $0x390] ss:$8 sps:$4 sm:$0xff]   ;;  %v2091_v58 = vor.u32 %v2090_v48, %v2087_v44  ;;  %v5925_v59 = vld [vmem:[#allocation6 + $0x474] ss:$8 sps:$4 sm:$0xff]   ;;  %v5958_v60 = vld [vmem:[#allocation6 + $0x3a4] ss:$8 sps:$4 sm:$0xff]  }
 0x147   : > { %5305 = vmatprep.subr.bf16.mxu1 %v5956_v41  ;;  %v2101_v61 = vor.u32 %v2100_v51, %v2096_v49  ;;  %v2106_v62 = vrot.slane %v2104_v50, 5  ;;  %v899_v63 = vrot.slane %v897_v53, 4  ;;  %v898_v1 = vsel %vm6380_vm4, %v4765_v52, %v897_v53  ;;  %4210 = vmatprep.subr.bf16.mxu0 %v5925_v59  ;;  %v794_v2 = vld [vmem:[%s6362_s4 + $0x58] sm:$0xf]  ;;  %v793_v6 = vld [vmem:[%s6362_s4 + $0x54] sm:$0xe] }
 0x148   : > { %v2092_v0 = vrot.slane %v2091_v58, 4  ;;  %4211 = vmatpush1.bf16.msra.mxu0 %v5923_v55  ;;  %v795_v7 = vld [vmem:[%s6362_s4 + $0x5c] sm:$0x1]  ;;  %v5032_v11 = vld [vmem:[%s6362_s4 + $0x18] sm:$0xe]  ;;  %v5926_v19 = vld [vmem:[%s6362_s4 + $0x60] sm:$0xff]  }
 0x149   : > { %4106 = vmatmul.mubr.bf16.gmra.mrb[16].mxu0 %v5912_v8  ;;  %v2102_v3 = vrot.slane %v2101_v61, 4  ;;  %v901_v5 = vsel %vm6380_vm4, %v899_v63, %v900_v54  ;;  %v904_v8 = vrot.slane %v794_v2, 5  ;;  %v5959_v9 = vld [vmem:[#allocation6 + $0x3a0] ss:$8 sps:$4 sm:$0xff]   ;;  %v5960_v14 = vld [vmem:[#allocation6 + $0x3b4] ss:$8 sps:$4 sm:$0xff]  }
 0x14a   : > { %5321 = vmatpush1.bf16.msra.mxu1 %v5957_v56  ;;  %4115 = vmatprep.mubr.bf16.mxu0 %v5024_v47  ;;  %v2097_v10 = vsel %vm6387_vm5, %v2092_v0, %v2096_v49  ;;  %v5033_v13 = vld [vmem:[%s6362_s4 + $0x1c] sm:$0xf]  ;;  %v4778_v16 = vcombine.low %v898_v1, %v901_v5  ;;  %v4766_v20 = vrot.slane %v793_v6, 9  ;;  %v907_v22 = vrot.slane %v795_v7, 5  ;;  %v5034_v23 = vld [vmem:[%s6362_s4 + $0x20] sm:$0x1] }
 0x14b   : > { %5306 = vmatprep.subr.bf16.mxu1 %v5958_v60  ;;  %v2107_v15 = vsel %vm6387_vm5, %v2102_v3, %v2106_v62  ;;  %v2397_v17 = vrot.slane %v5033_v13, 5  ;;  %v906_v21 = vrot.slane %v904_v8, 4  ;;  %v797_v24 = vld [vmem:[%s6362_s4 + $0x64] sm:$0xf]  ;;  %v5071_v28 = vrot.slane %v5032_v11, 9  ;;  %v5927_v42 = vld [vmem:[%s6362_s4 + $0x6c] sm:$0xff]  }
 0x14c   : > { %3790 = vmatmul.mubr.bf16.gmra.mrb[20].mxu1 %v4777_v43  ;;  %v5025_v18 = vcombine.low %v2097_v10, %v2107_v15  ;;  %v5961_v25 = vld [vmem:[#allocation6 + $0x3b0] ss:$8 sps:$4 sm:$0xff]   ;;  %v5962_v29 = vld [vmem:[#allocation6 + $0x3c4] ss:$8 sps:$4 sm:$0xff]   ;;  %v2400_v32 = vrot.slane %v5034_v23, 5  ;;  %v905_v34 = vsel %vm6380_vm4, %v4766_v20, %v904_v8  ;;  %v911_v36 = vrot.slane %v797_v24, 5 }
 0x14d   : > { %3799 = vmatprep.mubr.bf16.mxu1 %v5921_v35  ;;  %v5922_v27 = vld [vmem:[%s6362_s4 + $0x60] sm:$0xff]   ;;  %v2399_v30 = vrot.slane %v2397_v17, 4  ;;  %v908_v35 = vsel %vm6380_vm4, %v906_v21, %v907_v22  ;;  %v5036_v37 = vld [vmem:[%s6362_s4 + $0x28] sm:$0xf]  ;;  %v2398_v41 = vsel %vm6380_vm4, %v5071_v28, %v2397_v17  ;;  %v6148_v44 = vmov 0   ;;  %v5928_v2 = vld [vmem:[%s6362_s4 + $0x78] sm:$0xff]  }
 0x14e   : > { %5322 = vmatpush1.bf16.msra.mxu1 %v5959_v9  ;;  %v796_v33 = vld [vmem:[%s6362_s4 + $0x60] sm:$0xe]  ;;  %v798_v39 = vld [vmem:[%s6362_s4 + $0x68] sm:$0x1]  ;;  %v4779_v45 = vcombine.low %v905_v34, %v908_v35  ;;  %v5035_v48 = vld [vmem:[%s6362_s4 + $0x24] sm:$0xe] }
 0x14f   : > { %5307 = vmatprep.subr.bf16.mxu1 %v5960_v14  ;;  %v5963_v40 = vld [vmem:[#allocation6 + $0x3c0] ss:$8 sps:$4 sm:$0xff]   ;;  %v5964_v43 = vld [vmem:[#allocation6 + $0x3d4] ss:$8 sps:$4 sm:$0xff]   ;;  %v2401_v46 = vsel %vm6380_vm4, %v2399_v30, %v2400_v32  ;;  %v4767_v47 = vrot.slane %v796_v33, 9  ;;  %v2404_v49 = vrot.slane %v5036_v37, 5 }
 0x150   : > { %v913_v50 = vrot.slane %v911_v36, 4  ;;  %v914_v51 = vrot.slane %v798_v39, 5  ;;  %v5037_v52 = vld [vmem:[%s6362_s4 + $0x2c] sm:$0x1]  ;;  %v800_v53 = vld [vmem:[%s6362_s4 + $0x70] sm:$0xf]  ;;  %v5084_v55 = vcombine.low %v2398_v41, %v2401_v46 }
 0x151   : > { %4116 = vmatmul.mubr.bf16.gmra.mrb[20].mxu0 %v5917_v57  ;;  %v5965_v54 = vld [vmem:[#allocation6 + $0x3d0] ss:$8 sps:$4 sm:$0xff]   ;;  %v5072_v56 = vrot.slane %v5035_v48, 9  ;;  %v2406_v57 = vrot.slane %v2404_v49, 4  ;;  %v2407_v58 = vrot.slane %v5037_v52, 5  ;;  %v912_v60 = vsel %vm6380_vm4, %v4767_v47, %v911_v36 }
 0x152   : > { %5323 = vmatpush1.bf16.msra.mxu1 %v5961_v25  ;;  %4125 = vmatprep.mubr.bf16.mxu0 %v5025_v18  ;;  %v799_v59 = vld [vmem:[%s6362_s4 + $0x6c] sm:$0xe]  ;;  %v915_v61 = vsel %vm6380_vm4, %v913_v50, %v914_v51  ;;  %v918_v62 = vrot.slane %v800_v53, 5  ;;  %v5039_v63 = vld [vmem:[%s6362_s4 + $0x34] sm:$0xf]  ;;  %v5929_v33 = vld [vmem:[%s6362_s4 + $0x84] sm:$0xff]  }
 0x153   : > { %5308 = vmatprep.subr.bf16.mxu1 %v5962_v29  ;;  %v801_v0 = vld [vmem:[%s6362_s4 + $0x74] sm:$0x1]  ;;  %v5038_v3 = vld [vmem:[%s6362_s4 + $0x30] sm:$0xe]  ;;  %v4780_v5 = vcombine.low %v912_v60, %v915_v61  ;;  %v2408_v6 = vsel %vm6380_vm4, %v2406_v57, %v2407_v58  ;;  %v4768_v7 = vrot.slane %v799_v59, 9  ;;  %v2411_v9 = vrot.slane %v5039_v63, 5 }
 0x154   : > { %3800 = vmatmul.mubr.bf16.gmra.mrb[24].mxu1 %v4778_v16  ;;  %v5966_v1 = vld [vmem:[#allocation6 + $0x3e0] ss:$8 sps:$4 sm:$0xff]   ;;  %v5040_v8 = vld [vmem:[%s6362_s4 + $0x38] sm:$0x1]  ;;  %v920_v10 = vrot.slane %v918_v62, 4  ;;  %v921_v11 = vrot.slane %v801_v0, 5 }
 0x155   : > { %3809 = vmatprep.mubr.bf16.mxu1 %v5926_v19  ;;  %v803_v13 = vld [vmem:[%s6362_s4 + $0x7c] sm:$0xf]  ;;  %v2414_v15 = vrot.slane %v5040_v8, 5  ;;  %v2413_v16 = vrot.slane %v2411_v9, 4  ;;  %v802_v17 = vld [vmem:[%s6362_s4 + $0x78] sm:$0xe]  ;;  %v919_v20 = vsel %vm6380_vm4, %v4768_v7, %v918_v62 }
 0x156   : > { %5324 = vmatpush1.bf16.msra.mxu1 %v5963_v40  ;;  %v925_v18 = vrot.slane %v803_v13, 5  ;;  %v5042_v19 = vld [vmem:[%s6362_s4 + $0x40] sm:$0xf]  ;;  %v922_v21 = vsel %vm6380_vm4, %v920_v10, %v921_v11  ;;  %v5041_v22 = vld [vmem:[%s6362_s4 + $0x3c] sm:$0xe]  ;;  %v4769_v24 = vrot.slane %v802_v17, 9 }
 0x157   : > { %5309 = vmatprep.subr.bf16.mxu1 %v5964_v43  ;;  %v2418_v25 = vrot.slane %v5042_v19, 5  ;;  %v2415_v28 = vsel %vm6380_vm4, %v2413_v16, %v2414_v15  ;;  %v5043_v32 = vld [vmem:[%s6362_s4 + $0x44] sm:$0x1]  ;;  %v5074_v34 = vrot.slane %v5041_v22, 9  ;;  %v806_v35 = vld [vmem:[%s6362_s4 + $0x88] sm:$0xf] }
 0x158   : > { %v927_v29 = vrot.slane %v925_v18, 4  ;;  %v5045_v36 = vld [vmem:[%s6362_s4 + $0x4c] sm:$0xf]  ;;  %v805_v37 = vld [vmem:[%s6362_s4 + $0x84] sm:$0xe]  ;;  %v2421_v43 = vrot.slane %v5043_v32, 5  ;;  %v926_v47 = vsel %vm6380_vm4, %v4769_v24, %v925_v18 }
 0x159   : > { %4126 = vmatmul.mubr.bf16.gmra.mrb[24].mxu0 %v5922_v27  ;;  %v4781_v27 = vcombine.low %v919_v20, %v922_v21  ;;  %v5001_v39 = vld [vmem:[%s6362_s4 + $0x6c] sm:$0xf]  ;;  %v5002_v40 = vld [vmem:[%s6362_s4 + $0x70] sm:$0xf]  ;;  %v5044_v46 = vld [vmem:[%s6362_s4 + $0x48] sm:$0xe] }
 0x15a   : > { %4228 = vmatprep.mubr.bf16.mxu0 %v6148_v44  ;;  %5325 = vmatpush1.bf16.msra.mxu1 %v5965_v54  ;;  %v5046_v50 = vld [vmem:[%s6362_s4 + $0x50] sm:$0x1]  ;;  %v2425_v51 = vrot.slane %v5045_v36, 5  ;;  %v2109_v52 = vshrl.u32 %v5001_v39, 16  ;;  %v2112_v53 = vshll.u32 %v5001_v39, 16  ;;  %v2118_v54 = vshll.u32 %v5002_v40, 16 }
 0x15b   : > { %5310 = vmatprep.subr.bf16.mxu1 %v6646_v38  ;;  %v2405_v38 = vsel %vm6380_vm4, %v5072_v56, %v2404_v49  ;;  %v932_v49 = vrot.slane %v806_v35, 5  ;;  %v2419_v56 = vsel %vm6380_vm4, %v5074_v34, %v2418_v25  ;;  %v5930_v59 = vld [vmem:[%s6362_s4 + $0x90] sm:$0xff]   ;;  %v4770_v60 = vrot.slane %v805_v37, 9  ;;  %v5004_v11 = vld [vmem:[%s6362_s4 + $0x78] sm:$0xf] }
 0x15c   : > { %3810 = vmatmul.mubr.bf16.gmra.mrb[28].mxu1 %v4779_v45  ;;  %v5085_v14 = vcombine.low %v2405_v38, %v2408_v6  ;;  %v807_v45 = vld [vmem:[%s6362_s4 + $0x8c] sm:$0x1]  ;;  %v5075_v63 = vrot.slane %v5044_v46, 9  ;;  %v2427_v0 = vrot.slane %v2425_v51, 4  ;;  %v808_v38 = vld [vmem:[%s6362_s4 + $0x90] sm:$0xe] }
 0x15d   : > { %3819 = vmatprep.mubr.bf16.mxu1 %v5927_v42  ;;  %v2420_v42 = vrot.slane %v2418_v25, 4  ;;  %v935_v61 = vrot.slane %v807_v45, 5  ;;  %v934_v62 = vrot.slane %v932_v49, 4  ;;  %v6873_v6 = vrot.slane %v2118_v54, 5  ;;  %v5003_v8 = vld [vmem:[%s6362_s4 + $0x74] sm:$0x1] }
 0x15e   : > { %5326 = vmatpush1.bf16.msra.mxu1 %v5966_v1  ;;  %v2428_v1 = vrot.slane %v5046_v50, 5  ;;  %v933_v10 = vsel %vm6380_vm4, %v4770_v60, %v932_v49  ;;  %v5005_v13 = vld [vmem:[%s6362_s4 + $0x7c] sm:$0xf]  ;;  %v810_v15 = vld [vmem:[%s6362_s4 + $0x98] sm:$0x1]  ;;  %v4771_v16 = vrot.slane %v808_v38, 9 }
 0x15f   : > { %5311 = vmatprep.subr.bf16.mxu1 %v6675_v31  ;;  %v5073_v31 = vrot.slane %v5038_v3, 9  ;;  %v2422_v58 = vsel %vm6380_vm4, %v2420_v42, %v2421_v43  ;;  %v2111_v3 = vrot.slane %v2109_v52, 4  ;;  %v5048_v18 = vld [vmem:[%s6362_s4 + $0x58] sm:$0xf]  ;;  %v2133_v22 = vshrl.u32 %v5004_v11, 16 }
 0x160   : > { %v2429_v19 = vsel %vm6380_vm4, %v2427_v0, %v2428_v1  ;;  %v2142_v24 = vshll.u32 %v5005_v13, 16  ;;  %v2146_v25 = vshrl.u32 %v5005_v13, 16  ;;  %v2432_v32 = vrot.slane %v5048_v18, 5  ;;  %v5007_v35 = vld [vmem:[%s6362_s4 + $0x84] sm:$0xf] }
 0x161   : > { %4229 = vmatmul.mubr.bf16.vlgmr.msra.gmra.mrb[0].mxu0 %v5084_v55  ;;  %v2412_v23 = vsel %vm6380_vm4, %v5073_v31, %v2411_v9  ;;  %v2122_v55 = vshrl.u32 %v5002_v40, 16  ;;  %v5087_v9 = vcombine.low %v2419_v56, %v2422_v58  ;;  %v2426_v31 = vsel %vm6380_vm4, %v5075_v63, %v2425_v51  ;;  %v5008_v36 = vld [vmem:[%s6362_s4 + $0x88] sm:$0xf]  ;;  %v5051_v42 = vld [vmem:[%s6362_s4 + $0x64] sm:$0xf] }
 0x162   : > { %4238 = vmatprep.mubr.bf16.mxu0 %v6148_v44  ;;  %5327 = vmatpush1.bf16.msra.mxu1 %v6669_v26  ;;  %v804_v26 = vld [vmem:[%s6362_s4 + $0x80] sm:$0x1]  ;;  %v5086_v41 = vcombine.low %v2412_v23, %v2415_v28  ;;  %v2136_v23 = vshll.u32 %v5004_v11, 16  ;;  %v942_v28 = vrot.slane %v810_v15, 5  ;;  %v5088_v34 = vcombine.low %v2426_v31, %v2429_v19  ;;  %v5011_v31 = vld [vmem:[%s6362_s4 + $0x94] sm:$0xf] }
 0x163   : > { %v928_v30 = vrot.slane %v804_v26, 5  ;;  %v2124_v7 = vrot.slane %v2122_v55, 4  ;;  %v2128_v26 = vshll.u32 %v5003_v8, 16  ;;  %v2135_v43 = vrot.slane %v2133_v22, 4 }
 0x164   : > { %3820 = vmatmul.mubr.bf16.gmra.mrb[32].mxu1 %v4780_v5  ;;  %v2114_v5 = vrot.slane %v2112_v53, 5  ;;  %v2138_v45 = vrot.slane %v2136_v23, 5  ;;  %v6896_v46 = vrot.slane %v2142_v24, 5  ;;  %v2157_v49 = vshrl.u32 %v5007_v35, 16 }
 0x165   : > { %3829 = vmatprep.mubr.bf16.mxu1 %v5928_v2  ;;  %v929_v48 = vsel %vm6380_vm4, %v927_v29, %v928_v30  ;;  %v809_v2 = vld [vmem:[%s6362_s4 + $0x94] sm:$0xf]  ;;  %v2125_v21 = vor.u32 %v2124_v7, %v6873_v6  ;;  %v5049_v30 = vld [vmem:[%s6362_s4 + $0x5c] sm:$0x1]  ;;  %v2160_v50 = vshll.u32 %v5007_v35, 16  ;;  %v2166_v51 = vshll.u32 %v5008_v36, 16 }
 0x166   : > { %v4782_v57 = vcombine.low %v926_v47, %v929_v48  ;;  %v939_v17 = vrot.slane %v809_v2, 5  ;;  %v2115_v20 = vor.u32 %v2114_v5, %v2111_v3  ;;  %v5047_v29 = vld [vmem:[%s6362_s4 + $0x54] sm:$0xe]  ;;  %v2148_v47 = vrot.slane %v2146_v25, 4  ;;  %v5006_v48 = vld [vmem:[%s6362_s4 + $0x80] sm:$0x1] }
 0x167   : > { %v2126_v40 = vrot.slane %v2125_v21, 4  ;;  %v2170_v52 = vshrl.u32 %v5008_v36, 16  ;;  %v5076_v53 = vrot.slane %v5047_v29, 9  ;;  %v2434_v54 = vrot.slane %v2432_v32, 4 }
 0x168   : > { %v941_v37 = vrot.slane %v939_v17, 4  ;;  %v2116_v39 = vrot.slane %v2115_v20, 4  ;;  %v2435_v55 = vrot.slane %v5049_v30, 5  ;;  %v940_v56 = vsel %vm6380_vm4, %v4771_v16, %v939_v17  ;;  %v5054_v20 = vld [vmem:[%s6362_s4 + $0x70] sm:$0xf] }
 0x169   : > { %4239 = vmatmul.mubr.bf16.gmra.mrb[4].mxu0 %v5085_v14  ;;  %v936_v14 = vsel %vm6380_vm4, %v934_v62, %v935_v61  ;;  %v2439_v60 = vrot.slane %v5051_v42, 5  ;;  %v5052_v62 = vld [vmem:[%s6362_s4 + $0x68] sm:$0x1]  ;;  %v2139_v63 = vor.u32 %v2138_v45, %v2135_v43  ;;  %v2149_v0 = vor.u32 %v2148_v47, %v6896_v46  ;;  %v5012_v47 = vld [vmem:[%s6362_s4 + $0x98] sm:$0x1] }
 0x16a   : > { %4248 = vmatprep.mubr.bf16.mxu0 %v6148_v44  ;;  %v2121_v58 = vsel %vm6387_vm5, %v2116_v39, %v6873_v6  ;;  %v2152_v1 = vshll.u32 %v5006_v48, 16  ;;  %v2159_v38 = vrot.slane %v2157_v49, 4  ;;  %v2162_v2 = vrot.slane %v2160_v50, 5  ;;  %v5013_v49 = vld [vmem:[%s6362_s4 + $0x9c] sm:$0xf] }
 0x16b   : > { %v6911_v3 = vrot.slane %v2166_v51, 5  ;;  %v2172_v5 = vrot.slane %v2170_v52, 4  ;;  %v2433_v7 = vsel %vm6380_vm4, %v5076_v53, %v2432_v32  ;;  %v2436_v8 = vsel %vm6380_vm4, %v2434_v54, %v2435_v55  ;;  %v5014_v50 = vld [vmem:[%s6362_s4 + $0xa0] sm:$0xf] }
 0x16c   : > { %3830 = vmatmul.mubr.bf16.gmra.mrb[36].mxu1 %v4781_v27  ;;  %v5931_v27 = vld [vmem:[%s6362_s4 + $0x9c] sm:$0xff]   ;;  %v2442_v13 = vrot.slane %v5052_v62, 5  ;;  %v2441_v15 = vrot.slane %v2439_v60, 4  ;;  %v2140_v16 = vrot.slane %v2139_v63, 4  ;;  %v2150_v17 = vrot.slane %v2149_v0, 4 }
 0x16d   : > { %3839 = vmatprep.mubr.bf16.mxu1 %v5929_v33  ;;  %v4783_v33 = vcombine.low %v933_v10, %v936_v14  ;;  %v5010_v14 = vld [vmem:[%s6362_s4 + $0x90] sm:$0xf]  ;;  %v2154_v18 = vrot.slane %v2152_v1, 5  ;;  %v5089_v19 = vcombine.low %v2433_v7, %v2436_v8  ;;  %v2163_v21 = vor.u32 %v2162_v2, %v2159_v38  ;;  %v5933_v2 = vld [vmem:[%s6362_s4 + $0x78] sm:$0xff]  }
 0x16e   : > { %v2181_v23 = vshrl.u32 %v5010_v14, 16  ;;  %v2184_v24 = vshll.u32 %v5010_v14, 16  ;;  %v2190_v25 = vshll.u32 %v5011_v31, 16  ;;  %v2443_v30 = vsel %vm6380_vm4, %v2441_v15, %v2442_v13 }
 0x16f   : > { %v2145_v32 = vsel %vm6387_vm5, %v2140_v16, %v6896_v46  ;;  %v2446_v35 = vrot.slane %v5054_v20, 5  ;;  %v2164_v36 = vrot.slane %v2163_v21, 4  ;;  %v2214_v62 = vshll.u32 %v5014_v50, 16  ;;  %v5016_v16 = vld [vmem:[%s6362_s4 + $0xa8] sm:$0xf] }
 0x170   : > { %v2186_v42 = vrot.slane %v2184_v24, 5  ;;  %v6936_v43 = vrot.slane %v2190_v25, 5  ;;  %v2218_v63 = vshrl.u32 %v5014_v50, 16 }
 0x171   : > { %4249 = vmatmul.mubr.bf16.gmra.mrb[8].mxu0 %v5086_v41  ;;  %v2130_v41 = vrot.slane %v2128_v26, 5  ;;  %v2173_v26 = vor.u32 %v2172_v5, %v6911_v3  ;;  %v2448_v52 = vrot.slane %v2446_v35, 4  ;;  %v2169_v54 = vsel %vm6387_vm5, %v2164_v36, %v6911_v3  ;;  %v5056_v5 = vld [vmem:[%s6362_s4 + $0x78] sm:$0xe] }
 0x172   : > { %4258 = vmatprep.mubr.bf16.mxu0 %v6148_v44  ;;  %v2216_v13 = vrot.slane %v2214_v62, 5  ;;  %v2220_v14 = vrot.slane %v2218_v63, 4 }
 0x173   : > { %v2131_v61 = vsel %vm6387_vm5, %v2126_v40, %v2130_v41  ;;  %v5055_v40 = vld [vmem:[%s6362_s4 + $0x74] sm:$0x1]  ;;  %v2183_v41 = vrot.slane %v2181_v23, 4 }
 0x174   : > { %3840 = vmatmul.mubr.bf16.gmra.mrb[40].mxu1 %v4782_v57  ;;  %v943_v57 = vsel %vm6380_vm4, %v941_v37, %v942_v28  ;;  %v5026_v10 = vcombine.low %v2121_v58, %v2131_v61  ;;  %v5932_v28 = vld [vmem:[%s6362_s4 + $0x6c] sm:$0xff]   ;;  %v2174_v37 = vrot.slane %v2173_v26, 4  ;;  %v2449_v53 = vrot.slane %v5055_v40, 5 }
 0x175   : > { %3849 = vmatprep.mubr.bf16.mxu1 %v5930_v59  ;;  %v5050_v59 = vld [vmem:[%s6362_s4 + $0x60] sm:$0xe]  ;;  %v4784_v6 = vcombine.low %v940_v56, %v943_v57  ;;  %v5057_v56 = vld [vmem:[%s6362_s4 + $0x7c] sm:$0xf]  ;;  %v2187_v57 = vor.u32 %v2186_v42, %v2183_v41  ;;  %v2208_v61 = vshll.u32 %v5013_v49, 16  ;;  %v2221_v24 = vor.u32 %v2220_v14, %v2216_v13 }
 0x176   : > { %v5077_v11 = vrot.slane %v5050_v59, 9  ;;  %v2200_v59 = vshll.u32 %v5012_v47, 16  ;;  %v2450_v1 = vsel %vm6380_vm4, %v2448_v52, %v2449_v53  ;;  %v2453_v38 = vrot.slane %v5057_v56, 5 }
 0x177   : > { %v2222_v41 = vrot.slane %v2221_v24, 4 }
 0x178   : > { %v2440_v29 = vsel %vm6380_vm4, %v5077_v11, %v2439_v60  ;;  %v2205_v60 = vshrl.u32 %v5013_v49, 16  ;;  %v2202_v8 = vrot.slane %v2200_v59, 5  ;;  %v2210_v11 = vrot.slane %v2208_v61, 5  ;;  %v5018_v49 = vld [vmem:[%s6362_s4 + $0xb0] sm:$0x1] }
 0x179   : > { %4259 = vmatmul.mubr.bf16.gmra.mrb[12].mxu0 %v5087_v9  ;;  %v5009_v9 = vld [vmem:[%s6362_s4 + $0x8c] sm:$0x1]  ;;  %v5090_v48 = vcombine.low %v2440_v29, %v2443_v30  ;;  %v5935_v59 = vld [vmem:[%s6362_s4 + $0x90] sm:$0xff]  }
 0x17a   : > { %4268 = vmatprep.mubr.bf16.mxu0 %v6148_v44  ;;  %v2176_v22 = vshll.u32 %v5009_v9, 16  ;;  %v5058_v9 = vld [vmem:[%s6362_s4 + $0x80] sm:$0x1] }
 0x17b   : > { %v2456_v20 = vrot.slane %v5058_v9, 5  ;;  %v5066_v9 = vld [vmem:[%s6362_s4 + $0xa0] sm:$0xf] }
 0x17c   : > { %3850 = vmatmul.mubr.bf16.gmra.mrb[44].mxu1 %v4783_v33  ;;  %v2155_v33 = vsel %vm6387_vm5, %v2150_v17, %v2154_v18  ;;  %v2178_v39 = vrot.slane %v2176_v22, 5  ;;  %v5017_v17 = vld [vmem:[%s6362_s4 + $0xac] sm:$0xf]  ;;  %v5079_v18 = vrot.slane %v5056_v5, 9  ;;  %v5060_v22 = vld [vmem:[%s6362_s4 + $0x88] sm:$0xf] }
 0x17d   : > { %3859 = vmatprep.mubr.bf16.mxu1 %v5931_v27  ;;  %v2194_v27 = vshrl.u32 %v5011_v31, 16  ;;  %v5027_v46 = vcombine.low %v2145_v32, %v2155_v33  ;;  %v5015_v31 = vld [vmem:[%s6362_s4 + $0xa4] sm:$0x1]  ;;  %v2238_v29 = vshll.u32 %v5017_v17, 16  ;;  %v2242_v30 = vshrl.u32 %v5017_v17, 16 }
 0x17e   : > { %v2179_v55 = vsel %vm6387_vm5, %v2174_v37, %v2178_v39  ;;  %v2224_v25 = vshll.u32 %v5015_v31, 16  ;;  %v5934_v32 = vld [vmem:[%s6362_s4 + $0x84] sm:$0xff]   ;;  %v2454_v33 = vsel %vm6380_vm4, %v5079_v18, %v2453_v38  ;;  %v2460_v36 = vrot.slane %v5060_v22, 5  ;;  %v5061_v39 = vld [vmem:[%s6362_s4 + $0x8c] sm:$0x1] }
 0x17f   : > { %v2196_v45 = vrot.slane %v2194_v27, 4  ;;  %v5028_v3 = vcombine.low %v2169_v54, %v2179_v55  ;;  %v2229_v27 = vshrl.u32 %v5016_v16, 16  ;;  %v2244_v47 = vrot.slane %v2242_v30, 4  ;;  %v5063_v54 = vld [vmem:[%s6362_s4 + $0x94] sm:$0xf]  ;;  %v5937_v22 = vld [vmem:[%s6362_s4 + $0xa8] sm:$0xff]  }
 0x180   : > { %v2226_v42 = vrot.slane %v2224_v25, 5  ;;  %v2463_v52 = vrot.slane %v5061_v39, 5  ;;  %v2467_v62 = vrot.slane %v5063_v54, 5  ;;  %v5065_v17 = vld [vmem:[%s6362_s4 + $0x9c] sm:$0xe] }
 0x181   : > { %4269 = vmatmul.mubr.bf16.gmra.mrb[16].mxu0 %v5088_v34  ;;  %v5053_v34 = vld [vmem:[%s6362_s4 + $0x6c] sm:$0xe]  ;;  %v2197_v58 = vor.u32 %v2196_v45, %v6936_v43  ;;  %v5067_v18 = vld [vmem:[%s6362_s4 + $0xa4] sm:$0x1] }
 0x182   : > { %4278 = vmatprep.mubr.bf16.mxu0 %v6148_v44  ;;  %v5078_v51 = vrot.slane %v5053_v34, 9  ;;  %v2227_v55 = vsel %vm6387_vm5, %v2222_v41, %v2226_v42 }
 0x183   : > { %v2198_v7 = vrot.slane %v2197_v58, 4  ;;  %v2248_v58 = vshll.u32 %v5018_v49, 16 }
 0x184   : > { %3860 = vmatmul.mubr.bf16.gmra.mrb[48].mxu1 %v4784_v6  ;;  %v2447_v0 = vsel %vm6380_vm4, %v5078_v51, %v2446_v35  ;;  %v2188_v6 = vrot.slane %v2187_v57, 4  ;;  %v5059_v35 = vld [vmem:[%s6362_s4 + $0x84] sm:$0xe]  ;;  %v2462_v51 = vrot.slane %v2460_v36, 4 }
 0x185   : > { %4135 = vmatprep.mubr.bf16.mxu1 %v5026_v10  ;;  %v2207_v10 = vrot.slane %v2205_v60, 4  ;;  %v5091_v15 = vcombine.low %v2447_v0, %v2450_v1  ;;  %v2203_v26 = vsel %vm6387_vm5, %v2198_v7, %v2202_v8  ;;  %v5080_v50 = vrot.slane %v5059_v35, 9  ;;  %v5062_v0 = vld [vmem:[%s6362_s4 + $0x90] sm:$0xe]  ;;  %v5064_v1 = vld [vmem:[%s6362_s4 + $0x98] sm:$0x1] }
 0x186   : > { %v2193_v21 = vsel %vm6387_vm5, %v2188_v6, %v6936_v43  ;;  %v2231_v43 = vrot.slane %v2229_v27, 4  ;;  %v2464_v61 = vsel %vm6380_vm4, %v2462_v51, %v2463_v52  ;;  %v5081_v6 = vrot.slane %v5062_v0, 9  ;;  %v5068_v27 = vld [vmem:[%s6362_s4 + $0xa8] sm:$0xe] }
 0x187   : > { %v2211_v23 = vor.u32 %v2210_v11, %v2207_v10  ;;  %v5029_v37 = vcombine.low %v2193_v21, %v2203_v26  ;;  %v2461_v60 = vsel %vm6380_vm4, %v5080_v50, %v2460_v36  ;;  %v2469_v7 = vrot.slane %v2467_v62, 4  ;;  %v5069_v26 = vld [vmem:[%s6362_s4 + $0xac] sm:$0xf] }
 0x188   : > { %v5093_v5 = vcombine.low %v2461_v60, %v2464_v61  ;;  %v2470_v8 = vrot.slane %v5064_v1, 5  ;;  %v2468_v14 = vsel %vm6380_vm4, %v5081_v6, %v2467_v62  ;;  %v2477_v21 = vrot.slane %v5067_v18, 5 }
 0x189   : > { %4279 = vmatmul.mubr.bf16.gmra.mrb[20].mxu0 %v5089_v19  ;;  %v2455_v19 = vrot.slane %v2453_v38, 4  ;;  %v2212_v40 = vrot.slane %v2211_v23, 4  ;;  %v2481_v25 = vrot.slane %v5069_v26, 5  ;;  %v5083_v30 = vrot.slane %v5068_v27, 9 }
 0x18a   : > { %4288 = vmatprep.mubr.bf16.mxu0 %v6148_v44  ;;  %v2471_v31 = vsel %vm6380_vm4, %v2469_v7, %v2470_v8 }
 0x18b   : > { %v2457_v34 = vsel %vm6380_vm4, %v2455_v19, %v2456_v20  ;;  %v2217_v53 = vsel %vm6387_vm5, %v2212_v40, %v2216_v13  ;;  %v5936_v13 = vld [vmem:[%s6362_s4 + $0x9c] sm:$0xff]   ;;  %v5094_v12 = vcombine.low %v2468_v14, %v2471_v31  ;;  %v5082_v19 = vrot.slane %v5065_v17, 9 }
 0x18c   : > { %4136 = vmatmul.mubr.bf16.vlgmr.msra.gmra.mrb[52].mxu1 %v5932_v28  ;;  %v2232_v28 = vshll.u32 %v5016_v16, 16  ;;  %v5030_v63 = vcombine.low %v2217_v53, %v2227_v55 }
 0x18d   : > { %4145 = vmatprep.mubr.bf16.mxu1 %v5027_v46  ;;  %v2240_v46 = vrot.slane %v2238_v29, 5 }
 0x18e   : > { %v2234_v45 = vrot.slane %v2232_v28, 5  ;;  %v5070_v28 = vld [vmem:[%s6362_s4 + $0xb0] sm:$0x1] }
 0x18f   : > { %v2245_v57 = vor.u32 %v2244_v47, %v2240_v46 }
 0x190   : > { %v2235_v56 = vor.u32 %v2234_v45, %v2231_v43 }
 0x191   : > { %4289 = vmatmul.mubr.bf16.gmra.mrb[24].mxu0 %v5090_v48  ;;  %v5092_v48 = vcombine.low %v2454_v33, %v2457_v34  ;;  %v2484_v33 = vrot.slane %v5070_v28, 5  ;;  %v2482_v34 = vsel %vm6380_vm4, %v5083_v30, %v2481_v25 }
 0x192   : > { %4298 = vmatprep.mubr.bf16.mxu0 %v6148_v44  ;;  %v2236_v38 = vrot.slane %v2235_v56, 4 }
 0x194   : > { %4146 = vmatmul.mubr.bf16.gmra.mrb[56].mxu1 %v5933_v2  ;;  %v2246_v2 = vrot.slane %v2245_v57, 4  ;;  %v2241_v10 = vsel %vm6387_vm5, %v2236_v38, %v2240_v46 }
 0x195   : > { %4155 = vmatprep.mubr.bf16.mxu1 %v5028_v3  ;;  %v2250_v3 = vrot.slane %v2248_v58, 5 }
 0x197   : > { %v2251_v11 = vsel %vm6387_vm5, %v2246_v2, %v2250_v3 }
 0x198   : > { %v5031_v16 = vcombine.low %v2241_v10, %v2251_v11 }
 0x199   : > { %4299 = vmatmul.mubr.bf16.gmra.mrb[52].mxu0 %v5091_v15  ;;  %v2474_v15 = vrot.slane %v5066_v9, 5 }
 0x19a   : > { %4308 = vmatprep.mubr.bf16.mxu0 %v6148_v44 }
 0x19b   : > { %v2476_v20 = vrot.slane %v2474_v15, 4  ;;  %v2475_v23 = vsel %vm6380_vm4, %v5082_v19, %v2474_v15 }
 0x19c   : > { %4156 = vmatmul.mubr.bf16.gmra.mrb[60].mxu1 %v5934_v32  ;;  %v2483_v32 = vrot.slane %v2481_v25, 4  ;;  %v2812_v25 = vld [vmem:[#allocation8] sm:$0x3] }
 0x19d   : > { %4165 = vmatprep.mubr.bf16.mxu1 %v5029_v37  ;;  %v2478_v24 = vsel %vm6380_vm4, %v2476_v20, %v2477_v21 }
 0x19e   : > { %v5095_v29 = vcombine.low %v2475_v23, %v2478_v24  ;;  %v2485_v35 = vsel %vm6380_vm4, %v2483_v32, %v2484_v33 }
 0x19f   : > { %v5096_v36 = vcombine.low %v2482_v34, %v2485_v35 }
 0x1a1   : > { %4309 = vmatmul.mubr.bf16.gmra.mrb[56].mxu0 %v5092_v48 }
 0x1a2   : > { %4318 = vmatprep.mubr.bf16.mxu0 %v6148_v44 }
 0x1a4   : > { %4166 = vmatmul.mubr.bf16.gmra.mrb[64].mxu1 %v5935_v59 }
 0x1a5   : > { %4175 = vmatprep.mubr.bf16.mxu1 %v5030_v63 }
 0x1a9   : > { %4319 = vmatmul.mubr.bf16.gmra.mrb[60].mxu0 %v5093_v5 }
 0x1aa   : > { %4328 = vmatprep.mubr.bf16.mxu0 %v6148_v44 }
 0x1ac   : > { %4176 = vmatmul.mubr.bf16.gmra.mrb[68].mxu1 %v5936_v13 }
 0x1ad   : > { %4185 = vmatprep.mubr.bf16.mxu1 %v5031_v16 }
 0x1b1   : > { %4329 = vmatmul.mubr.bf16.gmra.mrb[64].mxu0 %v5094_v12  ;;  %v2814_v12 = vlaneseq }
 0x1b2   : > { %4338 = vmatprep.mubr.bf16.mxu0 %v6148_v44 }
 0x1b3   : > { %v2815_v21 = vshrl.u32 %v2814_v12, 7 }
 0x1b4   : > { %4186 = vmatmul.mubr.bf16.gmra.mrb[72].mxu1 %v5937_v22 }
 0x1b5   : > { %v2816_v23 = vsub.s32 0, %v2815_v21  ;;  %v2820_v27 = vsub.s32 1, %v2815_v21 }
 0x1b7   : > { %v7112_v30 = vrot.slane %v2812_v25, %v2820_v27 }
 0x1b9   : > { %4339 = vmatmul.mubr.bf16.gmra.mrb[68].mxu0 %v5095_v29  ;;  %v7110_v29 = vrot.slane %v2812_v25, %v2816_v23 }
 0x1ba   : > { %4348 = vmatprep.mubr.bf16.mxu0 %v6148_v44 }
 0x1c1   : > { %4349 = vmatmul.mubr.bf16.gmra.mrb[72].mxu0 %v5096_v36 }
 0x1c2   : > { %v7014_v37 = vpop.f32.mrb[28].mxu0 }
 0x1c3   : > { %v7016_v39 = vpop.f32.mrb[29].mxu0 }
 0x1c4   : > { %v7018_v40 = vpop.f32.mrb[30].mxu0 }
 0x1c5   : > { %v7020_v41 = vpop.f32.mrb[31].mxu0 }
 0x1cc   : > { %v7022_v42 = vpop.f32.mrb[32].mxu0 }
 0x1cd   : > { %v7024_v43 = vpop.f32.mrb[33].mxu0 }
 0x1ce   : > { %v7026_v44 = vpop.f32.mrb[34].mxu0 }
 0x1cf   : > { %v7028_v45 = vpop.f32.mrb[35].mxu0 }
 0x1d6   : > { %v7030_v4 = vpop.f32.mrb[36].mxu0 }
 0x1d7   : > { %v7032_v46 = vpop.f32.mrb[37].mxu0 }
 0x1d8   : > { %v7034_v47 = vpop.f32.mrb[38].mxu0 }
 0x1d9   : > { %v7036_v48 = vpop.f32.mrb[39].mxu0 }
 0x1e0   : > { %v7038_v49 = vpop.f32.mrb[40].mxu0 }
 0x1e1   : > { %v7040_v50 = vpop.f32.mrb[41].mxu0 }
 0x1e2   : > { %v7042_v51 = vpop.f32.mrb[42].mxu0 }
 0x1e3   : > { %v7044_v52 = vpop.f32.mrb[43].mxu0 }
 0x1eb   : > { %v7046_v53 = vpop.f32.mrb[44].mxu0 }
 0x1ec   : > { %v7048_v54 = vpop.f32.mrb[45].mxu0 }
 0x1ed   : > { %v7050_v55 = vpop.f32.mrb[46].mxu0 }
 0x1ee   : > { %v7052_v56 = vpop.f32.mrb[47].mxu0 }
 0x1f4   : > { %v7054_v57 = vpop.f32.mrb[48].mxu0 }
 0x1f5   : > { %v7056_v58 = vpop.f32.mrb[49].mxu0 }
 0x1f6   : > { %v7058_v59 = vpop.f32.mrb[50].mxu0 }
 0x1f7   : > { %7393 = vst [vmem:[#allocation13_spill] sm:$0xff] %v7058_v59  ;;  %v7060_v60 = vpop.f32.mrb[51].mxu0  ;;  %v3741_v61 = vpop.f32.mrb[0].mxu1 }
 0x1f8   : > { %7394 = vst [vmem:[#allocation14_spill] sm:$0xff] %v7060_v60  ;;  %v3743_v62 = vpop.f32.mrb[1].mxu1  ;;  %v5328_v35 = vadd.f32 %v3741_v61, %v7110_v29 }
 0x1f9   : > { %v3745_v63 = vpop.f32.mrb[2].mxu1 }
 0x1fa   : > { %v3747_v0 = vpop.f32.mrb[3].mxu1  ;;  %v5332_v25 = vadd.f32 %v3745_v63, %v7110_v29 }
 0x1ff   : > { %v7062_v1 = vpop.f32.mrb[4].mxu1 }
 0x200   : > { %v7064_v38 = vpop.f32.mrb[5].mxu1 }
 0x201   : > { %v7066_v2 = vpop.f32.mrb[6].mxu1 }
 0x202   : > { %v7068_v3 = vpop.f32.mrb[7].mxu1 }
 0x207   : > { %v7070_v5 = vpop.f32.mrb[8].mxu1 }
 0x208   : > { %v7072_v6 = vpop.f32.mrb[9].mxu1 }
 0x209   : > { %v7074_v7 = vpop.f32.mrb[10].mxu1 }
 0x20a   : > { %v7076_v8 = vpop.f32.mrb[11].mxu1 }
 0x20f   : > { %v7078_v9 = vpop.f32.mrb[12].mxu1 }
 0x210   : > { %v7080_v10 = vpop.f32.mrb[13].mxu1 }
 0x211   : > { %v7082_v11 = vpop.f32.mrb[14].mxu1 }
 0x212   : > { %v7084_v13 = vpop.f32.mrb[15].mxu1 }
 0x217   : > { %v7086_v14 = vpop.f32.mrb[16].mxu1 }
 0x218   : > { %v7088_v31 = vpop.f32.mrb[17].mxu1 }
 0x219   : > { %v7090_v15 = vpop.f32.mrb[18].mxu1 }
 0x21a   : > { %v7092_v16 = vpop.f32.mrb[19].mxu1 }
 0x21f   : > { %v7094_v17 = vpop.f32.mrb[20].mxu1 }
 0x220   : > { %v7096_v18 = vpop.f32.mrb[21].mxu1 }
 0x221   : > { %v7098_v19 = vpop.f32.mrb[22].mxu1 }
 0x222   : > { %v7100_v20 = vpop.f32.mrb[23].mxu1 }
 0x223   : > { %7395 = vst [vmem:[#allocation15_spill] sm:$0xff] %v7100_v20 }
 0x227   : > { %v7102_v26 = vpop.f32.mrb[24].mxu1 }
 0x228   : > { %7396 = vst [vmem:[#allocation16_spill] sm:$0xff] %v7102_v26  ;;  %v7104_v22 = vpop.f32.mrb[25].mxu1 }
 0x229   : > { %7397 = vst [vmem:[#allocation17_spill] sm:$0xff] %v7104_v22  ;;  %v7106_v24 = vpop.f32.mrb[26].mxu1 }
 0x22a   : > { %7398 = vst [vmem:[#allocation18_spill] sm:$0xff] %v7106_v24  ;;  %v7108_v28 = vpop.f32.mrb[27].mxu1  ;;  %v5330_v24 = vadd.f32 %v3743_v62, %v7112_v30 }
 0x22b   : > { %7399 = vst [vmem:[#allocation19_spill] sm:$0xff] %v7108_v28 }
 0x22f   : > { %v3811_v32 = vpop.f32.mrb[28].mxu1 }
 0x230   : > { %v5384_v33 = vadd.f32 %v3811_v32, %v7110_v29  ;;  %v3813_v34 = vpop.f32.mrb[29].mxu1 }
 0x231   : > { %v5388_v36 = vadd.f32 %v3813_v34, %v7112_v30  ;;  %v3815_v12 = vpop.f32.mrb[30].mxu1  ;;  %v5334_v34 = vadd.f32 %v3747_v0, %v7112_v30 }
 0x232   : > { %v5392_v21 = vadd.f32 %v3815_v12, %v7110_v29  ;;  %v3817_v28 = vpop.f32.mrb[31].mxu1  ;;  %v7120_v23 = vadd.f32 %v5384_v33, %v7014_v37 }
 0x233   : > { %v5396_v26 = vadd.f32 %v3817_v28, %v7112_v30  ;;  %v7126_v61 = vadd.f32 %v5388_v36, %v7016_v39 }
 0x234   : > { %v4230_v22 = vpop.f32.mrb[0].mxu0  ;;  %7400 = vst [vmem:[#allocation20_spill] sm:$0xff] %v7120_v23  ;;  %v7130_v12 = vadd.f32 %v5392_v21, %v7018_v40 }
 0x235   : > { %v5329_v27 = vadd.f32 %v5328_v35, %v4230_v22  ;;  %v4232_v32 = vpop.f32.mrb[1].mxu0  ;;  %v7133_v63 = vadd.f32 %v5396_v26, %v7020_v41 }
 0x236   : > { %v5331_v62 = vadd.f32 %v5330_v24, %v4232_v32  ;;  %v4234_v60 = vpop.f32.mrb[2].mxu0  ;;  %v5336_v24 = vadd.f32 %v7062_v1, %v7110_v29  ;;  %v5340_v1 = vadd.f32 %v7066_v2, %v7110_v29 }
 0x237   : > { %v4359_v59 = vmax.f32 %v5329_v27, 0.0  ;;  %v5333_v37 = vadd.f32 %v5332_v25, %v4234_v60  ;;  %v4236_v33 = vpop.f32.mrb[3].mxu0  ;;  %v3821_v28 = vpop.f32.mrb[32].mxu1  ;;  %v5338_v60 = vadd.f32 %v7064_v38, %v7112_v30 }
 0x238   : > { %v4360_v22 = vmax.f32 %v5331_v62, 0.0  ;;  %v5335_v35 = vadd.f32 %v5334_v34, %v4236_v33  ;;  %v5400_v36 = vadd.f32 %v3821_v28, %v7110_v29  ;;  %v3823_v0 = vpop.f32.mrb[33].mxu1 }
 0x239   : > { %v4361_v23 = vmax.f32 %v5333_v37, 0.0  ;;  %v5404_v40 = vadd.f32 %v3823_v0, %v7112_v30  ;;  %v3825_v21 = vpop.f32.mrb[34].mxu1 }
 0x23a   : > { %v5270_v20 = vpack.c.bf16 %v4360_v22, %v4359_v59  ;;  %v4362_v39 = vmax.f32 %v5335_v35, 0.0  ;;  %v5408_v26 = vadd.f32 %v3825_v21, %v7110_v29  ;;  %v3827_v25 = vpop.f32.mrb[35].mxu1  ;;  %v7146_v27 = vadd.f32 %v5400_v36, %v7022_v42 }
 0x23b   : > { %v5412_v38 = vadd.f32 %v3827_v25, %v7112_v30  ;;  %v7152_v62 = vadd.f32 %v5404_v40, %v7024_v43 }
 0x23c   : > { %4567 = vst [vmem:[%s7141_s22] sm:$0xff] %v5270_v20  ;;  %v5271_v41 = vpack.c.bf16 %v4362_v39, %v4361_v23  ;;  %v4240_v59 = vpop.f32.mrb[4].mxu0  ;;  %v5342_v20 = vadd.f32 %v7068_v3, %v7112_v30  ;;  %v7158_v33 = vadd.f32 %v5408_v26, %v7026_v44  ;;  %v5344_v44 = vadd.f32 %v7070_v5, %v7110_v29 }
 0x23d   : > { %v5337_v32 = vadd.f32 %v5336_v24, %v4240_v59  ;;  %v4242_v34 = vpop.f32.mrb[5].mxu0  ;;  %v7161_v35 = vadd.f32 %v5412_v38, %v7028_v45  ;;  %v5346_v45 = vadd.f32 %v7072_v6, %v7112_v30  ;;  %v5350_v6 = vadd.f32 %v7076_v8, %v7112_v30 }
 0x23e   : > { %4568 = vst [vmem:[%s7141_s22 + $0x8] sm:$0xff] %v5271_v41  ;;  %v5339_v23 = vadd.f32 %v5338_v60, %v4242_v34  ;;  %v4244_v37 = vpop.f32.mrb[6].mxu0 }
 0x23f   : > { %v4363_v42 = vmax.f32 %v5337_v32, 0.0  ;;  %v5341_v22 = vadd.f32 %v5340_v1, %v4244_v37  ;;  %v4246_v2 = vpop.f32.mrb[7].mxu0  ;;  %v3831_v36 = vpop.f32.mrb[36].mxu1  ;;  %v5348_v32 = vadd.f32 %v7074_v7, %v7110_v29 }
 0x240   : > { %v4364_v28 = vmax.f32 %v5339_v23, 0.0  ;;  %v5343_v39 = vadd.f32 %v5342_v20, %v4246_v2  ;;  %v5416_v3 = vadd.f32 %v3831_v36, %v7110_v29  ;;  %v3833_v40 = vpop.f32.mrb[37].mxu1 }
 0x241   : > { %v4365_v43 = vmax.f32 %v5341_v22, 0.0  ;;  %v5420_v21 = vadd.f32 %v3833_v40, %v7112_v30  ;;  %v3835_v60 = vpop.f32.mrb[38].mxu1 }
 0x242   : > { %v5272_v0 = vpack.c.bf16 %v4364_v28, %v4363_v42  ;;  %v4366_v24 = vmax.f32 %v5343_v39, 0.0  ;;  %v5424_v26 = vadd.f32 %v3835_v60, %v7110_v29  ;;  %v3837_v25 = vpop.f32.mrb[39].mxu1  ;;  %v7172_v1 = vadd.f32 %v5416_v3, %v7030_v4 }
 0x243   : > { %v5428_v38 = vadd.f32 %v3837_v25, %v7112_v30  ;;  %v7178_v20 = vadd.f32 %v5420_v21, %v7032_v46 }
 0x244   : > { %4569 = vst [vmem:[%s7141_s22 + $0x10] sm:$0xff] %v5272_v0  ;;  %v5273_v41 = vpack.c.bf16 %v4366_v24, %v4365_v43  ;;  %v4250_v59 = vpop.f32.mrb[8].mxu0  ;;  %v7184_v42 = vadd.f32 %v5424_v26, %v7034_v47  ;;  %v5352_v47 = vadd.f32 %v7078_v9, %v7110_v29 }
 0x245   : > { %v5345_v5 = vadd.f32 %v5344_v44, %v4250_v59  ;;  %v4252_v34 = vpop.f32.mrb[9].mxu0  ;;  %v7187_v2 = vadd.f32 %v5428_v38, %v7036_v48  ;;  %v5354_v48 = vadd.f32 %v7080_v10, %v7112_v30  ;;  %v5356_v59 = vadd.f32 %v7082_v11, %v7110_v29 }
 0x246   : > { %4570 = vst [vmem:[%s7141_s22 + $0x18] sm:$0xff] %v5273_v41  ;;  %v5347_v23 = vadd.f32 %v5346_v45, %v4252_v34  ;;  %v4254_v37 = vpop.f32.mrb[10].mxu0  ;;  %v5358_v10 = vadd.f32 %v7084_v13, %v7112_v30 }
 0x247   : > { %v4367_v4 = vmax.f32 %v5345_v5, 0.0  ;;  %v5349_v22 = vadd.f32 %v5348_v32, %v4254_v37  ;;  %v4256_v7 = vpop.f32.mrb[11].mxu0  ;;  %v3841_v43 = vpop.f32.mrb[40].mxu1 }
 0x248   : > { %v4368_v28 = vmax.f32 %v5347_v23, 0.0  ;;  %v5351_v39 = vadd.f32 %v5350_v6, %v4256_v7  ;;  %v5432_v8 = vadd.f32 %v3841_v43, %v7110_v29  ;;  %v3843_v24 = vpop.f32.mrb[41].mxu1 }
 0x249   : > { %v4369_v46 = vmax.f32 %v5349_v22, 0.0  ;;  %v5436_v3 = vadd.f32 %v3843_v24, %v7112_v30  ;;  %v3845_v40 = vpop.f32.mrb[42].mxu1 }
 0x24a   : > { %v5274_v36 = vpack.c.bf16 %v4368_v28, %v4367_v4  ;;  %v4370_v0 = vmax.f32 %v5351_v39, 0.0  ;;  %v5440_v60 = vadd.f32 %v3845_v40, %v7110_v29  ;;  %v3847_v45 = vpop.f32.mrb[43].mxu1  ;;  %v7198_v41 = vadd.f32 %v5432_v8, %v7038_v49 }
 0x24b   : > { %v5444_v25 = vadd.f32 %v3847_v45, %v7112_v30  ;;  %v7204_v32 = vadd.f32 %v5436_v3, %v7040_v50  ;;  %v5364_v3 = vadd.f32 %v7090_v15, %v7110_v29 }
 0x24c   : > { %4571 = vst [vmem:[%s7141_s22 + $0x20] sm:$0xff] %v5274_v36  ;;  %v5275_v44 = vpack.c.bf16 %v4370_v0, %v4369_v46  ;;  %v4260_v21 = vpop.f32.mrb[12].mxu0  ;;  %v7210_v38 = vadd.f32 %v5440_v60, %v7042_v51  ;;  %v5360_v51 = vadd.f32 %v7086_v14, %v7110_v29 }
 0x24d   : > { %v5353_v9 = vadd.f32 %v5352_v47, %v4260_v21  ;;  %v4262_v26 = vpop.f32.mrb[13].mxu0  ;;  %v7213_v23 = vadd.f32 %v5444_v25, %v7044_v52  ;;  %v5362_v52 = vadd.f32 %v7088_v31, %v7112_v30  ;;  %v5366_v31 = vadd.f32 %v7092_v16, %v7112_v30 }
 0x24e   : > { %4572 = vst [vmem:[%s7141_s22 + $0x28] sm:$0xff] %v5275_v44  ;;  %v5355_v5 = vadd.f32 %v5354_v48, %v4262_v26  ;;  %v4264_v34 = vpop.f32.mrb[14].mxu0 }
 0x24f   : > { %v4371_v49 = vmax.f32 %v5353_v9, 0.0  ;;  %v5357_v6 = vadd.f32 %v5356_v59, %v4264_v34  ;;  %v4266_v11 = vpop.f32.mrb[15].mxu0  ;;  %v3851_v22 = vpop.f32.mrb[44].mxu1 }
 0x250   : > { %v4372_v37 = vmax.f32 %v5355_v5, 0.0  ;;  %v5359_v4 = vadd.f32 %v5358_v10, %v4266_v11  ;;  %v5448_v13 = vadd.f32 %v3851_v22, %v7110_v29  ;;  %v3853_v39 = vpop.f32.mrb[45].mxu1 }
 0x251   : > { %v4373_v50 = vmax.f32 %v5357_v6, 0.0  ;;  %v5452_v46 = vadd.f32 %v3853_v39, %v7112_v30  ;;  %v3855_v43 = vpop.f32.mrb[46].mxu1 }
 0x252   : > { %v5276_v7 = vpack.c.bf16 %v4372_v37, %v4371_v49  ;;  %v4374_v28 = vmax.f32 %v5359_v4, 0.0  ;;  %v5456_v8 = vadd.f32 %v3855_v43, %v7110_v29  ;;  %v3857_v24 = vpop.f32.mrb[47].mxu1  ;;  %v7224_v47 = vadd.f32 %v5448_v13, %v7046_v53 }
 0x253   : > { %v5460_v48 = vadd.f32 %v3857_v24, %v7112_v30  ;;  %v7230_v44 = vadd.f32 %v5452_v46, %v7048_v54  ;;  %v7403_v24 = vld [vmem:[#allocation14_spill] sm:$0xff] }
 0x254   : > { %4573 = vst [vmem:[%s7141_s22 + $0x30] sm:$0xff] %v5276_v7  ;;  %v5277_v36 = vpack.c.bf16 %v4374_v28, %v4373_v50  ;;  %v4270_v0 = vpop.f32.mrb[16].mxu0  ;;  %v7236_v45 = vadd.f32 %v5456_v8, %v7050_v55  ;;  %v5368_v55 = vadd.f32 %v7094_v17, %v7110_v29  ;;  %v5372_v28 = vadd.f32 %v7098_v19, %v7110_v29 }
 0x255   : > { %v5361_v14 = vadd.f32 %v5360_v51, %v4270_v0  ;;  %v4272_v40 = vpop.f32.mrb[17].mxu0  ;;  %v7239_v9 = vadd.f32 %v5460_v48, %v7052_v56  ;;  %v5370_v56 = vadd.f32 %v7096_v18, %v7112_v30  ;;  %v7401_v18 = vld [vmem:[#allocation15_spill] sm:$0xff] }
 0x256   : > { %4574 = vst [vmem:[%s7141_s22 + $0x38] sm:$0xff] %v5277_v36  ;;  %v5363_v21 = vadd.f32 %v5362_v52, %v4272_v40  ;;  %v4274_v60 = vpop.f32.mrb[18].mxu0  ;;  %v5374_v46 = vadd.f32 %v7401_v18, %v7112_v30  ;;  %v7402_v36 = vld [vmem:[#allocation13_spill] sm:$0xff] }
 0x257   : > { %v4375_v53 = vmax.f32 %v5361_v14, 0.0  ;;  %v5365_v59 = vadd.f32 %v5364_v3, %v4274_v60  ;;  %v4276_v15 = vpop.f32.mrb[19].mxu0  ;;  %v3861_v10 = vpop.f32.mrb[48].mxu1  ;;  %v7404_v60 = vld [vmem:[#allocation20_spill] sm:$0xff] }
 0x258   : > { %v4376_v26 = vmax.f32 %v5363_v21, 0.0  ;;  %v5367_v25 = vadd.f32 %v5366_v31, %v4276_v15  ;;  %v5464_v16 = vadd.f32 %v3861_v10, %v7110_v29  ;;  %v3863_v49 = vpop.f32.mrb[49].mxu1  ;;  %v7405_v15 = vld [vmem:[#allocation16_spill] sm:$0xff]  ;;  %v7406_v10 = vld [vmem:[#allocation17_spill] sm:$0xff] }
 0x259   : > { %v4377_v54 = vmax.f32 %v5365_v59, 0.0  ;;  %v5468_v6 = vadd.f32 %v3863_v49, %v7112_v30  ;;  %v3865_v11 = vpop.f32.mrb[50].mxu1 }
 0x25a   : > { %v5278_v5 = vpack.c.bf16 %v4376_v26, %v4375_v53  ;;  %v4378_v34 = vmax.f32 %v5367_v25, 0.0  ;;  %v5472_v50 = vadd.f32 %v3865_v11, %v7110_v29  ;;  %v3867_v22 = vpop.f32.mrb[51].mxu1  ;;  %v7250_v7 = vadd.f32 %v5464_v16, %v7054_v57 }
 0x25b   : > { %v5476_v39 = vadd.f32 %v3867_v22, %v7112_v30  ;;  %v7256_v51 = vadd.f32 %v5468_v6, %v7056_v58  ;;  %v5376_v26 = vadd.f32 %v7405_v15, %v7110_v29  ;;  %v7407_v6 = vld [vmem:[#allocation18_spill] sm:$0xff] }
 0x25c   : > { %4575 = vst [vmem:[%s7141_s22 + $0x40] sm:$0xff] %v5278_v5  ;;  %v5279_v37 = vpack.c.bf16 %v4378_v34, %v4377_v54  ;;  %v4280_v4 = vpop.f32.mrb[20].mxu0  ;;  %v7262_v0 = vadd.f32 %v5472_v50, %v7402_v36  ;;  %v5378_v5 = vadd.f32 %v7406_v10, %v7112_v30  ;;  %v5380_v11 = vadd.f32 %v7407_v6, %v7110_v29  ;;  %v7408_v50 = vld [vmem:[#allocation19_spill] sm:$0xff] }
 0x25d   : > { %v5369_v17 = vadd.f32 %v5368_v55, %v4280_v4  ;;  %v4282_v13 = vpop.f32.mrb[21].mxu0  ;;  %v7265_v3 = vadd.f32 %v5476_v39, %v7403_v24 }
 0x25e   : > { %4576 = vst [vmem:[%s7141_s22 + $0x48] sm:$0xff] %v5279_v37  ;;  %v5371_v43 = vadd.f32 %v5370_v56, %v4282_v13  ;;  %v4284_v52 = vpop.f32.mrb[22].mxu0 }
 0x25f   : > { %v4379_v57 = vmax.f32 %v5369_v17, 0.0  ;;  %v5373_v8 = vadd.f32 %v5372_v28, %v4284_v52  ;;  %v4286_v19 = vpop.f32.mrb[23].mxu0  ;;  %v4137_v48 = vpop.f32.mrb[52].mxu1 }
 0x260   : > { %v4380_v14 = vmax.f32 %v5371_v43, 0.0  ;;  %v5375_v40 = vadd.f32 %v5374_v46, %v4286_v19  ;;  %v5386_v53 = vadd.f32 %v7404_v60, %v4137_v48  ;;  %v4139_v59 = vpop.f32.mrb[53].mxu1 }
 0x261   : > { %v4381_v58 = vmax.f32 %v5373_v8, 0.0  ;;  %v5390_v25 = vadd.f32 %v7126_v61, %v4139_v59  ;;  %v4141_v54 = vpop.f32.mrb[54].mxu1  ;;  %v5382_v61 = vadd.f32 %v7408_v50, %v7112_v30 }
 0x262   : > { %v5280_v31 = vpack.c.bf16 %v4380_v14, %v4379_v57  ;;  %v4382_v21 = vmax.f32 %v5375_v40, 0.0  ;;  %v5394_v49 = vadd.f32 %v7130_v12, %v4141_v54  ;;  %v4143_v55 = vpop.f32.mrb[55].mxu1 }
 0x263   : > { %v5398_v4 = vadd.f32 %v7133_v63, %v4143_v55 }
 0x264   : > { %4577 = vst [vmem:[%s7141_s22 + $0x50] sm:$0xff] %v5280_v31  ;;  %v5281_v34 = vpack.c.bf16 %v4382_v21, %v4381_v58  ;;  %v4290_v16 = vpop.f32.mrb[24].mxu0 }
 0x265   : > { %v5377_v56 = vadd.f32 %v5376_v26, %v4290_v16  ;;  %v4292_v37 = vpop.f32.mrb[25].mxu0 }
 0x266   : > { %4578 = vst [vmem:[%s7141_s22 + $0x58] sm:$0xff] %v5281_v34  ;;  %v5379_v22 = vadd.f32 %v5378_v5, %v4292_v37  ;;  %v4294_v28 = vpop.f32.mrb[26].mxu0 }
 0x267   : > { %v4383_v17 = vmax.f32 %v5377_v56, 0.0  ;;  %v5381_v13 = vadd.f32 %v5380_v11, %v4294_v28  ;;  %v4296_v39 = vpop.f32.mrb[27].mxu0  ;;  %v4147_v43 = vpop.f32.mrb[56].mxu1 }
 0x268   : > { %v4384_v18 = vmax.f32 %v5379_v22, 0.0  ;;  %v5383_v12 = vadd.f32 %v5382_v61, %v4296_v39  ;;  %v5402_v36 = vadd.f32 %v7146_v27, %v4147_v43  ;;  %v4149_v63 = vpop.f32.mrb[57].mxu1 }
 0x269   : > { %v4385_v46 = vmax.f32 %v5381_v13, 0.0  ;;  %v5406_v57 = vadd.f32 %v7152_v62, %v4149_v63  ;;  %v4151_v30 = vpop.f32.mrb[58].mxu1 }
 0x26a   : > { %v5282_v29 = vpack.c.bf16 %v4384_v18, %v4383_v17  ;;  %v4386_v52 = vmax.f32 %v5383_v12, 0.0  ;;  %v5410_v24 = vadd.f32 %v7158_v33, %v4151_v30  ;;  %v4153_v14 = vpop.f32.mrb[59].mxu1 }
 0x26b   : > { %v5414_v48 = vadd.f32 %v7161_v35, %v4153_v14 }
 0x26c   : > { %4579 = vst [vmem:[%s7141_s22 + $0x60] sm:$0xff] %v5282_v29  ;;  %v5283_v8 = vpack.c.bf16 %v4386_v52, %v4385_v46  ;;  %v4300_v19 = vpop.f32.mrb[52].mxu0 }
 0x26d   : > { %v5387_v40 = vadd.f32 %v5386_v53, %v4300_v19  ;;  %v4302_v58 = vpop.f32.mrb[53].mxu0 }
 0x26e   : > { %4580 = vst [vmem:[%s7141_s22 + $0x68] sm:$0xff] %v5283_v8  ;;  %v5391_v31 = vadd.f32 %v5390_v25, %v4302_v58  ;;  %v4304_v21 = vpop.f32.mrb[54].mxu0 }
 0x26f   : > { %v4387_v60 = vmax.f32 %v5387_v40, 0.0  ;;  %v5395_v27 = vadd.f32 %v5394_v49, %v4304_v21  ;;  %v4306_v59 = vpop.f32.mrb[55].mxu0  ;;  %v4157_v54 = vpop.f32.mrb[60].mxu1 }
 0x270   : > { %v4388_v15 = vmax.f32 %v5391_v31, 0.0  ;;  %v5399_v62 = vadd.f32 %v5398_v4, %v4306_v59  ;;  %v5418_v33 = vadd.f32 %v7172_v1, %v4157_v54  ;;  %v4159_v53 = vpop.f32.mrb[61].mxu1 }
 0x271   : > { %v4389_v26 = vmax.f32 %v5395_v27, 0.0  ;;  %v5422_v34 = vadd.f32 %v7178_v20, %v4159_v53  ;;  %v4161_v35 = vpop.f32.mrb[62].mxu1 }
 0x272   : > { %v5284_v10 = vpack.c.bf16 %v4388_v15, %v4387_v60  ;;  %v4390_v5 = vmax.f32 %v5399_v62, 0.0  ;;  %v5426_v55 = vadd.f32 %v7184_v42, %v4161_v35  ;;  %v4163_v49 = vpop.f32.mrb[63].mxu1 }
 0x273   : > { %v5430_v56 = vadd.f32 %v7187_v2, %v4163_v49 }
 0x274   : > { %4581 = vst [vmem:[%s7141_s22 + $0x70] sm:$0xff] %v5284_v10  ;;  %v5285_v16 = vpack.c.bf16 %v4390_v5, %v4389_v26  ;;  %v4310_v25 = vpop.f32.mrb[56].mxu0 }
 0x275   : > { %v5403_v6 = vadd.f32 %v5402_v36, %v4310_v25  ;;  %v4312_v11 = vpop.f32.mrb[57].mxu0 }
 0x276   : > { %4582 = vst [vmem:[%s7141_s22 + $0x78] sm:$0xff] %v5285_v16  ;;  %v5407_v37 = vadd.f32 %v5406_v57, %v4312_v11  ;;  %v4314_v4 = vpop.f32.mrb[58].mxu0 }
 0x277   : > { %v4391_v50 = vmax.f32 %v5403_v6, 0.0  ;;  %v5411_v1 = vadd.f32 %v5410_v24, %v4314_v4  ;;  %v4316_v61 = vpop.f32.mrb[59].mxu0  ;;  %v4167_v17 = vpop.f32.mrb[64].mxu1 }
 0x278   : > { %v4392_v22 = vmax.f32 %v5407_v37, 0.0  ;;  %v5415_v20 = vadd.f32 %v5414_v48, %v4316_v61  ;;  %v5434_v42 = vadd.f32 %v7198_v41, %v4167_v17  ;;  %v4169_v18 = vpop.f32.mrb[65].mxu1 }
 0x279   : > { %v4393_v28 = vmax.f32 %v5411_v1, 0.0  ;;  %v5438_v12 = vadd.f32 %v7204_v32, %v4169_v18  ;;  %v4171_v2 = vpop.f32.mrb[66].mxu1 }
 0x27a   : > { %v5286_v13 = vpack.c.bf16 %v4392_v22, %v4391_v50  ;;  %v4394_v39 = vmax.f32 %v5415_v20, 0.0  ;;  %v5442_v29 = vadd.f32 %v7210_v38, %v4171_v2  ;;  %v4173_v52 = vpop.f32.mrb[67].mxu1 }
 0x27b   : > { %v5446_v57 = vadd.f32 %v7213_v23, %v4173_v52 }
 0x27c   : > { %4583 = vst [vmem:[%s7141_s22 + $0x80] sm:$0xff] %v5286_v13  ;;  %v5287_v46 = vpack.c.bf16 %v4394_v39, %v4393_v28  ;;  %v4320_v43 = vpop.f32.mrb[60].mxu0 }
 0x27d   : > { %v5419_v36 = vadd.f32 %v5418_v33, %v4320_v43  ;;  %v4322_v63 = vpop.f32.mrb[61].mxu0 }
 0x27e   : > { %4584 = vst [vmem:[%s7141_s22 + $0x88] sm:$0xff] %v5287_v46  ;;  %v5423_v30 = vadd.f32 %v5422_v34, %v4322_v63  ;;  %v4324_v8 = vpop.f32.mrb[62].mxu0 }
 0x27f   : > { %v4395_v19 = vmax.f32 %v5419_v36, 0.0  ;;  %v5427_v41 = vadd.f32 %v5426_v55, %v4324_v8  ;;  %v4326_v24 = vpop.f32.mrb[63].mxu0  ;;  %v4177_v58 = vpop.f32.mrb[68].mxu1 }
 0x280   : > { %v4396_v14 = vmax.f32 %v5423_v30, 0.0  ;;  %v5431_v32 = vadd.f32 %v5430_v56, %v4326_v24  ;;  %v5450_v38 = vadd.f32 %v7224_v47, %v4177_v58  ;;  %v4179_v21 = vpop.f32.mrb[69].mxu1 }
 0x281   : > { %v4397_v40 = vmax.f32 %v5427_v41, 0.0  ;;  %v5454_v60 = vadd.f32 %v7230_v44, %v4179_v21  ;;  %v4181_v23 = vpop.f32.mrb[70].mxu1 }
 0x282   : > { %v5288_v48 = vpack.c.bf16 %v4396_v14, %v4395_v19  ;;  %v4398_v31 = vmax.f32 %v5431_v32, 0.0  ;;  %v5458_v15 = vadd.f32 %v7236_v45, %v4181_v23  ;;  %v4183_v62 = vpop.f32.mrb[71].mxu1 }
 0x283   : > { %v5462_v10 = vadd.f32 %v7239_v9, %v4183_v62 }
 0x284   : > { %4585 = vst [vmem:[%s7141_s22 + $0x90] sm:$0xff] %v5288_v48  ;;  %v5289_v27 = vpack.c.bf16 %v4398_v31, %v4397_v40  ;;  %v4330_v59 = vpop.f32.mrb[64].mxu0 }
 0x285   : > { %v5435_v26 = vadd.f32 %v5434_v42, %v4330_v59  ;;  %v4332_v54 = vpop.f32.mrb[65].mxu0 }
 0x286   : > { %4586 = vst [vmem:[%s7141_s22 + $0x98] sm:$0xff] %v5289_v27  ;;  %v5439_v5 = vadd.f32 %v5438_v12, %v4332_v54  ;;  %v4334_v33 = vpop.f32.mrb[66].mxu0 }
 0x287   : > { %v4399_v53 = vmax.f32 %v5435_v26, 0.0  ;;  %v5443_v47 = vadd.f32 %v5442_v29, %v4334_v33  ;;  %v4336_v34 = vpop.f32.mrb[67].mxu0  ;;  %v4187_v25 = vpop.f32.mrb[72].mxu1 }
 0x288   : > { %v4400_v35 = vmax.f32 %v5439_v5, 0.0  ;;  %v5447_v44 = vadd.f32 %v5446_v57, %v4336_v34  ;;  %v5466_v45 = vadd.f32 %v7250_v7, %v4187_v25  ;;  %v4189_v6 = vpop.f32.mrb[73].mxu1 }
 0x289   : > { %v4401_v16 = vmax.f32 %v5443_v47, 0.0  ;;  %v5470_v11 = vadd.f32 %v7256_v51, %v4189_v6  ;;  %v4191_v9 = vpop.f32.mrb[74].mxu1 }
 0x28a   : > { %v5290_v55 = vpack.c.bf16 %v4400_v35, %v4399_v53  ;;  %v4402_v49 = vmax.f32 %v5447_v44, 0.0  ;;  %v5474_v4 = vadd.f32 %v7262_v0, %v4191_v9  ;;  %v4193_v50 = vpop.f32.mrb[75].mxu1 }
 0x28b   : > { %v5478_v22 = vadd.f32 %v7265_v3, %v4193_v50 }
 0x28c   : > { %4587 = vst [vmem:[%s7141_s22 + $0xa0] sm:$0xff] %v5290_v55  ;;  %v5291_v56 = vpack.c.bf16 %v4402_v49, %v4401_v16  ;;  %v4340_v37 = vpop.f32.mrb[68].mxu0 }
 0x28d   : > { %v5451_v1 = vadd.f32 %v5450_v38, %v4340_v37  ;;  %v4342_v61 = vpop.f32.mrb[69].mxu0 }
 0x28e   : > { %4588 = vst [vmem:[%s7141_s22 + $0xa8] sm:$0xff] %v5291_v56  ;;  %v5455_v20 = vadd.f32 %v5454_v60, %v4342_v61  ;;  %v4344_v28 = vpop.f32.mrb[70].mxu0 }
 0x28f   : > { %v4403_v7 = vmax.f32 %v5451_v1, 0.0  ;;  %v5459_v17 = vadd.f32 %v5458_v15, %v4344_v28  ;;  %v4346_v13 = vpop.f32.mrb[71].mxu0 }
 0x290   : > { %v4404_v51 = vmax.f32 %v5455_v20, 0.0  ;;  %v5463_v39 = vadd.f32 %v5462_v10, %v4346_v13 }
 0x291   : > { %v4405_v42 = vmax.f32 %v5459_v17, 0.0 }
 0x292   : > { %v5292_v18 = vpack.c.bf16 %v4404_v51, %v4403_v7  ;;  %v4406_v0 = vmax.f32 %v5463_v39, 0.0 }
 0x294   : > { %4589 = vst [vmem:[%s7141_s22 + $0xb0] sm:$0xff] %v5292_v18  ;;  %v5293_v12 = vpack.c.bf16 %v4406_v0, %v4405_v42  ;;  %v4350_v2 = vpop.f32.mrb[72].mxu0 }
 0x295   : > { %v5467_v46 = vadd.f32 %v5466_v45, %v4350_v2  ;;  %v4352_v43 = vpop.f32.mrb[73].mxu0 }
 0x296   : > { %4590 = vst [vmem:[%s7141_s22 + $0xb8] sm:$0xff] %v5293_v12  ;;  %v5471_v3 = vadd.f32 %v5470_v11, %v4352_v43  ;;  %v4354_v29 = vpop.f32.mrb[74].mxu0 }
 0x297   : > { %v4407_v52 = vmax.f32 %v5467_v46, 0.0  ;;  %v5475_v36 = vadd.f32 %v5474_v4, %v4354_v29  ;;  %v4356_v63 = vpop.f32.mrb[75].mxu0 }
 0x298   : > { %v4408_v57 = vmax.f32 %v5471_v3, 0.0  ;;  %v5479_v30 = vadd.f32 %v5478_v22, %v4356_v63 }
 0x299   : > { %v4409_v8 = vmax.f32 %v5475_v36, 0.0 }
 0x29a   : > { %v5294_v19 = vpack.c.bf16 %v4408_v57, %v4407_v52  ;;  %v4410_v41 = vmax.f32 %v5479_v30, 0.0 }
 0x29c   : > { %4591 = vst [vmem:[%s7141_s22 + $0xc0] sm:$0xff] %v5294_v19  ;;  %v5295_v24 = vpack.c.bf16 %v4410_v41, %v4409_v8 }
 0x29e   : > { %4592 = vst [vmem:[%s7141_s22 + $0xc8] sm:$0xff] %v5295_v24 }
 0x29f   : > { %6066 = shalt.err (!%p6063_p2)
}
 0x2a0   : > { %s6067_s9 = scalar_lea.hbm %s7318_s26, 3328  ;;  %s6071_s29 = scalar_lea.hbm %s7374_s3, 6656 }
 0x2a1   : > { %p6068_p0 = scmp.ne.s32.totalorder %s7318_s26, %s6067_s9  ;;  %p6072_p6 = scmp.lt.u32.totalorder %s7318_s26, %s7374_s3 }
 0x2a2   : > { %p6073_p7 = scmp.lt.u32.totalorder %s6071_s29, %s6067_s9  ;;  %p6075_p8 = scmp.lt.u32.totalorder %s6067_s9, %s7318_s26 }
 0x2a3   : > { %p6069_p4 = pnand %p6068_p0, %p7409_p12 }
 0x2a4   : > { %p6074_p11 = por %p6073_p7, %p6072_p6 }
 0x2a5   : > { %p6070_p13 = pneg %p6069_p4 }
 0x2a6   : > { %p6076_p1 = por %p6075_p8, %p6074_p11 }
 0x2a8   : > { %p6077_p10 = pnand %p6076_p1, %p6070_p13 }
 0x2aa   : > { %6080 = shalt.err (!%p6077_p10)
}
 0x2ab   : > { %s6150_s22 = smov 128   ;;  %s6151_s24 = smov 8  }
 0x2ac   : > { %5603 = dma.vmem_to_hbm [thread:$0]  (%p7409_p12), %s7320_s28, 3328, %s7318_s26, %s4594_s15, %s6150_s22, %s6150_s22, %s6151_s24  }
 0x2ad PF: > { %s4625_s6 = sand.u32 1, %s6119_s12   ;;  %p7410_p3 = scmp.ne.s32.totalorder %s7382_s23, 0 }
 0x2ae   : > { %p7411_p5 = scmp.ge.s32.totalorder %s6139_s17, 2  ;;  %s4626_s8 = scalar_lea.sflag [#allocation5], %s4625_s6 }
 0x2b0   : > { %p5617_p9 = pnand %p7411_p5, %p7410_p3 }
 0x2b2   : > { %6114 = dma.done.wait (!%p5617_p9), %s4626_s8, 3328  }
 0x2b3   : > { %6116 = vsyncadd (!%p5617_p9), %s4626_s8, 4294963968  ;;  %s20_s17 = sadd.s32 1, %s6139_s17   ;;  %s7412_s12 = smov %s6123_s13 }
 0x2b4   : > { %p17_p2 = scmp.ge.s32.totalorder %s20_s17, 4   ;;  %s7413_s13 = smov %s6127_s14 }
 0x2b5   : > { %s7414_s14 = smov %s6317_s30  ;;  %s7415_s15 = smov %s6135_s16 }
 0x2b6   : > { %s7416_s16 = smov %s7418_s11  ;;  %19 = sbr.rel (!%p17_p2) target bundleno = 7 (0x7), region = 88 }
 0x2bd   :  { %4631 = vsyncpa [#allocation4], 1 }
 0x2be   :  { %4633 = vsyncpa [#allocation4 + $0x1], 1 }
 0x2bf   :  { %4634 = vsyncpa [#allocation7], 1 }
 0x2c0   :  { %4635 = vsyncpa [#allocation5], 1 }
 0x2c1   :  { %4637 = vsyncpa [#allocation5 + $0x1], 1 }

</bundles_post_ra>
